<compile_context>
chip_gen: v5e
topology: v5e:2x2
jax: 0.10.0
libtpu: 0.0.40
codegen_flags: <defaults>
</compile_context>

<pallas_src>
import jax
import jax.numpy as jnp
from jax import lax
from jax.experimental import pallas as pl
from jax.experimental.pallas import tpu as pltpu

N_LAYERS = 17                                    # input + 15 hidden + output
TRUE_DIMS = [(1, 5)] + [(5, 5)] * 15 + [(5, 1)]  # true (fan_in, fan_out) per layer
HID = 5
LANES = 128                                      # lane width (batch on lanes)
SUBLANES = 8                                     # f32 sublanes per vreg
N_W = sum(fi * fo for fi, fo in TRUE_DIMS)       # 385 weight scalars
N_B = sum(fo for _, fo in TRUE_DIMS)             # 81 bias scalars


def mlp_kernel(x_ref, w_ref, b_ref, o_ref):
    """x_ref/o_ref: (block_rows, 128) f32 VMEM tiles (batch on sublanes x lanes).
    w_ref: (385,) f32 SMEM, row-major (fan_in, fan_out) per layer, concatenated.
    b_ref: (81,)  f32 SMEM, per-layer biases concatenated.
    All layers unrolled into scalar-broadcast mul/add/max on the VPU."""
    # Hoist all SMEM scalar loads out of the per-slab loop (loop-invariant).
    w = [w_ref[i] for i in range(N_W)]
    b = [b_ref[i] for i in range(N_B)]

    def run_layers(xb):
        # Layer 0: 1 -> 5, ReLU.
        h = [jnp.maximum(xb * w[j] + b[j], 0.0) for j in range(HID)]
        w_off, b_off = HID, HID
        # 15 hidden layers: 5 -> 5, ReLU.  Tree accumulation (shorter dep chain).
        for _ in range(15):
            nh = []
            for j in range(HID):
                p01 = h[0] * w[w_off + j] + h[1] * w[w_off + HID + j]
                p23 = h[2] * w[w_off + 2 * HID + j] + h[3] * w[w_off + 3 * HID + j]
                p4b = h[4] * w[w_off + 4 * HID + j] + b[b_off + j]
                nh.append(jnp.maximum((p01 + p23) + p4b, 0.0))
            h = nh
            w_off += HID * HID
            b_off += HID
        # Output layer: 5 -> 1, no ReLU.
        p01 = h[0] * w[w_off + 0] + h[1] * w[w_off + 1]
        p23 = h[2] * w[w_off + 2] + h[3] * w[w_off + 3]
        p4b = h[4] * w[w_off + 4] + b[b_off]
        return (p01 + p23) + p4b

    block_rows = x_ref.shape[0]
    n_slabs = block_rows // SUBLANES

    if n_slabs == 1:
        # Single full vreg: no loop needed.
        o_ref[...] = run_layers(x_ref[...])
    else:
        # Process one (8,128) vreg slab at a time to cap live-vreg pressure.
        def slab_body(s, carry):
            r0 = pl.multiple_of(s * SUBLANES, SUBLANES)
            o_ref[pl.ds(r0, SUBLANES), :] = run_layers(x_ref[pl.ds(r0, SUBLANES), :])
            return carry

        lax.fori_loop(0, n_slabs, slab_body, 0)


def mlp_forward(x, w_flat, b_flat, *, tile_rows=512):
    """x: (N, 1) float32 -> (N, 1) float32.  tile_rows: per-grid-step rows for
    large batches (must be a multiple of 8); each row holds 128 samples."""
    assert tile_rows % SUBLANES == 0
    n = x.shape[0]

    # Pad batch so rows is a whole number of (8,128) vregs.
    rows = pl.cdiv(n, LANES)
    rows = ((rows + SUBLANES - 1) // SUBLANES) * SUBLANES
    if rows <= tile_rows:
        block_rows = rows                 # single block, grid of 1
    else:
        block_rows = tile_rows            # lane-dense row tiles, pipelined DMA
        rows = ((rows + tile_rows - 1) // tile_rows) * tile_rows
    grid = (rows // block_rows,)
    n_pad = rows * LANES

    # Lane-dense layout; jnp.pad avoids an extra scatter op in the wrapper.
    x_lanes = jnp.pad(x[:, 0], (0, n_pad - n)).reshape(rows, LANES)

    out = pl.pallas_call(
        mlp_kernel,
        out_shape=jax.ShapeDtypeStruct((rows, LANES), jnp.float32),
        grid=grid,
        in_specs=[
            pl.BlockSpec((block_rows, LANES), lambda i: (i, 0)),        # activations
            pl.BlockSpec(memory_space=pltpu.MemorySpace.SMEM),          # weights (flat)
            pl.BlockSpec(memory_space=pltpu.MemorySpace.SMEM),          # biases  (flat)
        ],
        out_specs=pl.BlockSpec((block_rows, LANES), lambda i: (i, 0)),
        compiler_params=pltpu.CompilerParams(
            # Independent row tiles: lets v7x's two TensorCores split the grid.
            dimension_semantics=("parallel",),
        ),
    )(x_lanes, w_flat, b_flat)

    return out.reshape(n_pad)[:n].reshape(n, 1)


def init_params(key):
    """Deterministic init mimicking torch.nn.Linear defaults: U(-1/sqrt(fan_in), ...)."""
    ws, bs = [], []
    for fin, fout in TRUE_DIMS:
        key, kw, kb = jax.random.split(key, 3)
        bound = 1.0 / (fin ** 0.5)
        ws.append(jax.random.uniform(kw, (fin, fout), jnp.float32, -bound, bound))
        bs.append(jax.random.uniform(kb, (fout,), jnp.float32, -bound, bound))
    return ws, bs


def flatten_params(ws, bs):
    """Flatten true-size weights/biases to 1-D (row-major (fin, fout)) for SMEM."""
    w_flat = jnp.concatenate([w.reshape(-1) for w in ws])   # (385,)
    b_flat = jnp.concatenate([b.reshape(-1) for b in bs])   # (81,)
    return w_flat, b_flat


def reference_forward(x, ws, bs):
    """Pure-JAX reference for a correctness check."""
    h = x
    for l, (w, b) in enumerate(zip(ws, bs)):
        h = h @ w + b
        if l < N_LAYERS - 1:
            h = jnp.maximum(h, 0.0)
    return h


if __name__ == "__main__":
    key = jax.random.PRNGKey(0)
    key, kx, kx2 = jax.random.split(key, 3)

    ws, bs = init_params(key)
    w_flat, b_flat = flatten_params(ws, bs)

    # Original script feeds 75 scalar samples, shape (75, 1): single (8,128) block.
    x = jax.random.normal(kx, (75, 1), jnp.float32)
    y = jax.block_until_ready(mlp_forward(x, w_flat, b_flat))
    y_ref = reference_forward(x, ws, bs)
    assert y.shape == (75, 1)
    assert jnp.allclose(y, y_ref, atol=1e-5, rtol=1e-5)

    # Secondary check exercising the gridded path (multiple row tiles + the
    # in-kernel 8-row slab loop) with a small tile size.
    x_big = jax.random.normal(kx2, (5000, 1), jnp.float32)
    y_big = jax.block_until_ready(mlp_forward(x_big, w_flat, b_flat, tile_rows=16))
    y_big_ref = reference_forward(x_big, ws, bs)
    assert y_big.shape == (5000, 1)
    assert jnp.allclose(y_big, y_big_ref, atol=1e-5, rtol=1e-5)

    print("KERNEL_OK")
</pallas_src>

<mosaic_0001>
module attributes {stable_mosaic.version = 11 : i64} {
  func.func @mlp_kernel(%arg0: i32, %arg1: memref<8x128xf32, #tpu.memory_space<vmem>>, %arg2: memref<385xf32, #tpu.memory_space<smem>>, %arg3: memref<81xf32, #tpu.memory_space<smem>>, %arg4: memref<8x128xf32, #tpu.memory_space<vmem>>) attributes {dimension_semantics = [#tpu.dimension_semantics<parallel>], iteration_bounds = array<i64: 1>, scalar_prefetch = 0 : i64, scratch_operands = 0 : i64, tpu.core_type = #tpu.core_type<tc>, window_params = [{transform_indices = @transform_0, window_bounds = array<i64: 8, 128>}, {transform_indices = @transform_1, window_bounds = array<i64: 385>}, {transform_indices = @transform_2, window_bounds = array<i64: 81>}, {transform_indices = @transform_3, window_bounds = array<i64: 8, 128>}]} {
    %c0 = arith.constant 0 : index
    %0 = memref.load %arg2[%c0] : memref<385xf32, #tpu.memory_space<smem>>
    %c1 = arith.constant 1 : index
    %1 = memref.load %arg2[%c1] : memref<385xf32, #tpu.memory_space<smem>>
    %c2 = arith.constant 2 : index
    %2 = memref.load %arg2[%c2] : memref<385xf32, #tpu.memory_space<smem>>
    %c3 = arith.constant 3 : index
    %3 = memref.load %arg2[%c3] : memref<385xf32, #tpu.memory_space<smem>>
    %c4 = arith.constant 4 : index
    %4 = memref.load %arg2[%c4] : memref<385xf32, #tpu.memory_space<smem>>
    %c5 = arith.constant 5 : index
    %5 = memref.load %arg2[%c5] : memref<385xf32, #tpu.memory_space<smem>>
    %c6 = arith.constant 6 : index
    %6 = memref.load %arg2[%c6] : memref<385xf32, #tpu.memory_space<smem>>
    %c7 = arith.constant 7 : index
    %7 = memref.load %arg2[%c7] : memref<385xf32, #tpu.memory_space<smem>>
    %c8 = arith.constant 8 : index
    %8 = memref.load %arg2[%c8] : memref<385xf32, #tpu.memory_space<smem>>
    %c9 = arith.constant 9 : index
    %9 = memref.load %arg2[%c9] : memref<385xf32, #tpu.memory_space<smem>>
    %c10 = arith.constant 10 : index
    %10 = memref.load %arg2[%c10] : memref<385xf32, #tpu.memory_space<smem>>
    %c11 = arith.constant 11 : index
    %11 = memref.load %arg2[%c11] : memref<385xf32, #tpu.memory_space<smem>>
    %c12 = arith.constant 12 : index
    %12 = memref.load %arg2[%c12] : memref<385xf32, #tpu.memory_space<smem>>
    %c13 = arith.constant 13 : index
    %13 = memref.load %arg2[%c13] : memref<385xf32, #tpu.memory_space<smem>>
    %c14 = arith.constant 14 : index
    %14 = memref.load %arg2[%c14] : memref<385xf32, #tpu.memory_space<smem>>
    %c15 = arith.constant 15 : index
    %15 = memref.load %arg2[%c15] : memref<385xf32, #tpu.memory_space<smem>>
    %c16 = arith.constant 16 : index
    %16 = memref.load %arg2[%c16] : memref<385xf32, #tpu.memory_space<smem>>
    %c17 = arith.constant 17 : index
    %17 = memref.load %arg2[%c17] : memref<385xf32, #tpu.memory_space<smem>>
    %c18 = arith.constant 18 : index
    %18 = memref.load %arg2[%c18] : memref<385xf32, #tpu.memory_space<smem>>
    %c19 = arith.constant 19 : index
    %19 = memref.load %arg2[%c19] : memref<385xf32, #tpu.memory_space<smem>>
    %c20 = arith.constant 20 : index
    %20 = memref.load %arg2[%c20] : memref<385xf32, #tpu.memory_space<smem>>
    %c21 = arith.constant 21 : index
    %21 = memref.load %arg2[%c21] : memref<385xf32, #tpu.memory_space<smem>>
    %c22 = arith.constant 22 : index
    %22 = memref.load %arg2[%c22] : memref<385xf32, #tpu.memory_space<smem>>
    %c23 = arith.constant 23 : index
    %23 = memref.load %arg2[%c23] : memref<385xf32, #tpu.memory_space<smem>>
    %c24 = arith.constant 24 : index
    %24 = memref.load %arg2[%c24] : memref<385xf32, #tpu.memory_space<smem>>
    %c25 = arith.constant 25 : index
    %25 = memref.load %arg2[%c25] : memref<385xf32, #tpu.memory_space<smem>>
    %c26 = arith.constant 26 : index
    %26 = memref.load %arg2[%c26] : memref<385xf32, #tpu.memory_space<smem>>
    %c27 = arith.constant 27 : index
    %27 = memref.load %arg2[%c27] : memref<385xf32, #tpu.memory_space<smem>>
    %c28 = arith.constant 28 : index
    %28 = memref.load %arg2[%c28] : memref<385xf32, #tpu.memory_space<smem>>
    %c29 = arith.constant 29 : index
    %29 = memref.load %arg2[%c29] : memref<385xf32, #tpu.memory_space<smem>>
    %c30 = arith.constant 30 : index
    %30 = memref.load %arg2[%c30] : memref<385xf32, #tpu.memory_space<smem>>
    %c31 = arith.constant 31 : index
    %31 = memref.load %arg2[%c31] : memref<385xf32, #tpu.memory_space<smem>>
    %c32 = arith.constant 32 : index
    %32 = memref.load %arg2[%c32] : memref<385xf32, #tpu.memory_space<smem>>
    %c33 = arith.constant 33 : index
    %33 = memref.load %arg2[%c33] : memref<385xf32, #tpu.memory_space<smem>>
    %c34 = arith.constant 34 : index
    %34 = memref.load %arg2[%c34] : memref<385xf32, #tpu.memory_space<smem>>
    %c35 = arith.constant 35 : index
    %35 = memref.load %arg2[%c35] : memref<385xf32, #tpu.memory_space<smem>>
    %c36 = arith.constant 36 : index
    %36 = memref.load %arg2[%c36] : memref<385xf32, #tpu.memory_space<smem>>
    %c37 = arith.constant 37 : index
    %37 = memref.load %arg2[%c37] : memref<385xf32, #tpu.memory_space<smem>>
    %c38 = arith.constant 38 : index
    %38 = memref.load %arg2[%c38] : memref<385xf32, #tpu.memory_space<smem>>
    %c39 = arith.constant 39 : index
    %39 = memref.load %arg2[%c39] : memref<385xf32, #tpu.memory_space<smem>>
    %c40 = arith.constant 40 : index
    %40 = memref.load %arg2[%c40] : memref<385xf32, #tpu.memory_space<smem>>
    %c41 = arith.constant 41 : index
    %41 = memref.load %arg2[%c41] : memref<385xf32, #tpu.memory_space<smem>>
    %c42 = arith.constant 42 : index
    %42 = memref.load %arg2[%c42] : memref<385xf32, #tpu.memory_space<smem>>
    %c43 = arith.constant 43 : index
    %43 = memref.load %arg2[%c43] : memref<385xf32, #tpu.memory_space<smem>>
    %c44 = arith.constant 44 : index
    %44 = memref.load %arg2[%c44] : memref<385xf32, #tpu.memory_space<smem>>
    %c45 = arith.constant 45 : index
    %45 = memref.load %arg2[%c45] : memref<385xf32, #tpu.memory_space<smem>>
    %c46 = arith.constant 46 : index
    %46 = memref.load %arg2[%c46] : memref<385xf32, #tpu.memory_space<smem>>
    %c47 = arith.constant 47 : index
    %47 = memref.load %arg2[%c47] : memref<385xf32, #tpu.memory_space<smem>>
    %c48 = arith.constant 48 : index
    %48 = memref.load %arg2[%c48] : memref<385xf32, #tpu.memory_space<smem>>
    %c49 = arith.constant 49 : index
    %49 = memref.load %arg2[%c49] : memref<385xf32, #tpu.memory_space<smem>>
    %c50 = arith.constant 50 : index
    %50 = memref.load %arg2[%c50] : memref<385xf32, #tpu.memory_space<smem>>
    %c51 = arith.constant 51 : index
    %51 = memref.load %arg2[%c51] : memref<385xf32, #tpu.memory_space<smem>>
    %c52 = arith.constant 52 : index
    %52 = memref.load %arg2[%c52] : memref<385xf32, #tpu.memory_space<smem>>
    %c53 = arith.constant 53 : index
    %53 = memref.load %arg2[%c53] : memref<385xf32, #tpu.memory_space<smem>>
    %c54 = arith.constant 54 : index
    %54 = memref.load %arg2[%c54] : memref<385xf32, #tpu.memory_space<smem>>
    %c55 = arith.constant 55 : index
    %55 = memref.load %arg2[%c55] : memref<385xf32, #tpu.memory_space<smem>>
    %c56 = arith.constant 56 : index
    %56 = memref.load %arg2[%c56] : memref<385xf32, #tpu.memory_space<smem>>
    %c57 = arith.constant 57 : index
    %57 = memref.load %arg2[%c57] : memref<385xf32, #tpu.memory_space<smem>>
    %c58 = arith.constant 58 : index
    %58 = memref.load %arg2[%c58] : memref<385xf32, #tpu.memory_space<smem>>
    %c59 = arith.constant 59 : index
    %59 = memref.load %arg2[%c59] : memref<385xf32, #tpu.memory_space<smem>>
    %c60 = arith.constant 60 : index
    %60 = memref.load %arg2[%c60] : memref<385xf32, #tpu.memory_space<smem>>
    %c61 = arith.constant 61 : index
    %61 = memref.load %arg2[%c61] : memref<385xf32, #tpu.memory_space<smem>>
    %c62 = arith.constant 62 : index
    %62 = memref.load %arg2[%c62] : memref<385xf32, #tpu.memory_space<smem>>
    %c63 = arith.constant 63 : index
    %63 = memref.load %arg2[%c63] : memref<385xf32, #tpu.memory_space<smem>>
    %c64 = arith.constant 64 : index
    %64 = memref.load %arg2[%c64] : memref<385xf32, #tpu.memory_space<smem>>
    %c65 = arith.constant 65 : index
    %65 = memref.load %arg2[%c65] : memref<385xf32, #tpu.memory_space<smem>>
    %c66 = arith.constant 66 : index
    %66 = memref.load %arg2[%c66] : memref<385xf32, #tpu.memory_space<smem>>
    %c67 = arith.constant 67 : index
    %67 = memref.load %arg2[%c67] : memref<385xf32, #tpu.memory_space<smem>>
    %c68 = arith.constant 68 : index
    %68 = memref.load %arg2[%c68] : memref<385xf32, #tpu.memory_space<smem>>
    %c69 = arith.constant 69 : index
    %69 = memref.load %arg2[%c69] : memref<385xf32, #tpu.memory_space<smem>>
    %c70 = arith.constant 70 : index
    %70 = memref.load %arg2[%c70] : memref<385xf32, #tpu.memory_space<smem>>
    %c71 = arith.constant 71 : index
    %71 = memref.load %arg2[%c71] : memref<385xf32, #tpu.memory_space<smem>>
    %c72 = arith.constant 72 : index
    %72 = memref.load %arg2[%c72] : memref<385xf32, #tpu.memory_space<smem>>
    %c73 = arith.constant 73 : index
    %73 = memref.load %arg2[%c73] : memref<385xf32, #tpu.memory_space<smem>>
    %c74 = arith.constant 74 : index
    %74 = memref.load %arg2[%c74] : memref<385xf32, #tpu.memory_space<smem>>
    %c75 = arith.constant 75 : index
    %75 = memref.load %arg2[%c75] : memref<385xf32, #tpu.memory_space<smem>>
    %c76 = arith.constant 76 : index
    %76 = memref.load %arg2[%c76] : memref<385xf32, #tpu.memory_space<smem>>
    %c77 = arith.constant 77 : index
    %77 = memref.load %arg2[%c77] : memref<385xf32, #tpu.memory_space<smem>>
    %c78 = arith.constant 78 : index
    %78 = memref.load %arg2[%c78] : memref<385xf32, #tpu.memory_space<smem>>
    %c79 = arith.constant 79 : index
    %79 = memref.load %arg2[%c79] : memref<385xf32, #tpu.memory_space<smem>>
    %c80 = arith.constant 80 : index
    %80 = memref.load %arg2[%c80] : memref<385xf32, #tpu.memory_space<smem>>
    %c81 = arith.constant 81 : index
    %81 = memref.load %arg2[%c81] : memref<385xf32, #tpu.memory_space<smem>>
    %c82 = arith.constant 82 : index
    %82 = memref.load %arg2[%c82] : memref<385xf32, #tpu.memory_space<smem>>
    %c83 = arith.constant 83 : index
    %83 = memref.load %arg2[%c83] : memref<385xf32, #tpu.memory_space<smem>>
    %c84 = arith.constant 84 : index
    %84 = memref.load %arg2[%c84] : memref<385xf32, #tpu.memory_space<smem>>
    %c85 = arith.constant 85 : index
    %85 = memref.load %arg2[%c85] : memref<385xf32, #tpu.memory_space<smem>>
    %c86 = arith.constant 86 : index
    %86 = memref.load %arg2[%c86] : memref<385xf32, #tpu.memory_space<smem>>
    %c87 = arith.constant 87 : index
    %87 = memref.load %arg2[%c87] : memref<385xf32, #tpu.memory_space<smem>>
    %c88 = arith.constant 88 : index
    %88 = memref.load %arg2[%c88] : memref<385xf32, #tpu.memory_space<smem>>
    %c89 = arith.constant 89 : index
    %89 = memref.load %arg2[%c89] : memref<385xf32, #tpu.memory_space<smem>>
    %c90 = arith.constant 90 : index
    %90 = memref.load %arg2[%c90] : memref<385xf32, #tpu.memory_space<smem>>
    %c91 = arith.constant 91 : index
    %91 = memref.load %arg2[%c91] : memref<385xf32, #tpu.memory_space<smem>>
    %c92 = arith.constant 92 : index
    %92 = memref.load %arg2[%c92] : memref<385xf32, #tpu.memory_space<smem>>
    %c93 = arith.constant 93 : index
    %93 = memref.load %arg2[%c93] : memref<385xf32, #tpu.memory_space<smem>>
    %c94 = arith.constant 94 : index
    %94 = memref.load %arg2[%c94] : memref<385xf32, #tpu.memory_space<smem>>
    %c95 = arith.constant 95 : index
    %95 = memref.load %arg2[%c95] : memref<385xf32, #tpu.memory_space<smem>>
    %c96 = arith.constant 96 : index
    %96 = memref.load %arg2[%c96] : memref<385xf32, #tpu.memory_space<smem>>
    %c97 = arith.constant 97 : index
    %97 = memref.load %arg2[%c97] : memref<385xf32, #tpu.memory_space<smem>>
    %c98 = arith.constant 98 : index
    %98 = memref.load %arg2[%c98] : memref<385xf32, #tpu.memory_space<smem>>
    %c99 = arith.constant 99 : index
    %99 = memref.load %arg2[%c99] : memref<385xf32, #tpu.memory_space<smem>>
    %c100 = arith.constant 100 : index
    %100 = memref.load %arg2[%c100] : memref<385xf32, #tpu.memory_space<smem>>
    %c101 = arith.constant 101 : index
    %101 = memref.load %arg2[%c101] : memref<385xf32, #tpu.memory_space<smem>>
    %c102 = arith.constant 102 : index
    %102 = memref.load %arg2[%c102] : memref<385xf32, #tpu.memory_space<smem>>
    %c103 = arith.constant 103 : index
    %103 = memref.load %arg2[%c103] : memref<385xf32, #tpu.memory_space<smem>>
    %c104 = arith.constant 104 : index
    %104 = memref.load %arg2[%c104] : memref<385xf32, #tpu.memory_space<smem>>
    %c105 = arith.constant 105 : index
    %105 = memref.load %arg2[%c105] : memref<385xf32, #tpu.memory_space<smem>>
    %c106 = arith.constant 106 : index
    %106 = memref.load %arg2[%c106] : memref<385xf32, #tpu.memory_space<smem>>
    %c107 = arith.constant 107 : index
    %107 = memref.load %arg2[%c107] : memref<385xf32, #tpu.memory_space<smem>>
    %c108 = arith.constant 108 : index
    %108 = memref.load %arg2[%c108] : memref<385xf32, #tpu.memory_space<smem>>
    %c109 = arith.constant 109 : index
    %109 = memref.load %arg2[%c109] : memref<385xf32, #tpu.memory_space<smem>>
    %c110 = arith.constant 110 : index
    %110 = memref.load %arg2[%c110] : memref<385xf32, #tpu.memory_space<smem>>
    %c111 = arith.constant 111 : index
    %111 = memref.load %arg2[%c111] : memref<385xf32, #tpu.memory_space<smem>>
    %c112 = arith.constant 112 : index
    %112 = memref.load %arg2[%c112] : memref<385xf32, #tpu.memory_space<smem>>
    %c113 = arith.constant 113 : index
    %113 = memref.load %arg2[%c113] : memref<385xf32, #tpu.memory_space<smem>>
    %c114 = arith.constant 114 : index
    %114 = memref.load %arg2[%c114] : memref<385xf32, #tpu.memory_space<smem>>
    %c115 = arith.constant 115 : index
    %115 = memref.load %arg2[%c115] : memref<385xf32, #tpu.memory_space<smem>>
    %c116 = arith.constant 116 : index
    %116 = memref.load %arg2[%c116] : memref<385xf32, #tpu.memory_space<smem>>
    %c117 = arith.constant 117 : index
    %117 = memref.load %arg2[%c117] : memref<385xf32, #tpu.memory_space<smem>>
    %c118 = arith.constant 118 : index
    %118 = memref.load %arg2[%c118] : memref<385xf32, #tpu.memory_space<smem>>
    %c119 = arith.constant 119 : index
    %119 = memref.load %arg2[%c119] : memref<385xf32, #tpu.memory_space<smem>>
    %c120 = arith.constant 120 : index
    %120 = memref.load %arg2[%c120] : memref<385xf32, #tpu.memory_space<smem>>
    %c121 = arith.constant 121 : index
    %121 = memref.load %arg2[%c121] : memref<385xf32, #tpu.memory_space<smem>>
    %c122 = arith.constant 122 : index
    %122 = memref.load %arg2[%c122] : memref<385xf32, #tpu.memory_space<smem>>
    %c123 = arith.constant 123 : index
    %123 = memref.load %arg2[%c123] : memref<385xf32, #tpu.memory_space<smem>>
    %c124 = arith.constant 124 : index
    %124 = memref.load %arg2[%c124] : memref<385xf32, #tpu.memory_space<smem>>
    %c125 = arith.constant 125 : index
    %125 = memref.load %arg2[%c125] : memref<385xf32, #tpu.memory_space<smem>>
    %c126 = arith.constant 126 : index
    %126 = memref.load %arg2[%c126] : memref<385xf32, #tpu.memory_space<smem>>
    %c127 = arith.constant 127 : index
    %127 = memref.load %arg2[%c127] : memref<385xf32, #tpu.memory_space<smem>>
    %c128 = arith.constant 128 : index
    %128 = memref.load %arg2[%c128] : memref<385xf32, #tpu.memory_space<smem>>
    %c129 = arith.constant 129 : index
    %129 = memref.load %arg2[%c129] : memref<385xf32, #tpu.memory_space<smem>>
    %c130 = arith.constant 130 : index
    %130 = memref.load %arg2[%c130] : memref<385xf32, #tpu.memory_space<smem>>
    %c131 = arith.constant 131 : index
    %131 = memref.load %arg2[%c131] : memref<385xf32, #tpu.memory_space<smem>>
    %c132 = arith.constant 132 : index
    %132 = memref.load %arg2[%c132] : memref<385xf32, #tpu.memory_space<smem>>
    %c133 = arith.constant 133 : index
    %133 = memref.load %arg2[%c133] : memref<385xf32, #tpu.memory_space<smem>>
    %c134 = arith.constant 134 : index
    %134 = memref.load %arg2[%c134] : memref<385xf32, #tpu.memory_space<smem>>
    %c135 = arith.constant 135 : index
    %135 = memref.load %arg2[%c135] : memref<385xf32, #tpu.memory_space<smem>>
    %c136 = arith.constant 136 : index
    %136 = memref.load %arg2[%c136] : memref<385xf32, #tpu.memory_space<smem>>
    %c137 = arith.constant 137 : index
    %137 = memref.load %arg2[%c137] : memref<385xf32, #tpu.memory_space<smem>>
    %c138 = arith.constant 138 : index
    %138 = memref.load %arg2[%c138] : memref<385xf32, #tpu.memory_space<smem>>
    %c139 = arith.constant 139 : index
    %139 = memref.load %arg2[%c139] : memref<385xf32, #tpu.memory_space<smem>>
    %c140 = arith.constant 140 : index
    %140 = memref.load %arg2[%c140] : memref<385xf32, #tpu.memory_space<smem>>
    %c141 = arith.constant 141 : index
    %141 = memref.load %arg2[%c141] : memref<385xf32, #tpu.memory_space<smem>>
    %c142 = arith.constant 142 : index
    %142 = memref.load %arg2[%c142] : memref<385xf32, #tpu.memory_space<smem>>
    %c143 = arith.constant 143 : index
    %143 = memref.load %arg2[%c143] : memref<385xf32, #tpu.memory_space<smem>>
    %c144 = arith.constant 144 : index
    %144 = memref.load %arg2[%c144] : memref<385xf32, #tpu.memory_space<smem>>
    %c145 = arith.constant 145 : index
    %145 = memref.load %arg2[%c145] : memref<385xf32, #tpu.memory_space<smem>>
    %c146 = arith.constant 146 : index
    %146 = memref.load %arg2[%c146] : memref<385xf32, #tpu.memory_space<smem>>
    %c147 = arith.constant 147 : index
    %147 = memref.load %arg2[%c147] : memref<385xf32, #tpu.memory_space<smem>>
    %c148 = arith.constant 148 : index
    %148 = memref.load %arg2[%c148] : memref<385xf32, #tpu.memory_space<smem>>
    %c149 = arith.constant 149 : index
    %149 = memref.load %arg2[%c149] : memref<385xf32, #tpu.memory_space<smem>>
    %c150 = arith.constant 150 : index
    %150 = memref.load %arg2[%c150] : memref<385xf32, #tpu.memory_space<smem>>
    %c151 = arith.constant 151 : index
    %151 = memref.load %arg2[%c151] : memref<385xf32, #tpu.memory_space<smem>>
    %c152 = arith.constant 152 : index
    %152 = memref.load %arg2[%c152] : memref<385xf32, #tpu.memory_space<smem>>
    %c153 = arith.constant 153 : index
    %153 = memref.load %arg2[%c153] : memref<385xf32, #tpu.memory_space<smem>>
    %c154 = arith.constant 154 : index
    %154 = memref.load %arg2[%c154] : memref<385xf32, #tpu.memory_space<smem>>
    %c155 = arith.constant 155 : index
    %155 = memref.load %arg2[%c155] : memref<385xf32, #tpu.memory_space<smem>>
    %c156 = arith.constant 156 : index
    %156 = memref.load %arg2[%c156] : memref<385xf32, #tpu.memory_space<smem>>
    %c157 = arith.constant 157 : index
    %157 = memref.load %arg2[%c157] : memref<385xf32, #tpu.memory_space<smem>>
    %c158 = arith.constant 158 : index
    %158 = memref.load %arg2[%c158] : memref<385xf32, #tpu.memory_space<smem>>
    %c159 = arith.constant 159 : index
    %159 = memref.load %arg2[%c159] : memref<385xf32, #tpu.memory_space<smem>>
    %c160 = arith.constant 160 : index
    %160 = memref.load %arg2[%c160] : memref<385xf32, #tpu.memory_space<smem>>
    %c161 = arith.constant 161 : index
    %161 = memref.load %arg2[%c161] : memref<385xf32, #tpu.memory_space<smem>>
    %c162 = arith.constant 162 : index
    %162 = memref.load %arg2[%c162] : memref<385xf32, #tpu.memory_space<smem>>
    %c163 = arith.constant 163 : index
    %163 = memref.load %arg2[%c163] : memref<385xf32, #tpu.memory_space<smem>>
    %c164 = arith.constant 164 : index
    %164 = memref.load %arg2[%c164] : memref<385xf32, #tpu.memory_space<smem>>
    %c165 = arith.constant 165 : index
    %165 = memref.load %arg2[%c165] : memref<385xf32, #tpu.memory_space<smem>>
    %c166 = arith.constant 166 : index
    %166 = memref.load %arg2[%c166] : memref<385xf32, #tpu.memory_space<smem>>
    %c167 = arith.constant 167 : index
    %167 = memref.load %arg2[%c167] : memref<385xf32, #tpu.memory_space<smem>>
    %c168 = arith.constant 168 : index
    %168 = memref.load %arg2[%c168] : memref<385xf32, #tpu.memory_space<smem>>
    %c169 = arith.constant 169 : index
    %169 = memref.load %arg2[%c169] : memref<385xf32, #tpu.memory_space<smem>>
    %c170 = arith.constant 170 : index
    %170 = memref.load %arg2[%c170] : memref<385xf32, #tpu.memory_space<smem>>
    %c171 = arith.constant 171 : index
    %171 = memref.load %arg2[%c171] : memref<385xf32, #tpu.memory_space<smem>>
    %c172 = arith.constant 172 : index
    %172 = memref.load %arg2[%c172] : memref<385xf32, #tpu.memory_space<smem>>
    %c173 = arith.constant 173 : index
    %173 = memref.load %arg2[%c173] : memref<385xf32, #tpu.memory_space<smem>>
    %c174 = arith.constant 174 : index
    %174 = memref.load %arg2[%c174] : memref<385xf32, #tpu.memory_space<smem>>
    %c175 = arith.constant 175 : index
    %175 = memref.load %arg2[%c175] : memref<385xf32, #tpu.memory_space<smem>>
    %c176 = arith.constant 176 : index
    %176 = memref.load %arg2[%c176] : memref<385xf32, #tpu.memory_space<smem>>
    %c177 = arith.constant 177 : index
    %177 = memref.load %arg2[%c177] : memref<385xf32, #tpu.memory_space<smem>>
    %c178 = arith.constant 178 : index
    %178 = memref.load %arg2[%c178] : memref<385xf32, #tpu.memory_space<smem>>
    %c179 = arith.constant 179 : index
    %179 = memref.load %arg2[%c179] : memref<385xf32, #tpu.memory_space<smem>>
    %c180 = arith.constant 180 : index
    %180 = memref.load %arg2[%c180] : memref<385xf32, #tpu.memory_space<smem>>
    %c181 = arith.constant 181 : index
    %181 = memref.load %arg2[%c181] : memref<385xf32, #tpu.memory_space<smem>>
    %c182 = arith.constant 182 : index
    %182 = memref.load %arg2[%c182] : memref<385xf32, #tpu.memory_space<smem>>
    %c183 = arith.constant 183 : index
    %183 = memref.load %arg2[%c183] : memref<385xf32, #tpu.memory_space<smem>>
    %c184 = arith.constant 184 : index
    %184 = memref.load %arg2[%c184] : memref<385xf32, #tpu.memory_space<smem>>
    %c185 = arith.constant 185 : index
    %185 = memref.load %arg2[%c185] : memref<385xf32, #tpu.memory_space<smem>>
    %c186 = arith.constant 186 : index
    %186 = memref.load %arg2[%c186] : memref<385xf32, #tpu.memory_space<smem>>
    %c187 = arith.constant 187 : index
    %187 = memref.load %arg2[%c187] : memref<385xf32, #tpu.memory_space<smem>>
    %c188 = arith.constant 188 : index
    %188 = memref.load %arg2[%c188] : memref<385xf32, #tpu.memory_space<smem>>
    %c189 = arith.constant 189 : index
    %189 = memref.load %arg2[%c189] : memref<385xf32, #tpu.memory_space<smem>>
    %c190 = arith.constant 190 : index
    %190 = memref.load %arg2[%c190] : memref<385xf32, #tpu.memory_space<smem>>
    %c191 = arith.constant 191 : index
    %191 = memref.load %arg2[%c191] : memref<385xf32, #tpu.memory_space<smem>>
    %c192 = arith.constant 192 : index
    %192 = memref.load %arg2[%c192] : memref<385xf32, #tpu.memory_space<smem>>
    %c193 = arith.constant 193 : index
    %193 = memref.load %arg2[%c193] : memref<385xf32, #tpu.memory_space<smem>>
    %c194 = arith.constant 194 : index
    %194 = memref.load %arg2[%c194] : memref<385xf32, #tpu.memory_space<smem>>
    %c195 = arith.constant 195 : index
    %195 = memref.load %arg2[%c195] : memref<385xf32, #tpu.memory_space<smem>>
    %c196 = arith.constant 196 : index
    %196 = memref.load %arg2[%c196] : memref<385xf32, #tpu.memory_space<smem>>
    %c197 = arith.constant 197 : index
    %197 = memref.load %arg2[%c197] : memref<385xf32, #tpu.memory_space<smem>>
    %c198 = arith.constant 198 : index
    %198 = memref.load %arg2[%c198] : memref<385xf32, #tpu.memory_space<smem>>
    %c199 = arith.constant 199 : index
    %199 = memref.load %arg2[%c199] : memref<385xf32, #tpu.memory_space<smem>>
    %c200 = arith.constant 200 : index
    %200 = memref.load %arg2[%c200] : memref<385xf32, #tpu.memory_space<smem>>
    %c201 = arith.constant 201 : index
    %201 = memref.load %arg2[%c201] : memref<385xf32, #tpu.memory_space<smem>>
    %c202 = arith.constant 202 : index
    %202 = memref.load %arg2[%c202] : memref<385xf32, #tpu.memory_space<smem>>
    %c203 = arith.constant 203 : index
    %203 = memref.load %arg2[%c203] : memref<385xf32, #tpu.memory_space<smem>>
    %c204 = arith.constant 204 : index
    %204 = memref.load %arg2[%c204] : memref<385xf32, #tpu.memory_space<smem>>
    %c205 = arith.constant 205 : index
    %205 = memref.load %arg2[%c205] : memref<385xf32, #tpu.memory_space<smem>>
    %c206 = arith.constant 206 : index
    %206 = memref.load %arg2[%c206] : memref<385xf32, #tpu.memory_space<smem>>
    %c207 = arith.constant 207 : index
    %207 = memref.load %arg2[%c207] : memref<385xf32, #tpu.memory_space<smem>>
    %c208 = arith.constant 208 : index
    %208 = memref.load %arg2[%c208] : memref<385xf32, #tpu.memory_space<smem>>
    %c209 = arith.constant 209 : index
    %209 = memref.load %arg2[%c209] : memref<385xf32, #tpu.memory_space<smem>>
    %c210 = arith.constant 210 : index
    %210 = memref.load %arg2[%c210] : memref<385xf32, #tpu.memory_space<smem>>
    %c211 = arith.constant 211 : index
    %211 = memref.load %arg2[%c211] : memref<385xf32, #tpu.memory_space<smem>>
    %c212 = arith.constant 212 : index
    %212 = memref.load %arg2[%c212] : memref<385xf32, #tpu.memory_space<smem>>
    %c213 = arith.constant 213 : index
    %213 = memref.load %arg2[%c213] : memref<385xf32, #tpu.memory_space<smem>>
    %c214 = arith.constant 214 : index
    %214 = memref.load %arg2[%c214] : memref<385xf32, #tpu.memory_space<smem>>
    %c215 = arith.constant 215 : index
    %215 = memref.load %arg2[%c215] : memref<385xf32, #tpu.memory_space<smem>>
    %c216 = arith.constant 216 : index
    %216 = memref.load %arg2[%c216] : memref<385xf32, #tpu.memory_space<smem>>
    %c217 = arith.constant 217 : index
    %217 = memref.load %arg2[%c217] : memref<385xf32, #tpu.memory_space<smem>>
    %c218 = arith.constant 218 : index
    %218 = memref.load %arg2[%c218] : memref<385xf32, #tpu.memory_space<smem>>
    %c219 = arith.constant 219 : index
    %219 = memref.load %arg2[%c219] : memref<385xf32, #tpu.memory_space<smem>>
    %c220 = arith.constant 220 : index
    %220 = memref.load %arg2[%c220] : memref<385xf32, #tpu.memory_space<smem>>
    %c221 = arith.constant 221 : index
    %221 = memref.load %arg2[%c221] : memref<385xf32, #tpu.memory_space<smem>>
    %c222 = arith.constant 222 : index
    %222 = memref.load %arg2[%c222] : memref<385xf32, #tpu.memory_space<smem>>
    %c223 = arith.constant 223 : index
    %223 = memref.load %arg2[%c223] : memref<385xf32, #tpu.memory_space<smem>>
    %c224 = arith.constant 224 : index
    %224 = memref.load %arg2[%c224] : memref<385xf32, #tpu.memory_space<smem>>
    %c225 = arith.constant 225 : index
    %225 = memref.load %arg2[%c225] : memref<385xf32, #tpu.memory_space<smem>>
    %c226 = arith.constant 226 : index
    %226 = memref.load %arg2[%c226] : memref<385xf32, #tpu.memory_space<smem>>
    %c227 = arith.constant 227 : index
    %227 = memref.load %arg2[%c227] : memref<385xf32, #tpu.memory_space<smem>>
    %c228 = arith.constant 228 : index
    %228 = memref.load %arg2[%c228] : memref<385xf32, #tpu.memory_space<smem>>
    %c229 = arith.constant 229 : index
    %229 = memref.load %arg2[%c229] : memref<385xf32, #tpu.memory_space<smem>>
    %c230 = arith.constant 230 : index
    %230 = memref.load %arg2[%c230] : memref<385xf32, #tpu.memory_space<smem>>
    %c231 = arith.constant 231 : index
    %231 = memref.load %arg2[%c231] : memref<385xf32, #tpu.memory_space<smem>>
    %c232 = arith.constant 232 : index
    %232 = memref.load %arg2[%c232] : memref<385xf32, #tpu.memory_space<smem>>
    %c233 = arith.constant 233 : index
    %233 = memref.load %arg2[%c233] : memref<385xf32, #tpu.memory_space<smem>>
    %c234 = arith.constant 234 : index
    %234 = memref.load %arg2[%c234] : memref<385xf32, #tpu.memory_space<smem>>
    %c235 = arith.constant 235 : index
    %235 = memref.load %arg2[%c235] : memref<385xf32, #tpu.memory_space<smem>>
    %c236 = arith.constant 236 : index
    %236 = memref.load %arg2[%c236] : memref<385xf32, #tpu.memory_space<smem>>
    %c237 = arith.constant 237 : index
    %237 = memref.load %arg2[%c237] : memref<385xf32, #tpu.memory_space<smem>>
    %c238 = arith.constant 238 : index
    %238 = memref.load %arg2[%c238] : memref<385xf32, #tpu.memory_space<smem>>
    %c239 = arith.constant 239 : index
    %239 = memref.load %arg2[%c239] : memref<385xf32, #tpu.memory_space<smem>>
    %c240 = arith.constant 240 : index
    %240 = memref.load %arg2[%c240] : memref<385xf32, #tpu.memory_space<smem>>
    %c241 = arith.constant 241 : index
    %241 = memref.load %arg2[%c241] : memref<385xf32, #tpu.memory_space<smem>>
    %c242 = arith.constant 242 : index
    %242 = memref.load %arg2[%c242] : memref<385xf32, #tpu.memory_space<smem>>
    %c243 = arith.constant 243 : index
    %243 = memref.load %arg2[%c243] : memref<385xf32, #tpu.memory_space<smem>>
    %c244 = arith.constant 244 : index
    %244 = memref.load %arg2[%c244] : memref<385xf32, #tpu.memory_space<smem>>
    %c245 = arith.constant 245 : index
    %245 = memref.load %arg2[%c245] : memref<385xf32, #tpu.memory_space<smem>>
    %c246 = arith.constant 246 : index
    %246 = memref.load %arg2[%c246] : memref<385xf32, #tpu.memory_space<smem>>
    %c247 = arith.constant 247 : index
    %247 = memref.load %arg2[%c247] : memref<385xf32, #tpu.memory_space<smem>>
    %c248 = arith.constant 248 : index
    %248 = memref.load %arg2[%c248] : memref<385xf32, #tpu.memory_space<smem>>
    %c249 = arith.constant 249 : index
    %249 = memref.load %arg2[%c249] : memref<385xf32, #tpu.memory_space<smem>>
    %c250 = arith.constant 250 : index
    %250 = memref.load %arg2[%c250] : memref<385xf32, #tpu.memory_space<smem>>
    %c251 = arith.constant 251 : index
    %251 = memref.load %arg2[%c251] : memref<385xf32, #tpu.memory_space<smem>>
    %c252 = arith.constant 252 : index
    %252 = memref.load %arg2[%c252] : memref<385xf32, #tpu.memory_space<smem>>
    %c253 = arith.constant 253 : index
    %253 = memref.load %arg2[%c253] : memref<385xf32, #tpu.memory_space<smem>>
    %c254 = arith.constant 254 : index
    %254 = memref.load %arg2[%c254] : memref<385xf32, #tpu.memory_space<smem>>
    %c255 = arith.constant 255 : index
    %255 = memref.load %arg2[%c255] : memref<385xf32, #tpu.memory_space<smem>>
    %c256 = arith.constant 256 : index
    %256 = memref.load %arg2[%c256] : memref<385xf32, #tpu.memory_space<smem>>
    %c257 = arith.constant 257 : index
    %257 = memref.load %arg2[%c257] : memref<385xf32, #tpu.memory_space<smem>>
    %c258 = arith.constant 258 : index
    %258 = memref.load %arg2[%c258] : memref<385xf32, #tpu.memory_space<smem>>
    %c259 = arith.constant 259 : index
    %259 = memref.load %arg2[%c259] : memref<385xf32, #tpu.memory_space<smem>>
    %c260 = arith.constant 260 : index
    %260 = memref.load %arg2[%c260] : memref<385xf32, #tpu.memory_space<smem>>
    %c261 = arith.constant 261 : index
    %261 = memref.load %arg2[%c261] : memref<385xf32, #tpu.memory_space<smem>>
    %c262 = arith.constant 262 : index
    %262 = memref.load %arg2[%c262] : memref<385xf32, #tpu.memory_space<smem>>
    %c263 = arith.constant 263 : index
    %263 = memref.load %arg2[%c263] : memref<385xf32, #tpu.memory_space<smem>>
    %c264 = arith.constant 264 : index
    %264 = memref.load %arg2[%c264] : memref<385xf32, #tpu.memory_space<smem>>
    %c265 = arith.constant 265 : index
    %265 = memref.load %arg2[%c265] : memref<385xf32, #tpu.memory_space<smem>>
    %c266 = arith.constant 266 : index
    %266 = memref.load %arg2[%c266] : memref<385xf32, #tpu.memory_space<smem>>
    %c267 = arith.constant 267 : index
    %267 = memref.load %arg2[%c267] : memref<385xf32, #tpu.memory_space<smem>>
    %c268 = arith.constant 268 : index
    %268 = memref.load %arg2[%c268] : memref<385xf32, #tpu.memory_space<smem>>
    %c269 = arith.constant 269 : index
    %269 = memref.load %arg2[%c269] : memref<385xf32, #tpu.memory_space<smem>>
    %c270 = arith.constant 270 : index
    %270 = memref.load %arg2[%c270] : memref<385xf32, #tpu.memory_space<smem>>
    %c271 = arith.constant 271 : index
    %271 = memref.load %arg2[%c271] : memref<385xf32, #tpu.memory_space<smem>>
    %c272 = arith.constant 272 : index
    %272 = memref.load %arg2[%c272] : memref<385xf32, #tpu.memory_space<smem>>
    %c273 = arith.constant 273 : index
    %273 = memref.load %arg2[%c273] : memref<385xf32, #tpu.memory_space<smem>>
    %c274 = arith.constant 274 : index
    %274 = memref.load %arg2[%c274] : memref<385xf32, #tpu.memory_space<smem>>
    %c275 = arith.constant 275 : index
    %275 = memref.load %arg2[%c275] : memref<385xf32, #tpu.memory_space<smem>>
    %c276 = arith.constant 276 : index
    %276 = memref.load %arg2[%c276] : memref<385xf32, #tpu.memory_space<smem>>
    %c277 = arith.constant 277 : index
    %277 = memref.load %arg2[%c277] : memref<385xf32, #tpu.memory_space<smem>>
    %c278 = arith.constant 278 : index
    %278 = memref.load %arg2[%c278] : memref<385xf32, #tpu.memory_space<smem>>
    %c279 = arith.constant 279 : index
    %279 = memref.load %arg2[%c279] : memref<385xf32, #tpu.memory_space<smem>>
    %c280 = arith.constant 280 : index
    %280 = memref.load %arg2[%c280] : memref<385xf32, #tpu.memory_space<smem>>
    %c281 = arith.constant 281 : index
    %281 = memref.load %arg2[%c281] : memref<385xf32, #tpu.memory_space<smem>>
    %c282 = arith.constant 282 : index
    %282 = memref.load %arg2[%c282] : memref<385xf32, #tpu.memory_space<smem>>
    %c283 = arith.constant 283 : index
    %283 = memref.load %arg2[%c283] : memref<385xf32, #tpu.memory_space<smem>>
    %c284 = arith.constant 284 : index
    %284 = memref.load %arg2[%c284] : memref<385xf32, #tpu.memory_space<smem>>
    %c285 = arith.constant 285 : index
    %285 = memref.load %arg2[%c285] : memref<385xf32, #tpu.memory_space<smem>>
    %c286 = arith.constant 286 : index
    %286 = memref.load %arg2[%c286] : memref<385xf32, #tpu.memory_space<smem>>
    %c287 = arith.constant 287 : index
    %287 = memref.load %arg2[%c287] : memref<385xf32, #tpu.memory_space<smem>>
    %c288 = arith.constant 288 : index
    %288 = memref.load %arg2[%c288] : memref<385xf32, #tpu.memory_space<smem>>
    %c289 = arith.constant 289 : index
    %289 = memref.load %arg2[%c289] : memref<385xf32, #tpu.memory_space<smem>>
    %c290 = arith.constant 290 : index
    %290 = memref.load %arg2[%c290] : memref<385xf32, #tpu.memory_space<smem>>
    %c291 = arith.constant 291 : index
    %291 = memref.load %arg2[%c291] : memref<385xf32, #tpu.memory_space<smem>>
    %c292 = arith.constant 292 : index
    %292 = memref.load %arg2[%c292] : memref<385xf32, #tpu.memory_space<smem>>
    %c293 = arith.constant 293 : index
    %293 = memref.load %arg2[%c293] : memref<385xf32, #tpu.memory_space<smem>>
    %c294 = arith.constant 294 : index
    %294 = memref.load %arg2[%c294] : memref<385xf32, #tpu.memory_space<smem>>
    %c295 = arith.constant 295 : index
    %295 = memref.load %arg2[%c295] : memref<385xf32, #tpu.memory_space<smem>>
    %c296 = arith.constant 296 : index
    %296 = memref.load %arg2[%c296] : memref<385xf32, #tpu.memory_space<smem>>
    %c297 = arith.constant 297 : index
    %297 = memref.load %arg2[%c297] : memref<385xf32, #tpu.memory_space<smem>>
    %c298 = arith.constant 298 : index
    %298 = memref.load %arg2[%c298] : memref<385xf32, #tpu.memory_space<smem>>
    %c299 = arith.constant 299 : index
    %299 = memref.load %arg2[%c299] : memref<385xf32, #tpu.memory_space<smem>>
    %c300 = arith.constant 300 : index
    %300 = memref.load %arg2[%c300] : memref<385xf32, #tpu.memory_space<smem>>
    %c301 = arith.constant 301 : index
    %301 = memref.load %arg2[%c301] : memref<385xf32, #tpu.memory_space<smem>>
    %c302 = arith.constant 302 : index
    %302 = memref.load %arg2[%c302] : memref<385xf32, #tpu.memory_space<smem>>
    %c303 = arith.constant 303 : index
    %303 = memref.load %arg2[%c303] : memref<385xf32, #tpu.memory_space<smem>>
    %c304 = arith.constant 304 : index
    %304 = memref.load %arg2[%c304] : memref<385xf32, #tpu.memory_space<smem>>
    %c305 = arith.constant 305 : index
    %305 = memref.load %arg2[%c305] : memref<385xf32, #tpu.memory_space<smem>>
    %c306 = arith.constant 306 : index
    %306 = memref.load %arg2[%c306] : memref<385xf32, #tpu.memory_space<smem>>
    %c307 = arith.constant 307 : index
    %307 = memref.load %arg2[%c307] : memref<385xf32, #tpu.memory_space<smem>>
    %c308 = arith.constant 308 : index
    %308 = memref.load %arg2[%c308] : memref<385xf32, #tpu.memory_space<smem>>
    %c309 = arith.constant 309 : index
    %309 = memref.load %arg2[%c309] : memref<385xf32, #tpu.memory_space<smem>>
    %c310 = arith.constant 310 : index
    %310 = memref.load %arg2[%c310] : memref<385xf32, #tpu.memory_space<smem>>
    %c311 = arith.constant 311 : index
    %311 = memref.load %arg2[%c311] : memref<385xf32, #tpu.memory_space<smem>>
    %c312 = arith.constant 312 : index
    %312 = memref.load %arg2[%c312] : memref<385xf32, #tpu.memory_space<smem>>
    %c313 = arith.constant 313 : index
    %313 = memref.load %arg2[%c313] : memref<385xf32, #tpu.memory_space<smem>>
    %c314 = arith.constant 314 : index
    %314 = memref.load %arg2[%c314] : memref<385xf32, #tpu.memory_space<smem>>
    %c315 = arith.constant 315 : index
    %315 = memref.load %arg2[%c315] : memref<385xf32, #tpu.memory_space<smem>>
    %c316 = arith.constant 316 : index
    %316 = memref.load %arg2[%c316] : memref<385xf32, #tpu.memory_space<smem>>
    %c317 = arith.constant 317 : index
    %317 = memref.load %arg2[%c317] : memref<385xf32, #tpu.memory_space<smem>>
    %c318 = arith.constant 318 : index
    %318 = memref.load %arg2[%c318] : memref<385xf32, #tpu.memory_space<smem>>
    %c319 = arith.constant 319 : index
    %319 = memref.load %arg2[%c319] : memref<385xf32, #tpu.memory_space<smem>>
    %c320 = arith.constant 320 : index
    %320 = memref.load %arg2[%c320] : memref<385xf32, #tpu.memory_space<smem>>
    %c321 = arith.constant 321 : index
    %321 = memref.load %arg2[%c321] : memref<385xf32, #tpu.memory_space<smem>>
    %c322 = arith.constant 322 : index
    %322 = memref.load %arg2[%c322] : memref<385xf32, #tpu.memory_space<smem>>
    %c323 = arith.constant 323 : index
    %323 = memref.load %arg2[%c323] : memref<385xf32, #tpu.memory_space<smem>>
    %c324 = arith.constant 324 : index
    %324 = memref.load %arg2[%c324] : memref<385xf32, #tpu.memory_space<smem>>
    %c325 = arith.constant 325 : index
    %325 = memref.load %arg2[%c325] : memref<385xf32, #tpu.memory_space<smem>>
    %c326 = arith.constant 326 : index
    %326 = memref.load %arg2[%c326] : memref<385xf32, #tpu.memory_space<smem>>
    %c327 = arith.constant 327 : index
    %327 = memref.load %arg2[%c327] : memref<385xf32, #tpu.memory_space<smem>>
    %c328 = arith.constant 328 : index
    %328 = memref.load %arg2[%c328] : memref<385xf32, #tpu.memory_space<smem>>
    %c329 = arith.constant 329 : index
    %329 = memref.load %arg2[%c329] : memref<385xf32, #tpu.memory_space<smem>>
    %c330 = arith.constant 330 : index
    %330 = memref.load %arg2[%c330] : memref<385xf32, #tpu.memory_space<smem>>
    %c331 = arith.constant 331 : index
    %331 = memref.load %arg2[%c331] : memref<385xf32, #tpu.memory_space<smem>>
    %c332 = arith.constant 332 : index
    %332 = memref.load %arg2[%c332] : memref<385xf32, #tpu.memory_space<smem>>
    %c333 = arith.constant 333 : index
    %333 = memref.load %arg2[%c333] : memref<385xf32, #tpu.memory_space<smem>>
    %c334 = arith.constant 334 : index
    %334 = memref.load %arg2[%c334] : memref<385xf32, #tpu.memory_space<smem>>
    %c335 = arith.constant 335 : index
    %335 = memref.load %arg2[%c335] : memref<385xf32, #tpu.memory_space<smem>>
    %c336 = arith.constant 336 : index
    %336 = memref.load %arg2[%c336] : memref<385xf32, #tpu.memory_space<smem>>
    %c337 = arith.constant 337 : index
    %337 = memref.load %arg2[%c337] : memref<385xf32, #tpu.memory_space<smem>>
    %c338 = arith.constant 338 : index
    %338 = memref.load %arg2[%c338] : memref<385xf32, #tpu.memory_space<smem>>
    %c339 = arith.constant 339 : index
    %339 = memref.load %arg2[%c339] : memref<385xf32, #tpu.memory_space<smem>>
    %c340 = arith.constant 340 : index
    %340 = memref.load %arg2[%c340] : memref<385xf32, #tpu.memory_space<smem>>
    %c341 = arith.constant 341 : index
    %341 = memref.load %arg2[%c341] : memref<385xf32, #tpu.memory_space<smem>>
    %c342 = arith.constant 342 : index
    %342 = memref.load %arg2[%c342] : memref<385xf32, #tpu.memory_space<smem>>
    %c343 = arith.constant 343 : index
    %343 = memref.load %arg2[%c343] : memref<385xf32, #tpu.memory_space<smem>>
    %c344 = arith.constant 344 : index
    %344 = memref.load %arg2[%c344] : memref<385xf32, #tpu.memory_space<smem>>
    %c345 = arith.constant 345 : index
    %345 = memref.load %arg2[%c345] : memref<385xf32, #tpu.memory_space<smem>>
    %c346 = arith.constant 346 : index
    %346 = memref.load %arg2[%c346] : memref<385xf32, #tpu.memory_space<smem>>
    %c347 = arith.constant 347 : index
    %347 = memref.load %arg2[%c347] : memref<385xf32, #tpu.memory_space<smem>>
    %c348 = arith.constant 348 : index
    %348 = memref.load %arg2[%c348] : memref<385xf32, #tpu.memory_space<smem>>
    %c349 = arith.constant 349 : index
    %349 = memref.load %arg2[%c349] : memref<385xf32, #tpu.memory_space<smem>>
    %c350 = arith.constant 350 : index
    %350 = memref.load %arg2[%c350] : memref<385xf32, #tpu.memory_space<smem>>
    %c351 = arith.constant 351 : index
    %351 = memref.load %arg2[%c351] : memref<385xf32, #tpu.memory_space<smem>>
    %c352 = arith.constant 352 : index
    %352 = memref.load %arg2[%c352] : memref<385xf32, #tpu.memory_space<smem>>
    %c353 = arith.constant 353 : index
    %353 = memref.load %arg2[%c353] : memref<385xf32, #tpu.memory_space<smem>>
    %c354 = arith.constant 354 : index
    %354 = memref.load %arg2[%c354] : memref<385xf32, #tpu.memory_space<smem>>
    %c355 = arith.constant 355 : index
    %355 = memref.load %arg2[%c355] : memref<385xf32, #tpu.memory_space<smem>>
    %c356 = arith.constant 356 : index
    %356 = memref.load %arg2[%c356] : memref<385xf32, #tpu.memory_space<smem>>
    %c357 = arith.constant 357 : index
    %357 = memref.load %arg2[%c357] : memref<385xf32, #tpu.memory_space<smem>>
    %c358 = arith.constant 358 : index
    %358 = memref.load %arg2[%c358] : memref<385xf32, #tpu.memory_space<smem>>
    %c359 = arith.constant 359 : index
    %359 = memref.load %arg2[%c359] : memref<385xf32, #tpu.memory_space<smem>>
    %c360 = arith.constant 360 : index
    %360 = memref.load %arg2[%c360] : memref<385xf32, #tpu.memory_space<smem>>
    %c361 = arith.constant 361 : index
    %361 = memref.load %arg2[%c361] : memref<385xf32, #tpu.memory_space<smem>>
    %c362 = arith.constant 362 : index
    %362 = memref.load %arg2[%c362] : memref<385xf32, #tpu.memory_space<smem>>
    %c363 = arith.constant 363 : index
    %363 = memref.load %arg2[%c363] : memref<385xf32, #tpu.memory_space<smem>>
    %c364 = arith.constant 364 : index
    %364 = memref.load %arg2[%c364] : memref<385xf32, #tpu.memory_space<smem>>
    %c365 = arith.constant 365 : index
    %365 = memref.load %arg2[%c365] : memref<385xf32, #tpu.memory_space<smem>>
    %c366 = arith.constant 366 : index
    %366 = memref.load %arg2[%c366] : memref<385xf32, #tpu.memory_space<smem>>
    %c367 = arith.constant 367 : index
    %367 = memref.load %arg2[%c367] : memref<385xf32, #tpu.memory_space<smem>>
    %c368 = arith.constant 368 : index
    %368 = memref.load %arg2[%c368] : memref<385xf32, #tpu.memory_space<smem>>
    %c369 = arith.constant 369 : index
    %369 = memref.load %arg2[%c369] : memref<385xf32, #tpu.memory_space<smem>>
    %c370 = arith.constant 370 : index
    %370 = memref.load %arg2[%c370] : memref<385xf32, #tpu.memory_space<smem>>
    %c371 = arith.constant 371 : index
    %371 = memref.load %arg2[%c371] : memref<385xf32, #tpu.memory_space<smem>>
    %c372 = arith.constant 372 : index
    %372 = memref.load %arg2[%c372] : memref<385xf32, #tpu.memory_space<smem>>
    %c373 = arith.constant 373 : index
    %373 = memref.load %arg2[%c373] : memref<385xf32, #tpu.memory_space<smem>>
    %c374 = arith.constant 374 : index
    %374 = memref.load %arg2[%c374] : memref<385xf32, #tpu.memory_space<smem>>
    %c375 = arith.constant 375 : index
    %375 = memref.load %arg2[%c375] : memref<385xf32, #tpu.memory_space<smem>>
    %c376 = arith.constant 376 : index
    %376 = memref.load %arg2[%c376] : memref<385xf32, #tpu.memory_space<smem>>
    %c377 = arith.constant 377 : index
    %377 = memref.load %arg2[%c377] : memref<385xf32, #tpu.memory_space<smem>>
    %c378 = arith.constant 378 : index
    %378 = memref.load %arg2[%c378] : memref<385xf32, #tpu.memory_space<smem>>
    %c379 = arith.constant 379 : index
    %379 = memref.load %arg2[%c379] : memref<385xf32, #tpu.memory_space<smem>>
    %c380 = arith.constant 380 : index
    %380 = memref.load %arg2[%c380] : memref<385xf32, #tpu.memory_space<smem>>
    %c381 = arith.constant 381 : index
    %381 = memref.load %arg2[%c381] : memref<385xf32, #tpu.memory_space<smem>>
    %c382 = arith.constant 382 : index
    %382 = memref.load %arg2[%c382] : memref<385xf32, #tpu.memory_space<smem>>
    %c383 = arith.constant 383 : index
    %383 = memref.load %arg2[%c383] : memref<385xf32, #tpu.memory_space<smem>>
    %c384 = arith.constant 384 : index
    %384 = memref.load %arg2[%c384] : memref<385xf32, #tpu.memory_space<smem>>
    %c0_0 = arith.constant 0 : index
    %385 = memref.load %arg3[%c0_0] : memref<81xf32, #tpu.memory_space<smem>>
    %c1_1 = arith.constant 1 : index
    %386 = memref.load %arg3[%c1_1] : memref<81xf32, #tpu.memory_space<smem>>
    %c2_2 = arith.constant 2 : index
    %387 = memref.load %arg3[%c2_2] : memref<81xf32, #tpu.memory_space<smem>>
    %c3_3 = arith.constant 3 : index
    %388 = memref.load %arg3[%c3_3] : memref<81xf32, #tpu.memory_space<smem>>
    %c4_4 = arith.constant 4 : index
    %389 = memref.load %arg3[%c4_4] : memref<81xf32, #tpu.memory_space<smem>>
    %c5_5 = arith.constant 5 : index
    %390 = memref.load %arg3[%c5_5] : memref<81xf32, #tpu.memory_space<smem>>
    %c6_6 = arith.constant 6 : index
    %391 = memref.load %arg3[%c6_6] : memref<81xf32, #tpu.memory_space<smem>>
    %c7_7 = arith.constant 7 : index
    %392 = memref.load %arg3[%c7_7] : memref<81xf32, #tpu.memory_space<smem>>
    %c8_8 = arith.constant 8 : index
    %393 = memref.load %arg3[%c8_8] : memref<81xf32, #tpu.memory_space<smem>>
    %c9_9 = arith.constant 9 : index
    %394 = memref.load %arg3[%c9_9] : memref<81xf32, #tpu.memory_space<smem>>
    %c10_10 = arith.constant 10 : index
    %395 = memref.load %arg3[%c10_10] : memref<81xf32, #tpu.memory_space<smem>>
    %c11_11 = arith.constant 11 : index
    %396 = memref.load %arg3[%c11_11] : memref<81xf32, #tpu.memory_space<smem>>
    %c12_12 = arith.constant 12 : index
    %397 = memref.load %arg3[%c12_12] : memref<81xf32, #tpu.memory_space<smem>>
    %c13_13 = arith.constant 13 : index
    %398 = memref.load %arg3[%c13_13] : memref<81xf32, #tpu.memory_space<smem>>
    %c14_14 = arith.constant 14 : index
    %399 = memref.load %arg3[%c14_14] : memref<81xf32, #tpu.memory_space<smem>>
    %c15_15 = arith.constant 15 : index
    %400 = memref.load %arg3[%c15_15] : memref<81xf32, #tpu.memory_space<smem>>
    %c16_16 = arith.constant 16 : index
    %401 = memref.load %arg3[%c16_16] : memref<81xf32, #tpu.memory_space<smem>>
    %c17_17 = arith.constant 17 : index
    %402 = memref.load %arg3[%c17_17] : memref<81xf32, #tpu.memory_space<smem>>
    %c18_18 = arith.constant 18 : index
    %403 = memref.load %arg3[%c18_18] : memref<81xf32, #tpu.memory_space<smem>>
    %c19_19 = arith.constant 19 : index
    %404 = memref.load %arg3[%c19_19] : memref<81xf32, #tpu.memory_space<smem>>
    %c20_20 = arith.constant 20 : index
    %405 = memref.load %arg3[%c20_20] : memref<81xf32, #tpu.memory_space<smem>>
    %c21_21 = arith.constant 21 : index
    %406 = memref.load %arg3[%c21_21] : memref<81xf32, #tpu.memory_space<smem>>
    %c22_22 = arith.constant 22 : index
    %407 = memref.load %arg3[%c22_22] : memref<81xf32, #tpu.memory_space<smem>>
    %c23_23 = arith.constant 23 : index
    %408 = memref.load %arg3[%c23_23] : memref<81xf32, #tpu.memory_space<smem>>
    %c24_24 = arith.constant 24 : index
    %409 = memref.load %arg3[%c24_24] : memref<81xf32, #tpu.memory_space<smem>>
    %c25_25 = arith.constant 25 : index
    %410 = memref.load %arg3[%c25_25] : memref<81xf32, #tpu.memory_space<smem>>
    %c26_26 = arith.constant 26 : index
    %411 = memref.load %arg3[%c26_26] : memref<81xf32, #tpu.memory_space<smem>>
    %c27_27 = arith.constant 27 : index
    %412 = memref.load %arg3[%c27_27] : memref<81xf32, #tpu.memory_space<smem>>
    %c28_28 = arith.constant 28 : index
    %413 = memref.load %arg3[%c28_28] : memref<81xf32, #tpu.memory_space<smem>>
    %c29_29 = arith.constant 29 : index
    %414 = memref.load %arg3[%c29_29] : memref<81xf32, #tpu.memory_space<smem>>
    %c30_30 = arith.constant 30 : index
    %415 = memref.load %arg3[%c30_30] : memref<81xf32, #tpu.memory_space<smem>>
    %c31_31 = arith.constant 31 : index
    %416 = memref.load %arg3[%c31_31] : memref<81xf32, #tpu.memory_space<smem>>
    %c32_32 = arith.constant 32 : index
    %417 = memref.load %arg3[%c32_32] : memref<81xf32, #tpu.memory_space<smem>>
    %c33_33 = arith.constant 33 : index
    %418 = memref.load %arg3[%c33_33] : memref<81xf32, #tpu.memory_space<smem>>
    %c34_34 = arith.constant 34 : index
    %419 = memref.load %arg3[%c34_34] : memref<81xf32, #tpu.memory_space<smem>>
    %c35_35 = arith.constant 35 : index
    %420 = memref.load %arg3[%c35_35] : memref<81xf32, #tpu.memory_space<smem>>
    %c36_36 = arith.constant 36 : index
    %421 = memref.load %arg3[%c36_36] : memref<81xf32, #tpu.memory_space<smem>>
    %c37_37 = arith.constant 37 : index
    %422 = memref.load %arg3[%c37_37] : memref<81xf32, #tpu.memory_space<smem>>
    %c38_38 = arith.constant 38 : index
    %423 = memref.load %arg3[%c38_38] : memref<81xf32, #tpu.memory_space<smem>>
    %c39_39 = arith.constant 39 : index
    %424 = memref.load %arg3[%c39_39] : memref<81xf32, #tpu.memory_space<smem>>
    %c40_40 = arith.constant 40 : index
    %425 = memref.load %arg3[%c40_40] : memref<81xf32, #tpu.memory_space<smem>>
    %c41_41 = arith.constant 41 : index
    %426 = memref.load %arg3[%c41_41] : memref<81xf32, #tpu.memory_space<smem>>
    %c42_42 = arith.constant 42 : index
    %427 = memref.load %arg3[%c42_42] : memref<81xf32, #tpu.memory_space<smem>>
    %c43_43 = arith.constant 43 : index
    %428 = memref.load %arg3[%c43_43] : memref<81xf32, #tpu.memory_space<smem>>
    %c44_44 = arith.constant 44 : index
    %429 = memref.load %arg3[%c44_44] : memref<81xf32, #tpu.memory_space<smem>>
    %c45_45 = arith.constant 45 : index
    %430 = memref.load %arg3[%c45_45] : memref<81xf32, #tpu.memory_space<smem>>
    %c46_46 = arith.constant 46 : index
    %431 = memref.load %arg3[%c46_46] : memref<81xf32, #tpu.memory_space<smem>>
    %c47_47 = arith.constant 47 : index
    %432 = memref.load %arg3[%c47_47] : memref<81xf32, #tpu.memory_space<smem>>
    %c48_48 = arith.constant 48 : index
    %433 = memref.load %arg3[%c48_48] : memref<81xf32, #tpu.memory_space<smem>>
    %c49_49 = arith.constant 49 : index
    %434 = memref.load %arg3[%c49_49] : memref<81xf32, #tpu.memory_space<smem>>
    %c50_50 = arith.constant 50 : index
    %435 = memref.load %arg3[%c50_50] : memref<81xf32, #tpu.memory_space<smem>>
    %c51_51 = arith.constant 51 : index
    %436 = memref.load %arg3[%c51_51] : memref<81xf32, #tpu.memory_space<smem>>
    %c52_52 = arith.constant 52 : index
    %437 = memref.load %arg3[%c52_52] : memref<81xf32, #tpu.memory_space<smem>>
    %c53_53 = arith.constant 53 : index
    %438 = memref.load %arg3[%c53_53] : memref<81xf32, #tpu.memory_space<smem>>
    %c54_54 = arith.constant 54 : index
    %439 = memref.load %arg3[%c54_54] : memref<81xf32, #tpu.memory_space<smem>>
    %c55_55 = arith.constant 55 : index
    %440 = memref.load %arg3[%c55_55] : memref<81xf32, #tpu.memory_space<smem>>
    %c56_56 = arith.constant 56 : index
    %441 = memref.load %arg3[%c56_56] : memref<81xf32, #tpu.memory_space<smem>>
    %c57_57 = arith.constant 57 : index
    %442 = memref.load %arg3[%c57_57] : memref<81xf32, #tpu.memory_space<smem>>
    %c58_58 = arith.constant 58 : index
    %443 = memref.load %arg3[%c58_58] : memref<81xf32, #tpu.memory_space<smem>>
    %c59_59 = arith.constant 59 : index
    %444 = memref.load %arg3[%c59_59] : memref<81xf32, #tpu.memory_space<smem>>
    %c60_60 = arith.constant 60 : index
    %445 = memref.load %arg3[%c60_60] : memref<81xf32, #tpu.memory_space<smem>>
    %c61_61 = arith.constant 61 : index
    %446 = memref.load %arg3[%c61_61] : memref<81xf32, #tpu.memory_space<smem>>
    %c62_62 = arith.constant 62 : index
    %447 = memref.load %arg3[%c62_62] : memref<81xf32, #tpu.memory_space<smem>>
    %c63_63 = arith.constant 63 : index
    %448 = memref.load %arg3[%c63_63] : memref<81xf32, #tpu.memory_space<smem>>
    %c64_64 = arith.constant 64 : index
    %449 = memref.load %arg3[%c64_64] : memref<81xf32, #tpu.memory_space<smem>>
    %c65_65 = arith.constant 65 : index
    %450 = memref.load %arg3[%c65_65] : memref<81xf32, #tpu.memory_space<smem>>
    %c66_66 = arith.constant 66 : index
    %451 = memref.load %arg3[%c66_66] : memref<81xf32, #tpu.memory_space<smem>>
    %c67_67 = arith.constant 67 : index
    %452 = memref.load %arg3[%c67_67] : memref<81xf32, #tpu.memory_space<smem>>
    %c68_68 = arith.constant 68 : index
    %453 = memref.load %arg3[%c68_68] : memref<81xf32, #tpu.memory_space<smem>>
    %c69_69 = arith.constant 69 : index
    %454 = memref.load %arg3[%c69_69] : memref<81xf32, #tpu.memory_space<smem>>
    %c70_70 = arith.constant 70 : index
    %455 = memref.load %arg3[%c70_70] : memref<81xf32, #tpu.memory_space<smem>>
    %c71_71 = arith.constant 71 : index
    %456 = memref.load %arg3[%c71_71] : memref<81xf32, #tpu.memory_space<smem>>
    %c72_72 = arith.constant 72 : index
    %457 = memref.load %arg3[%c72_72] : memref<81xf32, #tpu.memory_space<smem>>
    %c73_73 = arith.constant 73 : index
    %458 = memref.load %arg3[%c73_73] : memref<81xf32, #tpu.memory_space<smem>>
    %c74_74 = arith.constant 74 : index
    %459 = memref.load %arg3[%c74_74] : memref<81xf32, #tpu.memory_space<smem>>
    %c75_75 = arith.constant 75 : index
    %460 = memref.load %arg3[%c75_75] : memref<81xf32, #tpu.memory_space<smem>>
    %c76_76 = arith.constant 76 : index
    %461 = memref.load %arg3[%c76_76] : memref<81xf32, #tpu.memory_space<smem>>
    %c77_77 = arith.constant 77 : index
    %462 = memref.load %arg3[%c77_77] : memref<81xf32, #tpu.memory_space<smem>>
    %c78_78 = arith.constant 78 : index
    %463 = memref.load %arg3[%c78_78] : memref<81xf32, #tpu.memory_space<smem>>
    %c79_79 = arith.constant 79 : index
    %464 = memref.load %arg3[%c79_79] : memref<81xf32, #tpu.memory_space<smem>>
    %c80_80 = arith.constant 80 : index
    %465 = memref.load %arg3[%c80_80] : memref<81xf32, #tpu.memory_space<smem>>
    %c0_81 = arith.constant 0 : index
    %c0_82 = arith.constant 0 : index
    %466 = vector.load %arg1[%c0_81, %c0_82] : memref<8x128xf32, #tpu.memory_space<vmem>>, vector<8x128xf32>
    %467 = vector.broadcast %0 : f32 to vector<8x128xf32>
    %468 = arith.mulf %466, %467 : vector<8x128xf32>
    %469 = vector.broadcast %385 : f32 to vector<8x128xf32>
    %470 = arith.addf %468, %469 : vector<8x128xf32>
    %cst = arith.constant 0.000000e+00 : f32
    %471 = vector.broadcast %cst : f32 to vector<8x128xf32>
    %472 = arith.maximumf %470, %471 : vector<8x128xf32>
    %473 = vector.broadcast %1 : f32 to vector<8x128xf32>
    %474 = arith.mulf %466, %473 : vector<8x128xf32>
    %475 = vector.broadcast %386 : f32 to vector<8x128xf32>
    %476 = arith.addf %474, %475 : vector<8x128xf32>
    %cst_83 = arith.constant 0.000000e+00 : f32
    %477 = vector.broadcast %cst_83 : f32 to vector<8x128xf32>
    %478 = arith.maximumf %476, %477 : vector<8x128xf32>
    %479 = vector.broadcast %2 : f32 to vector<8x128xf32>
    %480 = arith.mulf %466, %479 : vector<8x128xf32>
    %481 = vector.broadcast %387 : f32 to vector<8x128xf32>
    %482 = arith.addf %480, %481 : vector<8x128xf32>
    %cst_84 = arith.constant 0.000000e+00 : f32
    %483 = vector.broadcast %cst_84 : f32 to vector<8x128xf32>
    %484 = arith.maximumf %482, %483 : vector<8x128xf32>
    %485 = vector.broadcast %3 : f32 to vector<8x128xf32>
    %486 = arith.mulf %466, %485 : vector<8x128xf32>
    %487 = vector.broadcast %388 : f32 to vector<8x128xf32>
    %488 = arith.addf %486, %487 : vector<8x128xf32>
    %cst_85 = arith.constant 0.000000e+00 : f32
    %489 = vector.broadcast %cst_85 : f32 to vector<8x128xf32>
    %490 = arith.maximumf %488, %489 : vector<8x128xf32>
    %491 = vector.broadcast %4 : f32 to vector<8x128xf32>
    %492 = arith.mulf %466, %491 : vector<8x128xf32>
    %493 = vector.broadcast %389 : f32 to vector<8x128xf32>
    %494 = arith.addf %492, %493 : vector<8x128xf32>
    %cst_86 = arith.constant 0.000000e+00 : f32
    %495 = vector.broadcast %cst_86 : f32 to vector<8x128xf32>
    %496 = arith.maximumf %494, %495 : vector<8x128xf32>
    %497 = vector.broadcast %5 : f32 to vector<8x128xf32>
    %498 = arith.mulf %472, %497 : vector<8x128xf32>
    %499 = vector.broadcast %10 : f32 to vector<8x128xf32>
    %500 = arith.mulf %478, %499 : vector<8x128xf32>
    %501 = arith.addf %498, %500 : vector<8x128xf32>
    %502 = vector.broadcast %15 : f32 to vector<8x128xf32>
    %503 = arith.mulf %484, %502 : vector<8x128xf32>
    %504 = vector.broadcast %20 : f32 to vector<8x128xf32>
    %505 = arith.mulf %490, %504 : vector<8x128xf32>
    %506 = arith.addf %503, %505 : vector<8x128xf32>
    %507 = vector.broadcast %25 : f32 to vector<8x128xf32>
    %508 = arith.mulf %496, %507 : vector<8x128xf32>
    %509 = vector.broadcast %390 : f32 to vector<8x128xf32>
    %510 = arith.addf %508, %509 : vector<8x128xf32>
    %511 = arith.addf %501, %506 : vector<8x128xf32>
    %512 = arith.addf %511, %510 : vector<8x128xf32>
    %cst_87 = arith.constant 0.000000e+00 : f32
    %513 = vector.broadcast %cst_87 : f32 to vector<8x128xf32>
    %514 = arith.maximumf %512, %513 : vector<8x128xf32>
    %515 = vector.broadcast %6 : f32 to vector<8x128xf32>
    %516 = arith.mulf %472, %515 : vector<8x128xf32>
    %517 = vector.broadcast %11 : f32 to vector<8x128xf32>
    %518 = arith.mulf %478, %517 : vector<8x128xf32>
    %519 = arith.addf %516, %518 : vector<8x128xf32>
    %520 = vector.broadcast %16 : f32 to vector<8x128xf32>
    %521 = arith.mulf %484, %520 : vector<8x128xf32>
    %522 = vector.broadcast %21 : f32 to vector<8x128xf32>
    %523 = arith.mulf %490, %522 : vector<8x128xf32>
    %524 = arith.addf %521, %523 : vector<8x128xf32>
    %525 = vector.broadcast %26 : f32 to vector<8x128xf32>
    %526 = arith.mulf %496, %525 : vector<8x128xf32>
    %527 = vector.broadcast %391 : f32 to vector<8x128xf32>
    %528 = arith.addf %526, %527 : vector<8x128xf32>
    %529 = arith.addf %519, %524 : vector<8x128xf32>
    %530 = arith.addf %529, %528 : vector<8x128xf32>
    %cst_88 = arith.constant 0.000000e+00 : f32
    %531 = vector.broadcast %cst_88 : f32 to vector<8x128xf32>
    %532 = arith.maximumf %530, %531 : vector<8x128xf32>
    %533 = vector.broadcast %7 : f32 to vector<8x128xf32>
    %534 = arith.mulf %472, %533 : vector<8x128xf32>
    %535 = vector.broadcast %12 : f32 to vector<8x128xf32>
    %536 = arith.mulf %478, %535 : vector<8x128xf32>
    %537 = arith.addf %534, %536 : vector<8x128xf32>
    %538 = vector.broadcast %17 : f32 to vector<8x128xf32>
    %539 = arith.mulf %484, %538 : vector<8x128xf32>
    %540 = vector.broadcast %22 : f32 to vector<8x128xf32>
    %541 = arith.mulf %490, %540 : vector<8x128xf32>
    %542 = arith.addf %539, %541 : vector<8x128xf32>
    %543 = vector.broadcast %27 : f32 to vector<8x128xf32>
    %544 = arith.mulf %496, %543 : vector<8x128xf32>
    %545 = vector.broadcast %392 : f32 to vector<8x128xf32>
    %546 = arith.addf %544, %545 : vector<8x128xf32>
    %547 = arith.addf %537, %542 : vector<8x128xf32>
    %548 = arith.addf %547, %546 : vector<8x128xf32>
    %cst_89 = arith.constant 0.000000e+00 : f32
    %549 = vector.broadcast %cst_89 : f32 to vector<8x128xf32>
    %550 = arith.maximumf %548, %549 : vector<8x128xf32>
    %551 = vector.broadcast %8 : f32 to vector<8x128xf32>
    %552 = arith.mulf %472, %551 : vector<8x128xf32>
    %553 = vector.broadcast %13 : f32 to vector<8x128xf32>
    %554 = arith.mulf %478, %553 : vector<8x128xf32>
    %555 = arith.addf %552, %554 : vector<8x128xf32>
    %556 = vector.broadcast %18 : f32 to vector<8x128xf32>
    %557 = arith.mulf %484, %556 : vector<8x128xf32>
    %558 = vector.broadcast %23 : f32 to vector<8x128xf32>
    %559 = arith.mulf %490, %558 : vector<8x128xf32>
    %560 = arith.addf %557, %559 : vector<8x128xf32>
    %561 = vector.broadcast %28 : f32 to vector<8x128xf32>
    %562 = arith.mulf %496, %561 : vector<8x128xf32>
    %563 = vector.broadcast %393 : f32 to vector<8x128xf32>
    %564 = arith.addf %562, %563 : vector<8x128xf32>
    %565 = arith.addf %555, %560 : vector<8x128xf32>
    %566 = arith.addf %565, %564 : vector<8x128xf32>
    %cst_90 = arith.constant 0.000000e+00 : f32
    %567 = vector.broadcast %cst_90 : f32 to vector<8x128xf32>
    %568 = arith.maximumf %566, %567 : vector<8x128xf32>
    %569 = vector.broadcast %9 : f32 to vector<8x128xf32>
    %570 = arith.mulf %472, %569 : vector<8x128xf32>
    %571 = vector.broadcast %14 : f32 to vector<8x128xf32>
    %572 = arith.mulf %478, %571 : vector<8x128xf32>
    %573 = arith.addf %570, %572 : vector<8x128xf32>
    %574 = vector.broadcast %19 : f32 to vector<8x128xf32>
    %575 = arith.mulf %484, %574 : vector<8x128xf32>
    %576 = vector.broadcast %24 : f32 to vector<8x128xf32>
    %577 = arith.mulf %490, %576 : vector<8x128xf32>
    %578 = arith.addf %575, %577 : vector<8x128xf32>
    %579 = vector.broadcast %29 : f32 to vector<8x128xf32>
    %580 = arith.mulf %496, %579 : vector<8x128xf32>
    %581 = vector.broadcast %394 : f32 to vector<8x128xf32>
    %582 = arith.addf %580, %581 : vector<8x128xf32>
    %583 = arith.addf %573, %578 : vector<8x128xf32>
    %584 = arith.addf %583, %582 : vector<8x128xf32>
    %cst_91 = arith.constant 0.000000e+00 : f32
    %585 = vector.broadcast %cst_91 : f32 to vector<8x128xf32>
    %586 = arith.maximumf %584, %585 : vector<8x128xf32>
    %587 = vector.broadcast %30 : f32 to vector<8x128xf32>
    %588 = arith.mulf %514, %587 : vector<8x128xf32>
    %589 = vector.broadcast %35 : f32 to vector<8x128xf32>
    %590 = arith.mulf %532, %589 : vector<8x128xf32>
    %591 = arith.addf %588, %590 : vector<8x128xf32>
    %592 = vector.broadcast %40 : f32 to vector<8x128xf32>
    %593 = arith.mulf %550, %592 : vector<8x128xf32>
    %594 = vector.broadcast %45 : f32 to vector<8x128xf32>
    %595 = arith.mulf %568, %594 : vector<8x128xf32>
    %596 = arith.addf %593, %595 : vector<8x128xf32>
    %597 = vector.broadcast %50 : f32 to vector<8x128xf32>
    %598 = arith.mulf %586, %597 : vector<8x128xf32>
    %599 = vector.broadcast %395 : f32 to vector<8x128xf32>
    %600 = arith.addf %598, %599 : vector<8x128xf32>
    %601 = arith.addf %591, %596 : vector<8x128xf32>
    %602 = arith.addf %601, %600 : vector<8x128xf32>
    %cst_92 = arith.constant 0.000000e+00 : f32
    %603 = vector.broadcast %cst_92 : f32 to vector<8x128xf32>
    %604 = arith.maximumf %602, %603 : vector<8x128xf32>
    %605 = vector.broadcast %31 : f32 to vector<8x128xf32>
    %606 = arith.mulf %514, %605 : vector<8x128xf32>
    %607 = vector.broadcast %36 : f32 to vector<8x128xf32>
    %608 = arith.mulf %532, %607 : vector<8x128xf32>
    %609 = arith.addf %606, %608 : vector<8x128xf32>
    %610 = vector.broadcast %41 : f32 to vector<8x128xf32>
    %611 = arith.mulf %550, %610 : vector<8x128xf32>
    %612 = vector.broadcast %46 : f32 to vector<8x128xf32>
    %613 = arith.mulf %568, %612 : vector<8x128xf32>
    %614 = arith.addf %611, %613 : vector<8x128xf32>
    %615 = vector.broadcast %51 : f32 to vector<8x128xf32>
    %616 = arith.mulf %586, %615 : vector<8x128xf32>
    %617 = vector.broadcast %396 : f32 to vector<8x128xf32>
    %618 = arith.addf %616, %617 : vector<8x128xf32>
    %619 = arith.addf %609, %614 : vector<8x128xf32>
    %620 = arith.addf %619, %618 : vector<8x128xf32>
    %cst_93 = arith.constant 0.000000e+00 : f32
    %621 = vector.broadcast %cst_93 : f32 to vector<8x128xf32>
    %622 = arith.maximumf %620, %621 : vector<8x128xf32>
    %623 = vector.broadcast %32 : f32 to vector<8x128xf32>
    %624 = arith.mulf %514, %623 : vector<8x128xf32>
    %625 = vector.broadcast %37 : f32 to vector<8x128xf32>
    %626 = arith.mulf %532, %625 : vector<8x128xf32>
    %627 = arith.addf %624, %626 : vector<8x128xf32>
    %628 = vector.broadcast %42 : f32 to vector<8x128xf32>
    %629 = arith.mulf %550, %628 : vector<8x128xf32>
    %630 = vector.broadcast %47 : f32 to vector<8x128xf32>
    %631 = arith.mulf %568, %630 : vector<8x128xf32>
    %632 = arith.addf %629, %631 : vector<8x128xf32>
    %633 = vector.broadcast %52 : f32 to vector<8x128xf32>
    %634 = arith.mulf %586, %633 : vector<8x128xf32>
    %635 = vector.broadcast %397 : f32 to vector<8x128xf32>
    %636 = arith.addf %634, %635 : vector<8x128xf32>
    %637 = arith.addf %627, %632 : vector<8x128xf32>
    %638 = arith.addf %637, %636 : vector<8x128xf32>
    %cst_94 = arith.constant 0.000000e+00 : f32
    %639 = vector.broadcast %cst_94 : f32 to vector<8x128xf32>
    %640 = arith.maximumf %638, %639 : vector<8x128xf32>
    %641 = vector.broadcast %33 : f32 to vector<8x128xf32>
    %642 = arith.mulf %514, %641 : vector<8x128xf32>
    %643 = vector.broadcast %38 : f32 to vector<8x128xf32>
    %644 = arith.mulf %532, %643 : vector<8x128xf32>
    %645 = arith.addf %642, %644 : vector<8x128xf32>
    %646 = vector.broadcast %43 : f32 to vector<8x128xf32>
    %647 = arith.mulf %550, %646 : vector<8x128xf32>
    %648 = vector.broadcast %48 : f32 to vector<8x128xf32>
    %649 = arith.mulf %568, %648 : vector<8x128xf32>
    %650 = arith.addf %647, %649 : vector<8x128xf32>
    %651 = vector.broadcast %53 : f32 to vector<8x128xf32>
    %652 = arith.mulf %586, %651 : vector<8x128xf32>
    %653 = vector.broadcast %398 : f32 to vector<8x128xf32>
    %654 = arith.addf %652, %653 : vector<8x128xf32>
    %655 = arith.addf %645, %650 : vector<8x128xf32>
    %656 = arith.addf %655, %654 : vector<8x128xf32>
    %cst_95 = arith.constant 0.000000e+00 : f32
    %657 = vector.broadcast %cst_95 : f32 to vector<8x128xf32>
    %658 = arith.maximumf %656, %657 : vector<8x128xf32>
    %659 = vector.broadcast %34 : f32 to vector<8x128xf32>
    %660 = arith.mulf %514, %659 : vector<8x128xf32>
    %661 = vector.broadcast %39 : f32 to vector<8x128xf32>
    %662 = arith.mulf %532, %661 : vector<8x128xf32>
    %663 = arith.addf %660, %662 : vector<8x128xf32>
    %664 = vector.broadcast %44 : f32 to vector<8x128xf32>
    %665 = arith.mulf %550, %664 : vector<8x128xf32>
    %666 = vector.broadcast %49 : f32 to vector<8x128xf32>
    %667 = arith.mulf %568, %666 : vector<8x128xf32>
    %668 = arith.addf %665, %667 : vector<8x128xf32>
    %669 = vector.broadcast %54 : f32 to vector<8x128xf32>
    %670 = arith.mulf %586, %669 : vector<8x128xf32>
    %671 = vector.broadcast %399 : f32 to vector<8x128xf32>
    %672 = arith.addf %670, %671 : vector<8x128xf32>
    %673 = arith.addf %663, %668 : vector<8x128xf32>
    %674 = arith.addf %673, %672 : vector<8x128xf32>
    %cst_96 = arith.constant 0.000000e+00 : f32
    %675 = vector.broadcast %cst_96 : f32 to vector<8x128xf32>
    %676 = arith.maximumf %674, %675 : vector<8x128xf32>
    %677 = vector.broadcast %55 : f32 to vector<8x128xf32>
    %678 = arith.mulf %604, %677 : vector<8x128xf32>
    %679 = vector.broadcast %60 : f32 to vector<8x128xf32>
    %680 = arith.mulf %622, %679 : vector<8x128xf32>
    %681 = arith.addf %678, %680 : vector<8x128xf32>
    %682 = vector.broadcast %65 : f32 to vector<8x128xf32>
    %683 = arith.mulf %640, %682 : vector<8x128xf32>
    %684 = vector.broadcast %70 : f32 to vector<8x128xf32>
    %685 = arith.mulf %658, %684 : vector<8x128xf32>
    %686 = arith.addf %683, %685 : vector<8x128xf32>
    %687 = vector.broadcast %75 : f32 to vector<8x128xf32>
    %688 = arith.mulf %676, %687 : vector<8x128xf32>
    %689 = vector.broadcast %400 : f32 to vector<8x128xf32>
    %690 = arith.addf %688, %689 : vector<8x128xf32>
    %691 = arith.addf %681, %686 : vector<8x128xf32>
    %692 = arith.addf %691, %690 : vector<8x128xf32>
    %cst_97 = arith.constant 0.000000e+00 : f32
    %693 = vector.broadcast %cst_97 : f32 to vector<8x128xf32>
    %694 = arith.maximumf %692, %693 : vector<8x128xf32>
    %695 = vector.broadcast %56 : f32 to vector<8x128xf32>
    %696 = arith.mulf %604, %695 : vector<8x128xf32>
    %697 = vector.broadcast %61 : f32 to vector<8x128xf32>
    %698 = arith.mulf %622, %697 : vector<8x128xf32>
    %699 = arith.addf %696, %698 : vector<8x128xf32>
    %700 = vector.broadcast %66 : f32 to vector<8x128xf32>
    %701 = arith.mulf %640, %700 : vector<8x128xf32>
    %702 = vector.broadcast %71 : f32 to vector<8x128xf32>
    %703 = arith.mulf %658, %702 : vector<8x128xf32>
    %704 = arith.addf %701, %703 : vector<8x128xf32>
    %705 = vector.broadcast %76 : f32 to vector<8x128xf32>
    %706 = arith.mulf %676, %705 : vector<8x128xf32>
    %707 = vector.broadcast %401 : f32 to vector<8x128xf32>
    %708 = arith.addf %706, %707 : vector<8x128xf32>
    %709 = arith.addf %699, %704 : vector<8x128xf32>
    %710 = arith.addf %709, %708 : vector<8x128xf32>
    %cst_98 = arith.constant 0.000000e+00 : f32
    %711 = vector.broadcast %cst_98 : f32 to vector<8x128xf32>
    %712 = arith.maximumf %710, %711 : vector<8x128xf32>
    %713 = vector.broadcast %57 : f32 to vector<8x128xf32>
    %714 = arith.mulf %604, %713 : vector<8x128xf32>
    %715 = vector.broadcast %62 : f32 to vector<8x128xf32>
    %716 = arith.mulf %622, %715 : vector<8x128xf32>
    %717 = arith.addf %714, %716 : vector<8x128xf32>
    %718 = vector.broadcast %67 : f32 to vector<8x128xf32>
    %719 = arith.mulf %640, %718 : vector<8x128xf32>
    %720 = vector.broadcast %72 : f32 to vector<8x128xf32>
    %721 = arith.mulf %658, %720 : vector<8x128xf32>
    %722 = arith.addf %719, %721 : vector<8x128xf32>
    %723 = vector.broadcast %77 : f32 to vector<8x128xf32>
    %724 = arith.mulf %676, %723 : vector<8x128xf32>
    %725 = vector.broadcast %402 : f32 to vector<8x128xf32>
    %726 = arith.addf %724, %725 : vector<8x128xf32>
    %727 = arith.addf %717, %722 : vector<8x128xf32>
    %728 = arith.addf %727, %726 : vector<8x128xf32>
    %cst_99 = arith.constant 0.000000e+00 : f32
    %729 = vector.broadcast %cst_99 : f32 to vector<8x128xf32>
    %730 = arith.maximumf %728, %729 : vector<8x128xf32>
    %731 = vector.broadcast %58 : f32 to vector<8x128xf32>
    %732 = arith.mulf %604, %731 : vector<8x128xf32>
    %733 = vector.broadcast %63 : f32 to vector<8x128xf32>
    %734 = arith.mulf %622, %733 : vector<8x128xf32>
    %735 = arith.addf %732, %734 : vector<8x128xf32>
    %736 = vector.broadcast %68 : f32 to vector<8x128xf32>
    %737 = arith.mulf %640, %736 : vector<8x128xf32>
    %738 = vector.broadcast %73 : f32 to vector<8x128xf32>
    %739 = arith.mulf %658, %738 : vector<8x128xf32>
    %740 = arith.addf %737, %739 : vector<8x128xf32>
    %741 = vector.broadcast %78 : f32 to vector<8x128xf32>
    %742 = arith.mulf %676, %741 : vector<8x128xf32>
    %743 = vector.broadcast %403 : f32 to vector<8x128xf32>
    %744 = arith.addf %742, %743 : vector<8x128xf32>
    %745 = arith.addf %735, %740 : vector<8x128xf32>
    %746 = arith.addf %745, %744 : vector<8x128xf32>
    %cst_100 = arith.constant 0.000000e+00 : f32
    %747 = vector.broadcast %cst_100 : f32 to vector<8x128xf32>
    %748 = arith.maximumf %746, %747 : vector<8x128xf32>
    %749 = vector.broadcast %59 : f32 to vector<8x128xf32>
    %750 = arith.mulf %604, %749 : vector<8x128xf32>
    %751 = vector.broadcast %64 : f32 to vector<8x128xf32>
    %752 = arith.mulf %622, %751 : vector<8x128xf32>
    %753 = arith.addf %750, %752 : vector<8x128xf32>
    %754 = vector.broadcast %69 : f32 to vector<8x128xf32>
    %755 = arith.mulf %640, %754 : vector<8x128xf32>
    %756 = vector.broadcast %74 : f32 to vector<8x128xf32>
    %757 = arith.mulf %658, %756 : vector<8x128xf32>
    %758 = arith.addf %755, %757 : vector<8x128xf32>
    %759 = vector.broadcast %79 : f32 to vector<8x128xf32>
    %760 = arith.mulf %676, %759 : vector<8x128xf32>
    %761 = vector.broadcast %404 : f32 to vector<8x128xf32>
    %762 = arith.addf %760, %761 : vector<8x128xf32>
    %763 = arith.addf %753, %758 : vector<8x128xf32>
    %764 = arith.addf %763, %762 : vector<8x128xf32>
    %cst_101 = arith.constant 0.000000e+00 : f32
    %765 = vector.broadcast %cst_101 : f32 to vector<8x128xf32>
    %766 = arith.maximumf %764, %765 : vector<8x128xf32>
    %767 = vector.broadcast %80 : f32 to vector<8x128xf32>
    %768 = arith.mulf %694, %767 : vector<8x128xf32>
    %769 = vector.broadcast %85 : f32 to vector<8x128xf32>
    %770 = arith.mulf %712, %769 : vector<8x128xf32>
    %771 = arith.addf %768, %770 : vector<8x128xf32>
    %772 = vector.broadcast %90 : f32 to vector<8x128xf32>
    %773 = arith.mulf %730, %772 : vector<8x128xf32>
    %774 = vector.broadcast %95 : f32 to vector<8x128xf32>
    %775 = arith.mulf %748, %774 : vector<8x128xf32>
    %776 = arith.addf %773, %775 : vector<8x128xf32>
    %777 = vector.broadcast %100 : f32 to vector<8x128xf32>
    %778 = arith.mulf %766, %777 : vector<8x128xf32>
    %779 = vector.broadcast %405 : f32 to vector<8x128xf32>
    %780 = arith.addf %778, %779 : vector<8x128xf32>
    %781 = arith.addf %771, %776 : vector<8x128xf32>
    %782 = arith.addf %781, %780 : vector<8x128xf32>
    %cst_102 = arith.constant 0.000000e+00 : f32
    %783 = vector.broadcast %cst_102 : f32 to vector<8x128xf32>
    %784 = arith.maximumf %782, %783 : vector<8x128xf32>
    %785 = vector.broadcast %81 : f32 to vector<8x128xf32>
    %786 = arith.mulf %694, %785 : vector<8x128xf32>
    %787 = vector.broadcast %86 : f32 to vector<8x128xf32>
    %788 = arith.mulf %712, %787 : vector<8x128xf32>
    %789 = arith.addf %786, %788 : vector<8x128xf32>
    %790 = vector.broadcast %91 : f32 to vector<8x128xf32>
    %791 = arith.mulf %730, %790 : vector<8x128xf32>
    %792 = vector.broadcast %96 : f32 to vector<8x128xf32>
    %793 = arith.mulf %748, %792 : vector<8x128xf32>
    %794 = arith.addf %791, %793 : vector<8x128xf32>
    %795 = vector.broadcast %101 : f32 to vector<8x128xf32>
    %796 = arith.mulf %766, %795 : vector<8x128xf32>
    %797 = vector.broadcast %406 : f32 to vector<8x128xf32>
    %798 = arith.addf %796, %797 : vector<8x128xf32>
    %799 = arith.addf %789, %794 : vector<8x128xf32>
    %800 = arith.addf %799, %798 : vector<8x128xf32>
    %cst_103 = arith.constant 0.000000e+00 : f32
    %801 = vector.broadcast %cst_103 : f32 to vector<8x128xf32>
    %802 = arith.maximumf %800, %801 : vector<8x128xf32>
    %803 = vector.broadcast %82 : f32 to vector<8x128xf32>
    %804 = arith.mulf %694, %803 : vector<8x128xf32>
    %805 = vector.broadcast %87 : f32 to vector<8x128xf32>
    %806 = arith.mulf %712, %805 : vector<8x128xf32>
    %807 = arith.addf %804, %806 : vector<8x128xf32>
    %808 = vector.broadcast %92 : f32 to vector<8x128xf32>
    %809 = arith.mulf %730, %808 : vector<8x128xf32>
    %810 = vector.broadcast %97 : f32 to vector<8x128xf32>
    %811 = arith.mulf %748, %810 : vector<8x128xf32>
    %812 = arith.addf %809, %811 : vector<8x128xf32>
    %813 = vector.broadcast %102 : f32 to vector<8x128xf32>
    %814 = arith.mulf %766, %813 : vector<8x128xf32>
    %815 = vector.broadcast %407 : f32 to vector<8x128xf32>
    %816 = arith.addf %814, %815 : vector<8x128xf32>
    %817 = arith.addf %807, %812 : vector<8x128xf32>
    %818 = arith.addf %817, %816 : vector<8x128xf32>
    %cst_104 = arith.constant 0.000000e+00 : f32
    %819 = vector.broadcast %cst_104 : f32 to vector<8x128xf32>
    %820 = arith.maximumf %818, %819 : vector<8x128xf32>
    %821 = vector.broadcast %83 : f32 to vector<8x128xf32>
    %822 = arith.mulf %694, %821 : vector<8x128xf32>
    %823 = vector.broadcast %88 : f32 to vector<8x128xf32>
    %824 = arith.mulf %712, %823 : vector<8x128xf32>
    %825 = arith.addf %822, %824 : vector<8x128xf32>
    %826 = vector.broadcast %93 : f32 to vector<8x128xf32>
    %827 = arith.mulf %730, %826 : vector<8x128xf32>
    %828 = vector.broadcast %98 : f32 to vector<8x128xf32>
    %829 = arith.mulf %748, %828 : vector<8x128xf32>
    %830 = arith.addf %827, %829 : vector<8x128xf32>
    %831 = vector.broadcast %103 : f32 to vector<8x128xf32>
    %832 = arith.mulf %766, %831 : vector<8x128xf32>
    %833 = vector.broadcast %408 : f32 to vector<8x128xf32>
    %834 = arith.addf %832, %833 : vector<8x128xf32>
    %835 = arith.addf %825, %830 : vector<8x128xf32>
    %836 = arith.addf %835, %834 : vector<8x128xf32>
    %cst_105 = arith.constant 0.000000e+00 : f32
    %837 = vector.broadcast %cst_105 : f32 to vector<8x128xf32>
    %838 = arith.maximumf %836, %837 : vector<8x128xf32>
    %839 = vector.broadcast %84 : f32 to vector<8x128xf32>
    %840 = arith.mulf %694, %839 : vector<8x128xf32>
    %841 = vector.broadcast %89 : f32 to vector<8x128xf32>
    %842 = arith.mulf %712, %841 : vector<8x128xf32>
    %843 = arith.addf %840, %842 : vector<8x128xf32>
    %844 = vector.broadcast %94 : f32 to vector<8x128xf32>
    %845 = arith.mulf %730, %844 : vector<8x128xf32>
    %846 = vector.broadcast %99 : f32 to vector<8x128xf32>
    %847 = arith.mulf %748, %846 : vector<8x128xf32>
    %848 = arith.addf %845, %847 : vector<8x128xf32>
    %849 = vector.broadcast %104 : f32 to vector<8x128xf32>
    %850 = arith.mulf %766, %849 : vector<8x128xf32>
    %851 = vector.broadcast %409 : f32 to vector<8x128xf32>
    %852 = arith.addf %850, %851 : vector<8x128xf32>
    %853 = arith.addf %843, %848 : vector<8x128xf32>
    %854 = arith.addf %853, %852 : vector<8x128xf32>
    %cst_106 = arith.constant 0.000000e+00 : f32
    %855 = vector.broadcast %cst_106 : f32 to vector<8x128xf32>
    %856 = arith.maximumf %854, %855 : vector<8x128xf32>
    %857 = vector.broadcast %105 : f32 to vector<8x128xf32>
    %858 = arith.mulf %784, %857 : vector<8x128xf32>
    %859 = vector.broadcast %110 : f32 to vector<8x128xf32>
    %860 = arith.mulf %802, %859 : vector<8x128xf32>
    %861 = arith.addf %858, %860 : vector<8x128xf32>
    %862 = vector.broadcast %115 : f32 to vector<8x128xf32>
    %863 = arith.mulf %820, %862 : vector<8x128xf32>
    %864 = vector.broadcast %120 : f32 to vector<8x128xf32>
    %865 = arith.mulf %838, %864 : vector<8x128xf32>
    %866 = arith.addf %863, %865 : vector<8x128xf32>
    %867 = vector.broadcast %125 : f32 to vector<8x128xf32>
    %868 = arith.mulf %856, %867 : vector<8x128xf32>
    %869 = vector.broadcast %410 : f32 to vector<8x128xf32>
    %870 = arith.addf %868, %869 : vector<8x128xf32>
    %871 = arith.addf %861, %866 : vector<8x128xf32>
    %872 = arith.addf %871, %870 : vector<8x128xf32>
    %cst_107 = arith.constant 0.000000e+00 : f32
    %873 = vector.broadcast %cst_107 : f32 to vector<8x128xf32>
    %874 = arith.maximumf %872, %873 : vector<8x128xf32>
    %875 = vector.broadcast %106 : f32 to vector<8x128xf32>
    %876 = arith.mulf %784, %875 : vector<8x128xf32>
    %877 = vector.broadcast %111 : f32 to vector<8x128xf32>
    %878 = arith.mulf %802, %877 : vector<8x128xf32>
    %879 = arith.addf %876, %878 : vector<8x128xf32>
    %880 = vector.broadcast %116 : f32 to vector<8x128xf32>
    %881 = arith.mulf %820, %880 : vector<8x128xf32>
    %882 = vector.broadcast %121 : f32 to vector<8x128xf32>
    %883 = arith.mulf %838, %882 : vector<8x128xf32>
    %884 = arith.addf %881, %883 : vector<8x128xf32>
    %885 = vector.broadcast %126 : f32 to vector<8x128xf32>
    %886 = arith.mulf %856, %885 : vector<8x128xf32>
    %887 = vector.broadcast %411 : f32 to vector<8x128xf32>
    %888 = arith.addf %886, %887 : vector<8x128xf32>
    %889 = arith.addf %879, %884 : vector<8x128xf32>
    %890 = arith.addf %889, %888 : vector<8x128xf32>
    %cst_108 = arith.constant 0.000000e+00 : f32
    %891 = vector.broadcast %cst_108 : f32 to vector<8x128xf32>
    %892 = arith.maximumf %890, %891 : vector<8x128xf32>
    %893 = vector.broadcast %107 : f32 to vector<8x128xf32>
    %894 = arith.mulf %784, %893 : vector<8x128xf32>
    %895 = vector.broadcast %112 : f32 to vector<8x128xf32>
    %896 = arith.mulf %802, %895 : vector<8x128xf32>
    %897 = arith.addf %894, %896 : vector<8x128xf32>
    %898 = vector.broadcast %117 : f32 to vector<8x128xf32>
    %899 = arith.mulf %820, %898 : vector<8x128xf32>
    %900 = vector.broadcast %122 : f32 to vector<8x128xf32>
    %901 = arith.mulf %838, %900 : vector<8x128xf32>
    %902 = arith.addf %899, %901 : vector<8x128xf32>
    %903 = vector.broadcast %127 : f32 to vector<8x128xf32>
    %904 = arith.mulf %856, %903 : vector<8x128xf32>
    %905 = vector.broadcast %412 : f32 to vector<8x128xf32>
    %906 = arith.addf %904, %905 : vector<8x128xf32>
    %907 = arith.addf %897, %902 : vector<8x128xf32>
    %908 = arith.addf %907, %906 : vector<8x128xf32>
    %cst_109 = arith.constant 0.000000e+00 : f32
    %909 = vector.broadcast %cst_109 : f32 to vector<8x128xf32>
    %910 = arith.maximumf %908, %909 : vector<8x128xf32>
    %911 = vector.broadcast %108 : f32 to vector<8x128xf32>
    %912 = arith.mulf %784, %911 : vector<8x128xf32>
    %913 = vector.broadcast %113 : f32 to vector<8x128xf32>
    %914 = arith.mulf %802, %913 : vector<8x128xf32>
    %915 = arith.addf %912, %914 : vector<8x128xf32>
    %916 = vector.broadcast %118 : f32 to vector<8x128xf32>
    %917 = arith.mulf %820, %916 : vector<8x128xf32>
    %918 = vector.broadcast %123 : f32 to vector<8x128xf32>
    %919 = arith.mulf %838, %918 : vector<8x128xf32>
    %920 = arith.addf %917, %919 : vector<8x128xf32>
    %921 = vector.broadcast %128 : f32 to vector<8x128xf32>
    %922 = arith.mulf %856, %921 : vector<8x128xf32>
    %923 = vector.broadcast %413 : f32 to vector<8x128xf32>
    %924 = arith.addf %922, %923 : vector<8x128xf32>
    %925 = arith.addf %915, %920 : vector<8x128xf32>
    %926 = arith.addf %925, %924 : vector<8x128xf32>
    %cst_110 = arith.constant 0.000000e+00 : f32
    %927 = vector.broadcast %cst_110 : f32 to vector<8x128xf32>
    %928 = arith.maximumf %926, %927 : vector<8x128xf32>
    %929 = vector.broadcast %109 : f32 to vector<8x128xf32>
    %930 = arith.mulf %784, %929 : vector<8x128xf32>
    %931 = vector.broadcast %114 : f32 to vector<8x128xf32>
    %932 = arith.mulf %802, %931 : vector<8x128xf32>
    %933 = arith.addf %930, %932 : vector<8x128xf32>
    %934 = vector.broadcast %119 : f32 to vector<8x128xf32>
    %935 = arith.mulf %820, %934 : vector<8x128xf32>
    %936 = vector.broadcast %124 : f32 to vector<8x128xf32>
    %937 = arith.mulf %838, %936 : vector<8x128xf32>
    %938 = arith.addf %935, %937 : vector<8x128xf32>
    %939 = vector.broadcast %129 : f32 to vector<8x128xf32>
    %940 = arith.mulf %856, %939 : vector<8x128xf32>
    %941 = vector.broadcast %414 : f32 to vector<8x128xf32>
    %942 = arith.addf %940, %941 : vector<8x128xf32>
    %943 = arith.addf %933, %938 : vector<8x128xf32>
    %944 = arith.addf %943, %942 : vector<8x128xf32>
    %cst_111 = arith.constant 0.000000e+00 : f32
    %945 = vector.broadcast %cst_111 : f32 to vector<8x128xf32>
    %946 = arith.maximumf %944, %945 : vector<8x128xf32>
    %947 = vector.broadcast %130 : f32 to vector<8x128xf32>
    %948 = arith.mulf %874, %947 : vector<8x128xf32>
    %949 = vector.broadcast %135 : f32 to vector<8x128xf32>
    %950 = arith.mulf %892, %949 : vector<8x128xf32>
    %951 = arith.addf %948, %950 : vector<8x128xf32>
    %952 = vector.broadcast %140 : f32 to vector<8x128xf32>
    %953 = arith.mulf %910, %952 : vector<8x128xf32>
    %954 = vector.broadcast %145 : f32 to vector<8x128xf32>
    %955 = arith.mulf %928, %954 : vector<8x128xf32>
    %956 = arith.addf %953, %955 : vector<8x128xf32>
    %957 = vector.broadcast %150 : f32 to vector<8x128xf32>
    %958 = arith.mulf %946, %957 : vector<8x128xf32>
    %959 = vector.broadcast %415 : f32 to vector<8x128xf32>
    %960 = arith.addf %958, %959 : vector<8x128xf32>
    %961 = arith.addf %951, %956 : vector<8x128xf32>
    %962 = arith.addf %961, %960 : vector<8x128xf32>
    %cst_112 = arith.constant 0.000000e+00 : f32
    %963 = vector.broadcast %cst_112 : f32 to vector<8x128xf32>
    %964 = arith.maximumf %962, %963 : vector<8x128xf32>
    %965 = vector.broadcast %131 : f32 to vector<8x128xf32>
    %966 = arith.mulf %874, %965 : vector<8x128xf32>
    %967 = vector.broadcast %136 : f32 to vector<8x128xf32>
    %968 = arith.mulf %892, %967 : vector<8x128xf32>
    %969 = arith.addf %966, %968 : vector<8x128xf32>
    %970 = vector.broadcast %141 : f32 to vector<8x128xf32>
    %971 = arith.mulf %910, %970 : vector<8x128xf32>
    %972 = vector.broadcast %146 : f32 to vector<8x128xf32>
    %973 = arith.mulf %928, %972 : vector<8x128xf32>
    %974 = arith.addf %971, %973 : vector<8x128xf32>
    %975 = vector.broadcast %151 : f32 to vector<8x128xf32>
    %976 = arith.mulf %946, %975 : vector<8x128xf32>
    %977 = vector.broadcast %416 : f32 to vector<8x128xf32>
    %978 = arith.addf %976, %977 : vector<8x128xf32>
    %979 = arith.addf %969, %974 : vector<8x128xf32>
    %980 = arith.addf %979, %978 : vector<8x128xf32>
    %cst_113 = arith.constant 0.000000e+00 : f32
    %981 = vector.broadcast %cst_113 : f32 to vector<8x128xf32>
    %982 = arith.maximumf %980, %981 : vector<8x128xf32>
    %983 = vector.broadcast %132 : f32 to vector<8x128xf32>
    %984 = arith.mulf %874, %983 : vector<8x128xf32>
    %985 = vector.broadcast %137 : f32 to vector<8x128xf32>
    %986 = arith.mulf %892, %985 : vector<8x128xf32>
    %987 = arith.addf %984, %986 : vector<8x128xf32>
    %988 = vector.broadcast %142 : f32 to vector<8x128xf32>
    %989 = arith.mulf %910, %988 : vector<8x128xf32>
    %990 = vector.broadcast %147 : f32 to vector<8x128xf32>
    %991 = arith.mulf %928, %990 : vector<8x128xf32>
    %992 = arith.addf %989, %991 : vector<8x128xf32>
    %993 = vector.broadcast %152 : f32 to vector<8x128xf32>
    %994 = arith.mulf %946, %993 : vector<8x128xf32>
    %995 = vector.broadcast %417 : f32 to vector<8x128xf32>
    %996 = arith.addf %994, %995 : vector<8x128xf32>
    %997 = arith.addf %987, %992 : vector<8x128xf32>
    %998 = arith.addf %997, %996 : vector<8x128xf32>
    %cst_114 = arith.constant 0.000000e+00 : f32
    %999 = vector.broadcast %cst_114 : f32 to vector<8x128xf32>
    %1000 = arith.maximumf %998, %999 : vector<8x128xf32>
    %1001 = vector.broadcast %133 : f32 to vector<8x128xf32>
    %1002 = arith.mulf %874, %1001 : vector<8x128xf32>
    %1003 = vector.broadcast %138 : f32 to vector<8x128xf32>
    %1004 = arith.mulf %892, %1003 : vector<8x128xf32>
    %1005 = arith.addf %1002, %1004 : vector<8x128xf32>
    %1006 = vector.broadcast %143 : f32 to vector<8x128xf32>
    %1007 = arith.mulf %910, %1006 : vector<8x128xf32>
    %1008 = vector.broadcast %148 : f32 to vector<8x128xf32>
    %1009 = arith.mulf %928, %1008 : vector<8x128xf32>
    %1010 = arith.addf %1007, %1009 : vector<8x128xf32>
    %1011 = vector.broadcast %153 : f32 to vector<8x128xf32>
    %1012 = arith.mulf %946, %1011 : vector<8x128xf32>
    %1013 = vector.broadcast %418 : f32 to vector<8x128xf32>
    %1014 = arith.addf %1012, %1013 : vector<8x128xf32>
    %1015 = arith.addf %1005, %1010 : vector<8x128xf32>
    %1016 = arith.addf %1015, %1014 : vector<8x128xf32>
    %cst_115 = arith.constant 0.000000e+00 : f32
    %1017 = vector.broadcast %cst_115 : f32 to vector<8x128xf32>
    %1018 = arith.maximumf %1016, %1017 : vector<8x128xf32>
    %1019 = vector.broadcast %134 : f32 to vector<8x128xf32>
    %1020 = arith.mulf %874, %1019 : vector<8x128xf32>
    %1021 = vector.broadcast %139 : f32 to vector<8x128xf32>
    %1022 = arith.mulf %892, %1021 : vector<8x128xf32>
    %1023 = arith.addf %1020, %1022 : vector<8x128xf32>
    %1024 = vector.broadcast %144 : f32 to vector<8x128xf32>
    %1025 = arith.mulf %910, %1024 : vector<8x128xf32>
    %1026 = vector.broadcast %149 : f32 to vector<8x128xf32>
    %1027 = arith.mulf %928, %1026 : vector<8x128xf32>
    %1028 = arith.addf %1025, %1027 : vector<8x128xf32>
    %1029 = vector.broadcast %154 : f32 to vector<8x128xf32>
    %1030 = arith.mulf %946, %1029 : vector<8x128xf32>
    %1031 = vector.broadcast %419 : f32 to vector<8x128xf32>
    %1032 = arith.addf %1030, %1031 : vector<8x128xf32>
    %1033 = arith.addf %1023, %1028 : vector<8x128xf32>
    %1034 = arith.addf %1033, %1032 : vector<8x128xf32>
    %cst_116 = arith.constant 0.000000e+00 : f32
    %1035 = vector.broadcast %cst_116 : f32 to vector<8x128xf32>
    %1036 = arith.maximumf %1034, %1035 : vector<8x128xf32>
    %1037 = vector.broadcast %155 : f32 to vector<8x128xf32>
    %1038 = arith.mulf %964, %1037 : vector<8x128xf32>
    %1039 = vector.broadcast %160 : f32 to vector<8x128xf32>
    %1040 = arith.mulf %982, %1039 : vector<8x128xf32>
    %1041 = arith.addf %1038, %1040 : vector<8x128xf32>
    %1042 = vector.broadcast %165 : f32 to vector<8x128xf32>
    %1043 = arith.mulf %1000, %1042 : vector<8x128xf32>
    %1044 = vector.broadcast %170 : f32 to vector<8x128xf32>
    %1045 = arith.mulf %1018, %1044 : vector<8x128xf32>
    %1046 = arith.addf %1043, %1045 : vector<8x128xf32>
    %1047 = vector.broadcast %175 : f32 to vector<8x128xf32>
    %1048 = arith.mulf %1036, %1047 : vector<8x128xf32>
    %1049 = vector.broadcast %420 : f32 to vector<8x128xf32>
    %1050 = arith.addf %1048, %1049 : vector<8x128xf32>
    %1051 = arith.addf %1041, %1046 : vector<8x128xf32>
    %1052 = arith.addf %1051, %1050 : vector<8x128xf32>
    %cst_117 = arith.constant 0.000000e+00 : f32
    %1053 = vector.broadcast %cst_117 : f32 to vector<8x128xf32>
    %1054 = arith.maximumf %1052, %1053 : vector<8x128xf32>
    %1055 = vector.broadcast %156 : f32 to vector<8x128xf32>
    %1056 = arith.mulf %964, %1055 : vector<8x128xf32>
    %1057 = vector.broadcast %161 : f32 to vector<8x128xf32>
    %1058 = arith.mulf %982, %1057 : vector<8x128xf32>
    %1059 = arith.addf %1056, %1058 : vector<8x128xf32>
    %1060 = vector.broadcast %166 : f32 to vector<8x128xf32>
    %1061 = arith.mulf %1000, %1060 : vector<8x128xf32>
    %1062 = vector.broadcast %171 : f32 to vector<8x128xf32>
    %1063 = arith.mulf %1018, %1062 : vector<8x128xf32>
    %1064 = arith.addf %1061, %1063 : vector<8x128xf32>
    %1065 = vector.broadcast %176 : f32 to vector<8x128xf32>
    %1066 = arith.mulf %1036, %1065 : vector<8x128xf32>
    %1067 = vector.broadcast %421 : f32 to vector<8x128xf32>
    %1068 = arith.addf %1066, %1067 : vector<8x128xf32>
    %1069 = arith.addf %1059, %1064 : vector<8x128xf32>
    %1070 = arith.addf %1069, %1068 : vector<8x128xf32>
    %cst_118 = arith.constant 0.000000e+00 : f32
    %1071 = vector.broadcast %cst_118 : f32 to vector<8x128xf32>
    %1072 = arith.maximumf %1070, %1071 : vector<8x128xf32>
    %1073 = vector.broadcast %157 : f32 to vector<8x128xf32>
    %1074 = arith.mulf %964, %1073 : vector<8x128xf32>
    %1075 = vector.broadcast %162 : f32 to vector<8x128xf32>
    %1076 = arith.mulf %982, %1075 : vector<8x128xf32>
    %1077 = arith.addf %1074, %1076 : vector<8x128xf32>
    %1078 = vector.broadcast %167 : f32 to vector<8x128xf32>
    %1079 = arith.mulf %1000, %1078 : vector<8x128xf32>
    %1080 = vector.broadcast %172 : f32 to vector<8x128xf32>
    %1081 = arith.mulf %1018, %1080 : vector<8x128xf32>
    %1082 = arith.addf %1079, %1081 : vector<8x128xf32>
    %1083 = vector.broadcast %177 : f32 to vector<8x128xf32>
    %1084 = arith.mulf %1036, %1083 : vector<8x128xf32>
    %1085 = vector.broadcast %422 : f32 to vector<8x128xf32>
    %1086 = arith.addf %1084, %1085 : vector<8x128xf32>
    %1087 = arith.addf %1077, %1082 : vector<8x128xf32>
    %1088 = arith.addf %1087, %1086 : vector<8x128xf32>
    %cst_119 = arith.constant 0.000000e+00 : f32
    %1089 = vector.broadcast %cst_119 : f32 to vector<8x128xf32>
    %1090 = arith.maximumf %1088, %1089 : vector<8x128xf32>
    %1091 = vector.broadcast %158 : f32 to vector<8x128xf32>
    %1092 = arith.mulf %964, %1091 : vector<8x128xf32>
    %1093 = vector.broadcast %163 : f32 to vector<8x128xf32>
    %1094 = arith.mulf %982, %1093 : vector<8x128xf32>
    %1095 = arith.addf %1092, %1094 : vector<8x128xf32>
    %1096 = vector.broadcast %168 : f32 to vector<8x128xf32>
    %1097 = arith.mulf %1000, %1096 : vector<8x128xf32>
    %1098 = vector.broadcast %173 : f32 to vector<8x128xf32>
    %1099 = arith.mulf %1018, %1098 : vector<8x128xf32>
    %1100 = arith.addf %1097, %1099 : vector<8x128xf32>
    %1101 = vector.broadcast %178 : f32 to vector<8x128xf32>
    %1102 = arith.mulf %1036, %1101 : vector<8x128xf32>
    %1103 = vector.broadcast %423 : f32 to vector<8x128xf32>
    %1104 = arith.addf %1102, %1103 : vector<8x128xf32>
    %1105 = arith.addf %1095, %1100 : vector<8x128xf32>
    %1106 = arith.addf %1105, %1104 : vector<8x128xf32>
    %cst_120 = arith.constant 0.000000e+00 : f32
    %1107 = vector.broadcast %cst_120 : f32 to vector<8x128xf32>
    %1108 = arith.maximumf %1106, %1107 : vector<8x128xf32>
    %1109 = vector.broadcast %159 : f32 to vector<8x128xf32>
    %1110 = arith.mulf %964, %1109 : vector<8x128xf32>
    %1111 = vector.broadcast %164 : f32 to vector<8x128xf32>
    %1112 = arith.mulf %982, %1111 : vector<8x128xf32>
    %1113 = arith.addf %1110, %1112 : vector<8x128xf32>
    %1114 = vector.broadcast %169 : f32 to vector<8x128xf32>
    %1115 = arith.mulf %1000, %1114 : vector<8x128xf32>
    %1116 = vector.broadcast %174 : f32 to vector<8x128xf32>
    %1117 = arith.mulf %1018, %1116 : vector<8x128xf32>
    %1118 = arith.addf %1115, %1117 : vector<8x128xf32>
    %1119 = vector.broadcast %179 : f32 to vector<8x128xf32>
    %1120 = arith.mulf %1036, %1119 : vector<8x128xf32>
    %1121 = vector.broadcast %424 : f32 to vector<8x128xf32>
    %1122 = arith.addf %1120, %1121 : vector<8x128xf32>
    %1123 = arith.addf %1113, %1118 : vector<8x128xf32>
    %1124 = arith.addf %1123, %1122 : vector<8x128xf32>
    %cst_121 = arith.constant 0.000000e+00 : f32
    %1125 = vector.broadcast %cst_121 : f32 to vector<8x128xf32>
    %1126 = arith.maximumf %1124, %1125 : vector<8x128xf32>
    %1127 = vector.broadcast %180 : f32 to vector<8x128xf32>
    %1128 = arith.mulf %1054, %1127 : vector<8x128xf32>
    %1129 = vector.broadcast %185 : f32 to vector<8x128xf32>
    %1130 = arith.mulf %1072, %1129 : vector<8x128xf32>
    %1131 = arith.addf %1128, %1130 : vector<8x128xf32>
    %1132 = vector.broadcast %190 : f32 to vector<8x128xf32>
    %1133 = arith.mulf %1090, %1132 : vector<8x128xf32>
    %1134 = vector.broadcast %195 : f32 to vector<8x128xf32>
    %1135 = arith.mulf %1108, %1134 : vector<8x128xf32>
    %1136 = arith.addf %1133, %1135 : vector<8x128xf32>
    %1137 = vector.broadcast %200 : f32 to vector<8x128xf32>
    %1138 = arith.mulf %1126, %1137 : vector<8x128xf32>
    %1139 = vector.broadcast %425 : f32 to vector<8x128xf32>
    %1140 = arith.addf %1138, %1139 : vector<8x128xf32>
    %1141 = arith.addf %1131, %1136 : vector<8x128xf32>
    %1142 = arith.addf %1141, %1140 : vector<8x128xf32>
    %cst_122 = arith.constant 0.000000e+00 : f32
    %1143 = vector.broadcast %cst_122 : f32 to vector<8x128xf32>
    %1144 = arith.maximumf %1142, %1143 : vector<8x128xf32>
    %1145 = vector.broadcast %181 : f32 to vector<8x128xf32>
    %1146 = arith.mulf %1054, %1145 : vector<8x128xf32>
    %1147 = vector.broadcast %186 : f32 to vector<8x128xf32>
    %1148 = arith.mulf %1072, %1147 : vector<8x128xf32>
    %1149 = arith.addf %1146, %1148 : vector<8x128xf32>
    %1150 = vector.broadcast %191 : f32 to vector<8x128xf32>
    %1151 = arith.mulf %1090, %1150 : vector<8x128xf32>
    %1152 = vector.broadcast %196 : f32 to vector<8x128xf32>
    %1153 = arith.mulf %1108, %1152 : vector<8x128xf32>
    %1154 = arith.addf %1151, %1153 : vector<8x128xf32>
    %1155 = vector.broadcast %201 : f32 to vector<8x128xf32>
    %1156 = arith.mulf %1126, %1155 : vector<8x128xf32>
    %1157 = vector.broadcast %426 : f32 to vector<8x128xf32>
    %1158 = arith.addf %1156, %1157 : vector<8x128xf32>
    %1159 = arith.addf %1149, %1154 : vector<8x128xf32>
    %1160 = arith.addf %1159, %1158 : vector<8x128xf32>
    %cst_123 = arith.constant 0.000000e+00 : f32
    %1161 = vector.broadcast %cst_123 : f32 to vector<8x128xf32>
    %1162 = arith.maximumf %1160, %1161 : vector<8x128xf32>
    %1163 = vector.broadcast %182 : f32 to vector<8x128xf32>
    %1164 = arith.mulf %1054, %1163 : vector<8x128xf32>
    %1165 = vector.broadcast %187 : f32 to vector<8x128xf32>
    %1166 = arith.mulf %1072, %1165 : vector<8x128xf32>
    %1167 = arith.addf %1164, %1166 : vector<8x128xf32>
    %1168 = vector.broadcast %192 : f32 to vector<8x128xf32>
    %1169 = arith.mulf %1090, %1168 : vector<8x128xf32>
    %1170 = vector.broadcast %197 : f32 to vector<8x128xf32>
    %1171 = arith.mulf %1108, %1170 : vector<8x128xf32>
    %1172 = arith.addf %1169, %1171 : vector<8x128xf32>
    %1173 = vector.broadcast %202 : f32 to vector<8x128xf32>
    %1174 = arith.mulf %1126, %1173 : vector<8x128xf32>
    %1175 = vector.broadcast %427 : f32 to vector<8x128xf32>
    %1176 = arith.addf %1174, %1175 : vector<8x128xf32>
    %1177 = arith.addf %1167, %1172 : vector<8x128xf32>
    %1178 = arith.addf %1177, %1176 : vector<8x128xf32>
    %cst_124 = arith.constant 0.000000e+00 : f32
    %1179 = vector.broadcast %cst_124 : f32 to vector<8x128xf32>
    %1180 = arith.maximumf %1178, %1179 : vector<8x128xf32>
    %1181 = vector.broadcast %183 : f32 to vector<8x128xf32>
    %1182 = arith.mulf %1054, %1181 : vector<8x128xf32>
    %1183 = vector.broadcast %188 : f32 to vector<8x128xf32>
    %1184 = arith.mulf %1072, %1183 : vector<8x128xf32>
    %1185 = arith.addf %1182, %1184 : vector<8x128xf32>
    %1186 = vector.broadcast %193 : f32 to vector<8x128xf32>
    %1187 = arith.mulf %1090, %1186 : vector<8x128xf32>
    %1188 = vector.broadcast %198 : f32 to vector<8x128xf32>
    %1189 = arith.mulf %1108, %1188 : vector<8x128xf32>
    %1190 = arith.addf %1187, %1189 : vector<8x128xf32>
    %1191 = vector.broadcast %203 : f32 to vector<8x128xf32>
    %1192 = arith.mulf %1126, %1191 : vector<8x128xf32>
    %1193 = vector.broadcast %428 : f32 to vector<8x128xf32>
    %1194 = arith.addf %1192, %1193 : vector<8x128xf32>
    %1195 = arith.addf %1185, %1190 : vector<8x128xf32>
    %1196 = arith.addf %1195, %1194 : vector<8x128xf32>
    %cst_125 = arith.constant 0.000000e+00 : f32
    %1197 = vector.broadcast %cst_125 : f32 to vector<8x128xf32>
    %1198 = arith.maximumf %1196, %1197 : vector<8x128xf32>
    %1199 = vector.broadcast %184 : f32 to vector<8x128xf32>
    %1200 = arith.mulf %1054, %1199 : vector<8x128xf32>
    %1201 = vector.broadcast %189 : f32 to vector<8x128xf32>
    %1202 = arith.mulf %1072, %1201 : vector<8x128xf32>
    %1203 = arith.addf %1200, %1202 : vector<8x128xf32>
    %1204 = vector.broadcast %194 : f32 to vector<8x128xf32>
    %1205 = arith.mulf %1090, %1204 : vector<8x128xf32>
    %1206 = vector.broadcast %199 : f32 to vector<8x128xf32>
    %1207 = arith.mulf %1108, %1206 : vector<8x128xf32>
    %1208 = arith.addf %1205, %1207 : vector<8x128xf32>
    %1209 = vector.broadcast %204 : f32 to vector<8x128xf32>
    %1210 = arith.mulf %1126, %1209 : vector<8x128xf32>
    %1211 = vector.broadcast %429 : f32 to vector<8x128xf32>
    %1212 = arith.addf %1210, %1211 : vector<8x128xf32>
    %1213 = arith.addf %1203, %1208 : vector<8x128xf32>
    %1214 = arith.addf %1213, %1212 : vector<8x128xf32>
    %cst_126 = arith.constant 0.000000e+00 : f32
    %1215 = vector.broadcast %cst_126 : f32 to vector<8x128xf32>
    %1216 = arith.maximumf %1214, %1215 : vector<8x128xf32>
    %1217 = vector.broadcast %205 : f32 to vector<8x128xf32>
    %1218 = arith.mulf %1144, %1217 : vector<8x128xf32>
    %1219 = vector.broadcast %210 : f32 to vector<8x128xf32>
    %1220 = arith.mulf %1162, %1219 : vector<8x128xf32>
    %1221 = arith.addf %1218, %1220 : vector<8x128xf32>
    %1222 = vector.broadcast %215 : f32 to vector<8x128xf32>
    %1223 = arith.mulf %1180, %1222 : vector<8x128xf32>
    %1224 = vector.broadcast %220 : f32 to vector<8x128xf32>
    %1225 = arith.mulf %1198, %1224 : vector<8x128xf32>
    %1226 = arith.addf %1223, %1225 : vector<8x128xf32>
    %1227 = vector.broadcast %225 : f32 to vector<8x128xf32>
    %1228 = arith.mulf %1216, %1227 : vector<8x128xf32>
    %1229 = vector.broadcast %430 : f32 to vector<8x128xf32>
    %1230 = arith.addf %1228, %1229 : vector<8x128xf32>
    %1231 = arith.addf %1221, %1226 : vector<8x128xf32>
    %1232 = arith.addf %1231, %1230 : vector<8x128xf32>
    %cst_127 = arith.constant 0.000000e+00 : f32
    %1233 = vector.broadcast %cst_127 : f32 to vector<8x128xf32>
    %1234 = arith.maximumf %1232, %1233 : vector<8x128xf32>
    %1235 = vector.broadcast %206 : f32 to vector<8x128xf32>
    %1236 = arith.mulf %1144, %1235 : vector<8x128xf32>
    %1237 = vector.broadcast %211 : f32 to vector<8x128xf32>
    %1238 = arith.mulf %1162, %1237 : vector<8x128xf32>
    %1239 = arith.addf %1236, %1238 : vector<8x128xf32>
    %1240 = vector.broadcast %216 : f32 to vector<8x128xf32>
    %1241 = arith.mulf %1180, %1240 : vector<8x128xf32>
    %1242 = vector.broadcast %221 : f32 to vector<8x128xf32>
    %1243 = arith.mulf %1198, %1242 : vector<8x128xf32>
    %1244 = arith.addf %1241, %1243 : vector<8x128xf32>
    %1245 = vector.broadcast %226 : f32 to vector<8x128xf32>
    %1246 = arith.mulf %1216, %1245 : vector<8x128xf32>
    %1247 = vector.broadcast %431 : f32 to vector<8x128xf32>
    %1248 = arith.addf %1246, %1247 : vector<8x128xf32>
    %1249 = arith.addf %1239, %1244 : vector<8x128xf32>
    %1250 = arith.addf %1249, %1248 : vector<8x128xf32>
    %cst_128 = arith.constant 0.000000e+00 : f32
    %1251 = vector.broadcast %cst_128 : f32 to vector<8x128xf32>
    %1252 = arith.maximumf %1250, %1251 : vector<8x128xf32>
    %1253 = vector.broadcast %207 : f32 to vector<8x128xf32>
    %1254 = arith.mulf %1144, %1253 : vector<8x128xf32>
    %1255 = vector.broadcast %212 : f32 to vector<8x128xf32>
    %1256 = arith.mulf %1162, %1255 : vector<8x128xf32>
    %1257 = arith.addf %1254, %1256 : vector<8x128xf32>
    %1258 = vector.broadcast %217 : f32 to vector<8x128xf32>
    %1259 = arith.mulf %1180, %1258 : vector<8x128xf32>
    %1260 = vector.broadcast %222 : f32 to vector<8x128xf32>
    %1261 = arith.mulf %1198, %1260 : vector<8x128xf32>
    %1262 = arith.addf %1259, %1261 : vector<8x128xf32>
    %1263 = vector.broadcast %227 : f32 to vector<8x128xf32>
    %1264 = arith.mulf %1216, %1263 : vector<8x128xf32>
    %1265 = vector.broadcast %432 : f32 to vector<8x128xf32>
    %1266 = arith.addf %1264, %1265 : vector<8x128xf32>
    %1267 = arith.addf %1257, %1262 : vector<8x128xf32>
    %1268 = arith.addf %1267, %1266 : vector<8x128xf32>
    %cst_129 = arith.constant 0.000000e+00 : f32
    %1269 = vector.broadcast %cst_129 : f32 to vector<8x128xf32>
    %1270 = arith.maximumf %1268, %1269 : vector<8x128xf32>
    %1271 = vector.broadcast %208 : f32 to vector<8x128xf32>
    %1272 = arith.mulf %1144, %1271 : vector<8x128xf32>
    %1273 = vector.broadcast %213 : f32 to vector<8x128xf32>
    %1274 = arith.mulf %1162, %1273 : vector<8x128xf32>
    %1275 = arith.addf %1272, %1274 : vector<8x128xf32>
    %1276 = vector.broadcast %218 : f32 to vector<8x128xf32>
    %1277 = arith.mulf %1180, %1276 : vector<8x128xf32>
    %1278 = vector.broadcast %223 : f32 to vector<8x128xf32>
    %1279 = arith.mulf %1198, %1278 : vector<8x128xf32>
    %1280 = arith.addf %1277, %1279 : vector<8x128xf32>
    %1281 = vector.broadcast %228 : f32 to vector<8x128xf32>
    %1282 = arith.mulf %1216, %1281 : vector<8x128xf32>
    %1283 = vector.broadcast %433 : f32 to vector<8x128xf32>
    %1284 = arith.addf %1282, %1283 : vector<8x128xf32>
    %1285 = arith.addf %1275, %1280 : vector<8x128xf32>
    %1286 = arith.addf %1285, %1284 : vector<8x128xf32>
    %cst_130 = arith.constant 0.000000e+00 : f32
    %1287 = vector.broadcast %cst_130 : f32 to vector<8x128xf32>
    %1288 = arith.maximumf %1286, %1287 : vector<8x128xf32>
    %1289 = vector.broadcast %209 : f32 to vector<8x128xf32>
    %1290 = arith.mulf %1144, %1289 : vector<8x128xf32>
    %1291 = vector.broadcast %214 : f32 to vector<8x128xf32>
    %1292 = arith.mulf %1162, %1291 : vector<8x128xf32>
    %1293 = arith.addf %1290, %1292 : vector<8x128xf32>
    %1294 = vector.broadcast %219 : f32 to vector<8x128xf32>
    %1295 = arith.mulf %1180, %1294 : vector<8x128xf32>
    %1296 = vector.broadcast %224 : f32 to vector<8x128xf32>
    %1297 = arith.mulf %1198, %1296 : vector<8x128xf32>
    %1298 = arith.addf %1295, %1297 : vector<8x128xf32>
    %1299 = vector.broadcast %229 : f32 to vector<8x128xf32>
    %1300 = arith.mulf %1216, %1299 : vector<8x128xf32>
    %1301 = vector.broadcast %434 : f32 to vector<8x128xf32>
    %1302 = arith.addf %1300, %1301 : vector<8x128xf32>
    %1303 = arith.addf %1293, %1298 : vector<8x128xf32>
    %1304 = arith.addf %1303, %1302 : vector<8x128xf32>
    %cst_131 = arith.constant 0.000000e+00 : f32
    %1305 = vector.broadcast %cst_131 : f32 to vector<8x128xf32>
    %1306 = arith.maximumf %1304, %1305 : vector<8x128xf32>
    %1307 = vector.broadcast %230 : f32 to vector<8x128xf32>
    %1308 = arith.mulf %1234, %1307 : vector<8x128xf32>
    %1309 = vector.broadcast %235 : f32 to vector<8x128xf32>
    %1310 = arith.mulf %1252, %1309 : vector<8x128xf32>
    %1311 = arith.addf %1308, %1310 : vector<8x128xf32>
    %1312 = vector.broadcast %240 : f32 to vector<8x128xf32>
    %1313 = arith.mulf %1270, %1312 : vector<8x128xf32>
    %1314 = vector.broadcast %245 : f32 to vector<8x128xf32>
    %1315 = arith.mulf %1288, %1314 : vector<8x128xf32>
    %1316 = arith.addf %1313, %1315 : vector<8x128xf32>
    %1317 = vector.broadcast %250 : f32 to vector<8x128xf32>
    %1318 = arith.mulf %1306, %1317 : vector<8x128xf32>
    %1319 = vector.broadcast %435 : f32 to vector<8x128xf32>
    %1320 = arith.addf %1318, %1319 : vector<8x128xf32>
    %1321 = arith.addf %1311, %1316 : vector<8x128xf32>
    %1322 = arith.addf %1321, %1320 : vector<8x128xf32>
    %cst_132 = arith.constant 0.000000e+00 : f32
    %1323 = vector.broadcast %cst_132 : f32 to vector<8x128xf32>
    %1324 = arith.maximumf %1322, %1323 : vector<8x128xf32>
    %1325 = vector.broadcast %231 : f32 to vector<8x128xf32>
    %1326 = arith.mulf %1234, %1325 : vector<8x128xf32>
    %1327 = vector.broadcast %236 : f32 to vector<8x128xf32>
    %1328 = arith.mulf %1252, %1327 : vector<8x128xf32>
    %1329 = arith.addf %1326, %1328 : vector<8x128xf32>
    %1330 = vector.broadcast %241 : f32 to vector<8x128xf32>
    %1331 = arith.mulf %1270, %1330 : vector<8x128xf32>
    %1332 = vector.broadcast %246 : f32 to vector<8x128xf32>
    %1333 = arith.mulf %1288, %1332 : vector<8x128xf32>
    %1334 = arith.addf %1331, %1333 : vector<8x128xf32>
    %1335 = vector.broadcast %251 : f32 to vector<8x128xf32>
    %1336 = arith.mulf %1306, %1335 : vector<8x128xf32>
    %1337 = vector.broadcast %436 : f32 to vector<8x128xf32>
    %1338 = arith.addf %1336, %1337 : vector<8x128xf32>
    %1339 = arith.addf %1329, %1334 : vector<8x128xf32>
    %1340 = arith.addf %1339, %1338 : vector<8x128xf32>
    %cst_133 = arith.constant 0.000000e+00 : f32
    %1341 = vector.broadcast %cst_133 : f32 to vector<8x128xf32>
    %1342 = arith.maximumf %1340, %1341 : vector<8x128xf32>
    %1343 = vector.broadcast %232 : f32 to vector<8x128xf32>
    %1344 = arith.mulf %1234, %1343 : vector<8x128xf32>
    %1345 = vector.broadcast %237 : f32 to vector<8x128xf32>
    %1346 = arith.mulf %1252, %1345 : vector<8x128xf32>
    %1347 = arith.addf %1344, %1346 : vector<8x128xf32>
    %1348 = vector.broadcast %242 : f32 to vector<8x128xf32>
    %1349 = arith.mulf %1270, %1348 : vector<8x128xf32>
    %1350 = vector.broadcast %247 : f32 to vector<8x128xf32>
    %1351 = arith.mulf %1288, %1350 : vector<8x128xf32>
    %1352 = arith.addf %1349, %1351 : vector<8x128xf32>
    %1353 = vector.broadcast %252 : f32 to vector<8x128xf32>
    %1354 = arith.mulf %1306, %1353 : vector<8x128xf32>
    %1355 = vector.broadcast %437 : f32 to vector<8x128xf32>
    %1356 = arith.addf %1354, %1355 : vector<8x128xf32>
    %1357 = arith.addf %1347, %1352 : vector<8x128xf32>
    %1358 = arith.addf %1357, %1356 : vector<8x128xf32>
    %cst_134 = arith.constant 0.000000e+00 : f32
    %1359 = vector.broadcast %cst_134 : f32 to vector<8x128xf32>
    %1360 = arith.maximumf %1358, %1359 : vector<8x128xf32>
    %1361 = vector.broadcast %233 : f32 to vector<8x128xf32>
    %1362 = arith.mulf %1234, %1361 : vector<8x128xf32>
    %1363 = vector.broadcast %238 : f32 to vector<8x128xf32>
    %1364 = arith.mulf %1252, %1363 : vector<8x128xf32>
    %1365 = arith.addf %1362, %1364 : vector<8x128xf32>
    %1366 = vector.broadcast %243 : f32 to vector<8x128xf32>
    %1367 = arith.mulf %1270, %1366 : vector<8x128xf32>
    %1368 = vector.broadcast %248 : f32 to vector<8x128xf32>
    %1369 = arith.mulf %1288, %1368 : vector<8x128xf32>
    %1370 = arith.addf %1367, %1369 : vector<8x128xf32>
    %1371 = vector.broadcast %253 : f32 to vector<8x128xf32>
    %1372 = arith.mulf %1306, %1371 : vector<8x128xf32>
    %1373 = vector.broadcast %438 : f32 to vector<8x128xf32>
    %1374 = arith.addf %1372, %1373 : vector<8x128xf32>
    %1375 = arith.addf %1365, %1370 : vector<8x128xf32>
    %1376 = arith.addf %1375, %1374 : vector<8x128xf32>
    %cst_135 = arith.constant 0.000000e+00 : f32
    %1377 = vector.broadcast %cst_135 : f32 to vector<8x128xf32>
    %1378 = arith.maximumf %1376, %1377 : vector<8x128xf32>
    %1379 = vector.broadcast %234 : f32 to vector<8x128xf32>
    %1380 = arith.mulf %1234, %1379 : vector<8x128xf32>
    %1381 = vector.broadcast %239 : f32 to vector<8x128xf32>
    %1382 = arith.mulf %1252, %1381 : vector<8x128xf32>
    %1383 = arith.addf %1380, %1382 : vector<8x128xf32>
    %1384 = vector.broadcast %244 : f32 to vector<8x128xf32>
    %1385 = arith.mulf %1270, %1384 : vector<8x128xf32>
    %1386 = vector.broadcast %249 : f32 to vector<8x128xf32>
    %1387 = arith.mulf %1288, %1386 : vector<8x128xf32>
    %1388 = arith.addf %1385, %1387 : vector<8x128xf32>
    %1389 = vector.broadcast %254 : f32 to vector<8x128xf32>
    %1390 = arith.mulf %1306, %1389 : vector<8x128xf32>
    %1391 = vector.broadcast %439 : f32 to vector<8x128xf32>
    %1392 = arith.addf %1390, %1391 : vector<8x128xf32>
    %1393 = arith.addf %1383, %1388 : vector<8x128xf32>
    %1394 = arith.addf %1393, %1392 : vector<8x128xf32>
    %cst_136 = arith.constant 0.000000e+00 : f32
    %1395 = vector.broadcast %cst_136 : f32 to vector<8x128xf32>
    %1396 = arith.maximumf %1394, %1395 : vector<8x128xf32>
    %1397 = vector.broadcast %255 : f32 to vector<8x128xf32>
    %1398 = arith.mulf %1324, %1397 : vector<8x128xf32>
    %1399 = vector.broadcast %260 : f32 to vector<8x128xf32>
    %1400 = arith.mulf %1342, %1399 : vector<8x128xf32>
    %1401 = arith.addf %1398, %1400 : vector<8x128xf32>
    %1402 = vector.broadcast %265 : f32 to vector<8x128xf32>
    %1403 = arith.mulf %1360, %1402 : vector<8x128xf32>
    %1404 = vector.broadcast %270 : f32 to vector<8x128xf32>
    %1405 = arith.mulf %1378, %1404 : vector<8x128xf32>
    %1406 = arith.addf %1403, %1405 : vector<8x128xf32>
    %1407 = vector.broadcast %275 : f32 to vector<8x128xf32>
    %1408 = arith.mulf %1396, %1407 : vector<8x128xf32>
    %1409 = vector.broadcast %440 : f32 to vector<8x128xf32>
    %1410 = arith.addf %1408, %1409 : vector<8x128xf32>
    %1411 = arith.addf %1401, %1406 : vector<8x128xf32>
    %1412 = arith.addf %1411, %1410 : vector<8x128xf32>
    %cst_137 = arith.constant 0.000000e+00 : f32
    %1413 = vector.broadcast %cst_137 : f32 to vector<8x128xf32>
    %1414 = arith.maximumf %1412, %1413 : vector<8x128xf32>
    %1415 = vector.broadcast %256 : f32 to vector<8x128xf32>
    %1416 = arith.mulf %1324, %1415 : vector<8x128xf32>
    %1417 = vector.broadcast %261 : f32 to vector<8x128xf32>
    %1418 = arith.mulf %1342, %1417 : vector<8x128xf32>
    %1419 = arith.addf %1416, %1418 : vector<8x128xf32>
    %1420 = vector.broadcast %266 : f32 to vector<8x128xf32>
    %1421 = arith.mulf %1360, %1420 : vector<8x128xf32>
    %1422 = vector.broadcast %271 : f32 to vector<8x128xf32>
    %1423 = arith.mulf %1378, %1422 : vector<8x128xf32>
    %1424 = arith.addf %1421, %1423 : vector<8x128xf32>
    %1425 = vector.broadcast %276 : f32 to vector<8x128xf32>
    %1426 = arith.mulf %1396, %1425 : vector<8x128xf32>
    %1427 = vector.broadcast %441 : f32 to vector<8x128xf32>
    %1428 = arith.addf %1426, %1427 : vector<8x128xf32>
    %1429 = arith.addf %1419, %1424 : vector<8x128xf32>
    %1430 = arith.addf %1429, %1428 : vector<8x128xf32>
    %cst_138 = arith.constant 0.000000e+00 : f32
    %1431 = vector.broadcast %cst_138 : f32 to vector<8x128xf32>
    %1432 = arith.maximumf %1430, %1431 : vector<8x128xf32>
    %1433 = vector.broadcast %257 : f32 to vector<8x128xf32>
    %1434 = arith.mulf %1324, %1433 : vector<8x128xf32>
    %1435 = vector.broadcast %262 : f32 to vector<8x128xf32>
    %1436 = arith.mulf %1342, %1435 : vector<8x128xf32>
    %1437 = arith.addf %1434, %1436 : vector<8x128xf32>
    %1438 = vector.broadcast %267 : f32 to vector<8x128xf32>
    %1439 = arith.mulf %1360, %1438 : vector<8x128xf32>
    %1440 = vector.broadcast %272 : f32 to vector<8x128xf32>
    %1441 = arith.mulf %1378, %1440 : vector<8x128xf32>
    %1442 = arith.addf %1439, %1441 : vector<8x128xf32>
    %1443 = vector.broadcast %277 : f32 to vector<8x128xf32>
    %1444 = arith.mulf %1396, %1443 : vector<8x128xf32>
    %1445 = vector.broadcast %442 : f32 to vector<8x128xf32>
    %1446 = arith.addf %1444, %1445 : vector<8x128xf32>
    %1447 = arith.addf %1437, %1442 : vector<8x128xf32>
    %1448 = arith.addf %1447, %1446 : vector<8x128xf32>
    %cst_139 = arith.constant 0.000000e+00 : f32
    %1449 = vector.broadcast %cst_139 : f32 to vector<8x128xf32>
    %1450 = arith.maximumf %1448, %1449 : vector<8x128xf32>
    %1451 = vector.broadcast %258 : f32 to vector<8x128xf32>
    %1452 = arith.mulf %1324, %1451 : vector<8x128xf32>
    %1453 = vector.broadcast %263 : f32 to vector<8x128xf32>
    %1454 = arith.mulf %1342, %1453 : vector<8x128xf32>
    %1455 = arith.addf %1452, %1454 : vector<8x128xf32>
    %1456 = vector.broadcast %268 : f32 to vector<8x128xf32>
    %1457 = arith.mulf %1360, %1456 : vector<8x128xf32>
    %1458 = vector.broadcast %273 : f32 to vector<8x128xf32>
    %1459 = arith.mulf %1378, %1458 : vector<8x128xf32>
    %1460 = arith.addf %1457, %1459 : vector<8x128xf32>
    %1461 = vector.broadcast %278 : f32 to vector<8x128xf32>
    %1462 = arith.mulf %1396, %1461 : vector<8x128xf32>
    %1463 = vector.broadcast %443 : f32 to vector<8x128xf32>
    %1464 = arith.addf %1462, %1463 : vector<8x128xf32>
    %1465 = arith.addf %1455, %1460 : vector<8x128xf32>
    %1466 = arith.addf %1465, %1464 : vector<8x128xf32>
    %cst_140 = arith.constant 0.000000e+00 : f32
    %1467 = vector.broadcast %cst_140 : f32 to vector<8x128xf32>
    %1468 = arith.maximumf %1466, %1467 : vector<8x128xf32>
    %1469 = vector.broadcast %259 : f32 to vector<8x128xf32>
    %1470 = arith.mulf %1324, %1469 : vector<8x128xf32>
    %1471 = vector.broadcast %264 : f32 to vector<8x128xf32>
    %1472 = arith.mulf %1342, %1471 : vector<8x128xf32>
    %1473 = arith.addf %1470, %1472 : vector<8x128xf32>
    %1474 = vector.broadcast %269 : f32 to vector<8x128xf32>
    %1475 = arith.mulf %1360, %1474 : vector<8x128xf32>
    %1476 = vector.broadcast %274 : f32 to vector<8x128xf32>
    %1477 = arith.mulf %1378, %1476 : vector<8x128xf32>
    %1478 = arith.addf %1475, %1477 : vector<8x128xf32>
    %1479 = vector.broadcast %279 : f32 to vector<8x128xf32>
    %1480 = arith.mulf %1396, %1479 : vector<8x128xf32>
    %1481 = vector.broadcast %444 : f32 to vector<8x128xf32>
    %1482 = arith.addf %1480, %1481 : vector<8x128xf32>
    %1483 = arith.addf %1473, %1478 : vector<8x128xf32>
    %1484 = arith.addf %1483, %1482 : vector<8x128xf32>
    %cst_141 = arith.constant 0.000000e+00 : f32
    %1485 = vector.broadcast %cst_141 : f32 to vector<8x128xf32>
    %1486 = arith.maximumf %1484, %1485 : vector<8x128xf32>
    %1487 = vector.broadcast %280 : f32 to vector<8x128xf32>
    %1488 = arith.mulf %1414, %1487 : vector<8x128xf32>
    %1489 = vector.broadcast %285 : f32 to vector<8x128xf32>
    %1490 = arith.mulf %1432, %1489 : vector<8x128xf32>
    %1491 = arith.addf %1488, %1490 : vector<8x128xf32>
    %1492 = vector.broadcast %290 : f32 to vector<8x128xf32>
    %1493 = arith.mulf %1450, %1492 : vector<8x128xf32>
    %1494 = vector.broadcast %295 : f32 to vector<8x128xf32>
    %1495 = arith.mulf %1468, %1494 : vector<8x128xf32>
    %1496 = arith.addf %1493, %1495 : vector<8x128xf32>
    %1497 = vector.broadcast %300 : f32 to vector<8x128xf32>
    %1498 = arith.mulf %1486, %1497 : vector<8x128xf32>
    %1499 = vector.broadcast %445 : f32 to vector<8x128xf32>
    %1500 = arith.addf %1498, %1499 : vector<8x128xf32>
    %1501 = arith.addf %1491, %1496 : vector<8x128xf32>
    %1502 = arith.addf %1501, %1500 : vector<8x128xf32>
    %cst_142 = arith.constant 0.000000e+00 : f32
    %1503 = vector.broadcast %cst_142 : f32 to vector<8x128xf32>
    %1504 = arith.maximumf %1502, %1503 : vector<8x128xf32>
    %1505 = vector.broadcast %281 : f32 to vector<8x128xf32>
    %1506 = arith.mulf %1414, %1505 : vector<8x128xf32>
    %1507 = vector.broadcast %286 : f32 to vector<8x128xf32>
    %1508 = arith.mulf %1432, %1507 : vector<8x128xf32>
    %1509 = arith.addf %1506, %1508 : vector<8x128xf32>
    %1510 = vector.broadcast %291 : f32 to vector<8x128xf32>
    %1511 = arith.mulf %1450, %1510 : vector<8x128xf32>
    %1512 = vector.broadcast %296 : f32 to vector<8x128xf32>
    %1513 = arith.mulf %1468, %1512 : vector<8x128xf32>
    %1514 = arith.addf %1511, %1513 : vector<8x128xf32>
    %1515 = vector.broadcast %301 : f32 to vector<8x128xf32>
    %1516 = arith.mulf %1486, %1515 : vector<8x128xf32>
    %1517 = vector.broadcast %446 : f32 to vector<8x128xf32>
    %1518 = arith.addf %1516, %1517 : vector<8x128xf32>
    %1519 = arith.addf %1509, %1514 : vector<8x128xf32>
    %1520 = arith.addf %1519, %1518 : vector<8x128xf32>
    %cst_143 = arith.constant 0.000000e+00 : f32
    %1521 = vector.broadcast %cst_143 : f32 to vector<8x128xf32>
    %1522 = arith.maximumf %1520, %1521 : vector<8x128xf32>
    %1523 = vector.broadcast %282 : f32 to vector<8x128xf32>
    %1524 = arith.mulf %1414, %1523 : vector<8x128xf32>
    %1525 = vector.broadcast %287 : f32 to vector<8x128xf32>
    %1526 = arith.mulf %1432, %1525 : vector<8x128xf32>
    %1527 = arith.addf %1524, %1526 : vector<8x128xf32>
    %1528 = vector.broadcast %292 : f32 to vector<8x128xf32>
    %1529 = arith.mulf %1450, %1528 : vector<8x128xf32>
    %1530 = vector.broadcast %297 : f32 to vector<8x128xf32>
    %1531 = arith.mulf %1468, %1530 : vector<8x128xf32>
    %1532 = arith.addf %1529, %1531 : vector<8x128xf32>
    %1533 = vector.broadcast %302 : f32 to vector<8x128xf32>
    %1534 = arith.mulf %1486, %1533 : vector<8x128xf32>
    %1535 = vector.broadcast %447 : f32 to vector<8x128xf32>
    %1536 = arith.addf %1534, %1535 : vector<8x128xf32>
    %1537 = arith.addf %1527, %1532 : vector<8x128xf32>
    %1538 = arith.addf %1537, %1536 : vector<8x128xf32>
    %cst_144 = arith.constant 0.000000e+00 : f32
    %1539 = vector.broadcast %cst_144 : f32 to vector<8x128xf32>
    %1540 = arith.maximumf %1538, %1539 : vector<8x128xf32>
    %1541 = vector.broadcast %283 : f32 to vector<8x128xf32>
    %1542 = arith.mulf %1414, %1541 : vector<8x128xf32>
    %1543 = vector.broadcast %288 : f32 to vector<8x128xf32>
    %1544 = arith.mulf %1432, %1543 : vector<8x128xf32>
    %1545 = arith.addf %1542, %1544 : vector<8x128xf32>
    %1546 = vector.broadcast %293 : f32 to vector<8x128xf32>
    %1547 = arith.mulf %1450, %1546 : vector<8x128xf32>
    %1548 = vector.broadcast %298 : f32 to vector<8x128xf32>
    %1549 = arith.mulf %1468, %1548 : vector<8x128xf32>
    %1550 = arith.addf %1547, %1549 : vector<8x128xf32>
    %1551 = vector.broadcast %303 : f32 to vector<8x128xf32>
    %1552 = arith.mulf %1486, %1551 : vector<8x128xf32>
    %1553 = vector.broadcast %448 : f32 to vector<8x128xf32>
    %1554 = arith.addf %1552, %1553 : vector<8x128xf32>
    %1555 = arith.addf %1545, %1550 : vector<8x128xf32>
    %1556 = arith.addf %1555, %1554 : vector<8x128xf32>
    %cst_145 = arith.constant 0.000000e+00 : f32
    %1557 = vector.broadcast %cst_145 : f32 to vector<8x128xf32>
    %1558 = arith.maximumf %1556, %1557 : vector<8x128xf32>
    %1559 = vector.broadcast %284 : f32 to vector<8x128xf32>
    %1560 = arith.mulf %1414, %1559 : vector<8x128xf32>
    %1561 = vector.broadcast %289 : f32 to vector<8x128xf32>
    %1562 = arith.mulf %1432, %1561 : vector<8x128xf32>
    %1563 = arith.addf %1560, %1562 : vector<8x128xf32>
    %1564 = vector.broadcast %294 : f32 to vector<8x128xf32>
    %1565 = arith.mulf %1450, %1564 : vector<8x128xf32>
    %1566 = vector.broadcast %299 : f32 to vector<8x128xf32>
    %1567 = arith.mulf %1468, %1566 : vector<8x128xf32>
    %1568 = arith.addf %1565, %1567 : vector<8x128xf32>
    %1569 = vector.broadcast %304 : f32 to vector<8x128xf32>
    %1570 = arith.mulf %1486, %1569 : vector<8x128xf32>
    %1571 = vector.broadcast %449 : f32 to vector<8x128xf32>
    %1572 = arith.addf %1570, %1571 : vector<8x128xf32>
    %1573 = arith.addf %1563, %1568 : vector<8x128xf32>
    %1574 = arith.addf %1573, %1572 : vector<8x128xf32>
    %cst_146 = arith.constant 0.000000e+00 : f32
    %1575 = vector.broadcast %cst_146 : f32 to vector<8x128xf32>
    %1576 = arith.maximumf %1574, %1575 : vector<8x128xf32>
    %1577 = vector.broadcast %305 : f32 to vector<8x128xf32>
    %1578 = arith.mulf %1504, %1577 : vector<8x128xf32>
    %1579 = vector.broadcast %310 : f32 to vector<8x128xf32>
    %1580 = arith.mulf %1522, %1579 : vector<8x128xf32>
    %1581 = arith.addf %1578, %1580 : vector<8x128xf32>
    %1582 = vector.broadcast %315 : f32 to vector<8x128xf32>
    %1583 = arith.mulf %1540, %1582 : vector<8x128xf32>
    %1584 = vector.broadcast %320 : f32 to vector<8x128xf32>
    %1585 = arith.mulf %1558, %1584 : vector<8x128xf32>
    %1586 = arith.addf %1583, %1585 : vector<8x128xf32>
    %1587 = vector.broadcast %325 : f32 to vector<8x128xf32>
    %1588 = arith.mulf %1576, %1587 : vector<8x128xf32>
    %1589 = vector.broadcast %450 : f32 to vector<8x128xf32>
    %1590 = arith.addf %1588, %1589 : vector<8x128xf32>
    %1591 = arith.addf %1581, %1586 : vector<8x128xf32>
    %1592 = arith.addf %1591, %1590 : vector<8x128xf32>
    %cst_147 = arith.constant 0.000000e+00 : f32
    %1593 = vector.broadcast %cst_147 : f32 to vector<8x128xf32>
    %1594 = arith.maximumf %1592, %1593 : vector<8x128xf32>
    %1595 = vector.broadcast %306 : f32 to vector<8x128xf32>
    %1596 = arith.mulf %1504, %1595 : vector<8x128xf32>
    %1597 = vector.broadcast %311 : f32 to vector<8x128xf32>
    %1598 = arith.mulf %1522, %1597 : vector<8x128xf32>
    %1599 = arith.addf %1596, %1598 : vector<8x128xf32>
    %1600 = vector.broadcast %316 : f32 to vector<8x128xf32>
    %1601 = arith.mulf %1540, %1600 : vector<8x128xf32>
    %1602 = vector.broadcast %321 : f32 to vector<8x128xf32>
    %1603 = arith.mulf %1558, %1602 : vector<8x128xf32>
    %1604 = arith.addf %1601, %1603 : vector<8x128xf32>
    %1605 = vector.broadcast %326 : f32 to vector<8x128xf32>
    %1606 = arith.mulf %1576, %1605 : vector<8x128xf32>
    %1607 = vector.broadcast %451 : f32 to vector<8x128xf32>
    %1608 = arith.addf %1606, %1607 : vector<8x128xf32>
    %1609 = arith.addf %1599, %1604 : vector<8x128xf32>
    %1610 = arith.addf %1609, %1608 : vector<8x128xf32>
    %cst_148 = arith.constant 0.000000e+00 : f32
    %1611 = vector.broadcast %cst_148 : f32 to vector<8x128xf32>
    %1612 = arith.maximumf %1610, %1611 : vector<8x128xf32>
    %1613 = vector.broadcast %307 : f32 to vector<8x128xf32>
    %1614 = arith.mulf %1504, %1613 : vector<8x128xf32>
    %1615 = vector.broadcast %312 : f32 to vector<8x128xf32>
    %1616 = arith.mulf %1522, %1615 : vector<8x128xf32>
    %1617 = arith.addf %1614, %1616 : vector<8x128xf32>
    %1618 = vector.broadcast %317 : f32 to vector<8x128xf32>
    %1619 = arith.mulf %1540, %1618 : vector<8x128xf32>
    %1620 = vector.broadcast %322 : f32 to vector<8x128xf32>
    %1621 = arith.mulf %1558, %1620 : vector<8x128xf32>
    %1622 = arith.addf %1619, %1621 : vector<8x128xf32>
    %1623 = vector.broadcast %327 : f32 to vector<8x128xf32>
    %1624 = arith.mulf %1576, %1623 : vector<8x128xf32>
    %1625 = vector.broadcast %452 : f32 to vector<8x128xf32>
    %1626 = arith.addf %1624, %1625 : vector<8x128xf32>
    %1627 = arith.addf %1617, %1622 : vector<8x128xf32>
    %1628 = arith.addf %1627, %1626 : vector<8x128xf32>
    %cst_149 = arith.constant 0.000000e+00 : f32
    %1629 = vector.broadcast %cst_149 : f32 to vector<8x128xf32>
    %1630 = arith.maximumf %1628, %1629 : vector<8x128xf32>
    %1631 = vector.broadcast %308 : f32 to vector<8x128xf32>
    %1632 = arith.mulf %1504, %1631 : vector<8x128xf32>
    %1633 = vector.broadcast %313 : f32 to vector<8x128xf32>
    %1634 = arith.mulf %1522, %1633 : vector<8x128xf32>
    %1635 = arith.addf %1632, %1634 : vector<8x128xf32>
    %1636 = vector.broadcast %318 : f32 to vector<8x128xf32>
    %1637 = arith.mulf %1540, %1636 : vector<8x128xf32>
    %1638 = vector.broadcast %323 : f32 to vector<8x128xf32>
    %1639 = arith.mulf %1558, %1638 : vector<8x128xf32>
    %1640 = arith.addf %1637, %1639 : vector<8x128xf32>
    %1641 = vector.broadcast %328 : f32 to vector<8x128xf32>
    %1642 = arith.mulf %1576, %1641 : vector<8x128xf32>
    %1643 = vector.broadcast %453 : f32 to vector<8x128xf32>
    %1644 = arith.addf %1642, %1643 : vector<8x128xf32>
    %1645 = arith.addf %1635, %1640 : vector<8x128xf32>
    %1646 = arith.addf %1645, %1644 : vector<8x128xf32>
    %cst_150 = arith.constant 0.000000e+00 : f32
    %1647 = vector.broadcast %cst_150 : f32 to vector<8x128xf32>
    %1648 = arith.maximumf %1646, %1647 : vector<8x128xf32>
    %1649 = vector.broadcast %309 : f32 to vector<8x128xf32>
    %1650 = arith.mulf %1504, %1649 : vector<8x128xf32>
    %1651 = vector.broadcast %314 : f32 to vector<8x128xf32>
    %1652 = arith.mulf %1522, %1651 : vector<8x128xf32>
    %1653 = arith.addf %1650, %1652 : vector<8x128xf32>
    %1654 = vector.broadcast %319 : f32 to vector<8x128xf32>
    %1655 = arith.mulf %1540, %1654 : vector<8x128xf32>
    %1656 = vector.broadcast %324 : f32 to vector<8x128xf32>
    %1657 = arith.mulf %1558, %1656 : vector<8x128xf32>
    %1658 = arith.addf %1655, %1657 : vector<8x128xf32>
    %1659 = vector.broadcast %329 : f32 to vector<8x128xf32>
    %1660 = arith.mulf %1576, %1659 : vector<8x128xf32>
    %1661 = vector.broadcast %454 : f32 to vector<8x128xf32>
    %1662 = arith.addf %1660, %1661 : vector<8x128xf32>
    %1663 = arith.addf %1653, %1658 : vector<8x128xf32>
    %1664 = arith.addf %1663, %1662 : vector<8x128xf32>
    %cst_151 = arith.constant 0.000000e+00 : f32
    %1665 = vector.broadcast %cst_151 : f32 to vector<8x128xf32>
    %1666 = arith.maximumf %1664, %1665 : vector<8x128xf32>
    %1667 = vector.broadcast %330 : f32 to vector<8x128xf32>
    %1668 = arith.mulf %1594, %1667 : vector<8x128xf32>
    %1669 = vector.broadcast %335 : f32 to vector<8x128xf32>
    %1670 = arith.mulf %1612, %1669 : vector<8x128xf32>
    %1671 = arith.addf %1668, %1670 : vector<8x128xf32>
    %1672 = vector.broadcast %340 : f32 to vector<8x128xf32>
    %1673 = arith.mulf %1630, %1672 : vector<8x128xf32>
    %1674 = vector.broadcast %345 : f32 to vector<8x128xf32>
    %1675 = arith.mulf %1648, %1674 : vector<8x128xf32>
    %1676 = arith.addf %1673, %1675 : vector<8x128xf32>
    %1677 = vector.broadcast %350 : f32 to vector<8x128xf32>
    %1678 = arith.mulf %1666, %1677 : vector<8x128xf32>
    %1679 = vector.broadcast %455 : f32 to vector<8x128xf32>
    %1680 = arith.addf %1678, %1679 : vector<8x128xf32>
    %1681 = arith.addf %1671, %1676 : vector<8x128xf32>
    %1682 = arith.addf %1681, %1680 : vector<8x128xf32>
    %cst_152 = arith.constant 0.000000e+00 : f32
    %1683 = vector.broadcast %cst_152 : f32 to vector<8x128xf32>
    %1684 = arith.maximumf %1682, %1683 : vector<8x128xf32>
    %1685 = vector.broadcast %331 : f32 to vector<8x128xf32>
    %1686 = arith.mulf %1594, %1685 : vector<8x128xf32>
    %1687 = vector.broadcast %336 : f32 to vector<8x128xf32>
    %1688 = arith.mulf %1612, %1687 : vector<8x128xf32>
    %1689 = arith.addf %1686, %1688 : vector<8x128xf32>
    %1690 = vector.broadcast %341 : f32 to vector<8x128xf32>
    %1691 = arith.mulf %1630, %1690 : vector<8x128xf32>
    %1692 = vector.broadcast %346 : f32 to vector<8x128xf32>
    %1693 = arith.mulf %1648, %1692 : vector<8x128xf32>
    %1694 = arith.addf %1691, %1693 : vector<8x128xf32>
    %1695 = vector.broadcast %351 : f32 to vector<8x128xf32>
    %1696 = arith.mulf %1666, %1695 : vector<8x128xf32>
    %1697 = vector.broadcast %456 : f32 to vector<8x128xf32>
    %1698 = arith.addf %1696, %1697 : vector<8x128xf32>
    %1699 = arith.addf %1689, %1694 : vector<8x128xf32>
    %1700 = arith.addf %1699, %1698 : vector<8x128xf32>
    %cst_153 = arith.constant 0.000000e+00 : f32
    %1701 = vector.broadcast %cst_153 : f32 to vector<8x128xf32>
    %1702 = arith.maximumf %1700, %1701 : vector<8x128xf32>
    %1703 = vector.broadcast %332 : f32 to vector<8x128xf32>
    %1704 = arith.mulf %1594, %1703 : vector<8x128xf32>
    %1705 = vector.broadcast %337 : f32 to vector<8x128xf32>
    %1706 = arith.mulf %1612, %1705 : vector<8x128xf32>
    %1707 = arith.addf %1704, %1706 : vector<8x128xf32>
    %1708 = vector.broadcast %342 : f32 to vector<8x128xf32>
    %1709 = arith.mulf %1630, %1708 : vector<8x128xf32>
    %1710 = vector.broadcast %347 : f32 to vector<8x128xf32>
    %1711 = arith.mulf %1648, %1710 : vector<8x128xf32>
    %1712 = arith.addf %1709, %1711 : vector<8x128xf32>
    %1713 = vector.broadcast %352 : f32 to vector<8x128xf32>
    %1714 = arith.mulf %1666, %1713 : vector<8x128xf32>
    %1715 = vector.broadcast %457 : f32 to vector<8x128xf32>
    %1716 = arith.addf %1714, %1715 : vector<8x128xf32>
    %1717 = arith.addf %1707, %1712 : vector<8x128xf32>
    %1718 = arith.addf %1717, %1716 : vector<8x128xf32>
    %cst_154 = arith.constant 0.000000e+00 : f32
    %1719 = vector.broadcast %cst_154 : f32 to vector<8x128xf32>
    %1720 = arith.maximumf %1718, %1719 : vector<8x128xf32>
    %1721 = vector.broadcast %333 : f32 to vector<8x128xf32>
    %1722 = arith.mulf %1594, %1721 : vector<8x128xf32>
    %1723 = vector.broadcast %338 : f32 to vector<8x128xf32>
    %1724 = arith.mulf %1612, %1723 : vector<8x128xf32>
    %1725 = arith.addf %1722, %1724 : vector<8x128xf32>
    %1726 = vector.broadcast %343 : f32 to vector<8x128xf32>
    %1727 = arith.mulf %1630, %1726 : vector<8x128xf32>
    %1728 = vector.broadcast %348 : f32 to vector<8x128xf32>
    %1729 = arith.mulf %1648, %1728 : vector<8x128xf32>
    %1730 = arith.addf %1727, %1729 : vector<8x128xf32>
    %1731 = vector.broadcast %353 : f32 to vector<8x128xf32>
    %1732 = arith.mulf %1666, %1731 : vector<8x128xf32>
    %1733 = vector.broadcast %458 : f32 to vector<8x128xf32>
    %1734 = arith.addf %1732, %1733 : vector<8x128xf32>
    %1735 = arith.addf %1725, %1730 : vector<8x128xf32>
    %1736 = arith.addf %1735, %1734 : vector<8x128xf32>
    %cst_155 = arith.constant 0.000000e+00 : f32
    %1737 = vector.broadcast %cst_155 : f32 to vector<8x128xf32>
    %1738 = arith.maximumf %1736, %1737 : vector<8x128xf32>
    %1739 = vector.broadcast %334 : f32 to vector<8x128xf32>
    %1740 = arith.mulf %1594, %1739 : vector<8x128xf32>
    %1741 = vector.broadcast %339 : f32 to vector<8x128xf32>
    %1742 = arith.mulf %1612, %1741 : vector<8x128xf32>
    %1743 = arith.addf %1740, %1742 : vector<8x128xf32>
    %1744 = vector.broadcast %344 : f32 to vector<8x128xf32>
    %1745 = arith.mulf %1630, %1744 : vector<8x128xf32>
    %1746 = vector.broadcast %349 : f32 to vector<8x128xf32>
    %1747 = arith.mulf %1648, %1746 : vector<8x128xf32>
    %1748 = arith.addf %1745, %1747 : vector<8x128xf32>
    %1749 = vector.broadcast %354 : f32 to vector<8x128xf32>
    %1750 = arith.mulf %1666, %1749 : vector<8x128xf32>
    %1751 = vector.broadcast %459 : f32 to vector<8x128xf32>
    %1752 = arith.addf %1750, %1751 : vector<8x128xf32>
    %1753 = arith.addf %1743, %1748 : vector<8x128xf32>
    %1754 = arith.addf %1753, %1752 : vector<8x128xf32>
    %cst_156 = arith.constant 0.000000e+00 : f32
    %1755 = vector.broadcast %cst_156 : f32 to vector<8x128xf32>
    %1756 = arith.maximumf %1754, %1755 : vector<8x128xf32>
    %1757 = vector.broadcast %355 : f32 to vector<8x128xf32>
    %1758 = arith.mulf %1684, %1757 : vector<8x128xf32>
    %1759 = vector.broadcast %360 : f32 to vector<8x128xf32>
    %1760 = arith.mulf %1702, %1759 : vector<8x128xf32>
    %1761 = arith.addf %1758, %1760 : vector<8x128xf32>
    %1762 = vector.broadcast %365 : f32 to vector<8x128xf32>
    %1763 = arith.mulf %1720, %1762 : vector<8x128xf32>
    %1764 = vector.broadcast %370 : f32 to vector<8x128xf32>
    %1765 = arith.mulf %1738, %1764 : vector<8x128xf32>
    %1766 = arith.addf %1763, %1765 : vector<8x128xf32>
    %1767 = vector.broadcast %375 : f32 to vector<8x128xf32>
    %1768 = arith.mulf %1756, %1767 : vector<8x128xf32>
    %1769 = vector.broadcast %460 : f32 to vector<8x128xf32>
    %1770 = arith.addf %1768, %1769 : vector<8x128xf32>
    %1771 = arith.addf %1761, %1766 : vector<8x128xf32>
    %1772 = arith.addf %1771, %1770 : vector<8x128xf32>
    %cst_157 = arith.constant 0.000000e+00 : f32
    %1773 = vector.broadcast %cst_157 : f32 to vector<8x128xf32>
    %1774 = arith.maximumf %1772, %1773 : vector<8x128xf32>
    %1775 = vector.broadcast %356 : f32 to vector<8x128xf32>
    %1776 = arith.mulf %1684, %1775 : vector<8x128xf32>
    %1777 = vector.broadcast %361 : f32 to vector<8x128xf32>
    %1778 = arith.mulf %1702, %1777 : vector<8x128xf32>
    %1779 = arith.addf %1776, %1778 : vector<8x128xf32>
    %1780 = vector.broadcast %366 : f32 to vector<8x128xf32>
    %1781 = arith.mulf %1720, %1780 : vector<8x128xf32>
    %1782 = vector.broadcast %371 : f32 to vector<8x128xf32>
    %1783 = arith.mulf %1738, %1782 : vector<8x128xf32>
    %1784 = arith.addf %1781, %1783 : vector<8x128xf32>
    %1785 = vector.broadcast %376 : f32 to vector<8x128xf32>
    %1786 = arith.mulf %1756, %1785 : vector<8x128xf32>
    %1787 = vector.broadcast %461 : f32 to vector<8x128xf32>
    %1788 = arith.addf %1786, %1787 : vector<8x128xf32>
    %1789 = arith.addf %1779, %1784 : vector<8x128xf32>
    %1790 = arith.addf %1789, %1788 : vector<8x128xf32>
    %cst_158 = arith.constant 0.000000e+00 : f32
    %1791 = vector.broadcast %cst_158 : f32 to vector<8x128xf32>
    %1792 = arith.maximumf %1790, %1791 : vector<8x128xf32>
    %1793 = vector.broadcast %357 : f32 to vector<8x128xf32>
    %1794 = arith.mulf %1684, %1793 : vector<8x128xf32>
    %1795 = vector.broadcast %362 : f32 to vector<8x128xf32>
    %1796 = arith.mulf %1702, %1795 : vector<8x128xf32>
    %1797 = arith.addf %1794, %1796 : vector<8x128xf32>
    %1798 = vector.broadcast %367 : f32 to vector<8x128xf32>
    %1799 = arith.mulf %1720, %1798 : vector<8x128xf32>
    %1800 = vector.broadcast %372 : f32 to vector<8x128xf32>
    %1801 = arith.mulf %1738, %1800 : vector<8x128xf32>
    %1802 = arith.addf %1799, %1801 : vector<8x128xf32>
    %1803 = vector.broadcast %377 : f32 to vector<8x128xf32>
    %1804 = arith.mulf %1756, %1803 : vector<8x128xf32>
    %1805 = vector.broadcast %462 : f32 to vector<8x128xf32>
    %1806 = arith.addf %1804, %1805 : vector<8x128xf32>
    %1807 = arith.addf %1797, %1802 : vector<8x128xf32>
    %1808 = arith.addf %1807, %1806 : vector<8x128xf32>
    %cst_159 = arith.constant 0.000000e+00 : f32
    %1809 = vector.broadcast %cst_159 : f32 to vector<8x128xf32>
    %1810 = arith.maximumf %1808, %1809 : vector<8x128xf32>
    %1811 = vector.broadcast %358 : f32 to vector<8x128xf32>
    %1812 = arith.mulf %1684, %1811 : vector<8x128xf32>
    %1813 = vector.broadcast %363 : f32 to vector<8x128xf32>
    %1814 = arith.mulf %1702, %1813 : vector<8x128xf32>
    %1815 = arith.addf %1812, %1814 : vector<8x128xf32>
    %1816 = vector.broadcast %368 : f32 to vector<8x128xf32>
    %1817 = arith.mulf %1720, %1816 : vector<8x128xf32>
    %1818 = vector.broadcast %373 : f32 to vector<8x128xf32>
    %1819 = arith.mulf %1738, %1818 : vector<8x128xf32>
    %1820 = arith.addf %1817, %1819 : vector<8x128xf32>
    %1821 = vector.broadcast %378 : f32 to vector<8x128xf32>
    %1822 = arith.mulf %1756, %1821 : vector<8x128xf32>
    %1823 = vector.broadcast %463 : f32 to vector<8x128xf32>
    %1824 = arith.addf %1822, %1823 : vector<8x128xf32>
    %1825 = arith.addf %1815, %1820 : vector<8x128xf32>
    %1826 = arith.addf %1825, %1824 : vector<8x128xf32>
    %cst_160 = arith.constant 0.000000e+00 : f32
    %1827 = vector.broadcast %cst_160 : f32 to vector<8x128xf32>
    %1828 = arith.maximumf %1826, %1827 : vector<8x128xf32>
    %1829 = vector.broadcast %359 : f32 to vector<8x128xf32>
    %1830 = arith.mulf %1684, %1829 : vector<8x128xf32>
    %1831 = vector.broadcast %364 : f32 to vector<8x128xf32>
    %1832 = arith.mulf %1702, %1831 : vector<8x128xf32>
    %1833 = arith.addf %1830, %1832 : vector<8x128xf32>
    %1834 = vector.broadcast %369 : f32 to vector<8x128xf32>
    %1835 = arith.mulf %1720, %1834 : vector<8x128xf32>
    %1836 = vector.broadcast %374 : f32 to vector<8x128xf32>
    %1837 = arith.mulf %1738, %1836 : vector<8x128xf32>
    %1838 = arith.addf %1835, %1837 : vector<8x128xf32>
    %1839 = vector.broadcast %379 : f32 to vector<8x128xf32>
    %1840 = arith.mulf %1756, %1839 : vector<8x128xf32>
    %1841 = vector.broadcast %464 : f32 to vector<8x128xf32>
    %1842 = arith.addf %1840, %1841 : vector<8x128xf32>
    %1843 = arith.addf %1833, %1838 : vector<8x128xf32>
    %1844 = arith.addf %1843, %1842 : vector<8x128xf32>
    %cst_161 = arith.constant 0.000000e+00 : f32
    %1845 = vector.broadcast %cst_161 : f32 to vector<8x128xf32>
    %1846 = arith.maximumf %1844, %1845 : vector<8x128xf32>
    %1847 = vector.broadcast %380 : f32 to vector<8x128xf32>
    %1848 = arith.mulf %1774, %1847 : vector<8x128xf32>
    %1849 = vector.broadcast %381 : f32 to vector<8x128xf32>
    %1850 = arith.mulf %1792, %1849 : vector<8x128xf32>
    %1851 = arith.addf %1848, %1850 : vector<8x128xf32>
    %1852 = vector.broadcast %382 : f32 to vector<8x128xf32>
    %1853 = arith.mulf %1810, %1852 : vector<8x128xf32>
    %1854 = vector.broadcast %383 : f32 to vector<8x128xf32>
    %1855 = arith.mulf %1828, %1854 : vector<8x128xf32>
    %1856 = arith.addf %1853, %1855 : vector<8x128xf32>
    %1857 = vector.broadcast %384 : f32 to vector<8x128xf32>
    %1858 = arith.mulf %1846, %1857 : vector<8x128xf32>
    %1859 = vector.broadcast %465 : f32 to vector<8x128xf32>
    %1860 = arith.addf %1858, %1859 : vector<8x128xf32>
    %1861 = arith.addf %1851, %1856 : vector<8x128xf32>
    %1862 = arith.addf %1861, %1860 : vector<8x128xf32>
    %c0_162 = arith.constant 0 : index
    %c0_163 = arith.constant 0 : index
    %1863 = vector.load %arg4[%c0_162, %c0_163] : memref<8x128xf32, #tpu.memory_space<vmem>>, vector<8x128xf32>
    tpu.vector_store %arg4[%c0_162, %c0_163], %1862 {strides = array<i32>} : memref<8x128xf32, #tpu.memory_space<vmem>>, vector<8x128xf32>,
    return
  }
  func.func @transform_0(%arg0: i32) -> (i32, i32) {
    %c0_i32 = arith.constant 0 : i32
    %c0_i32_0 = arith.constant 0 : i32
    return %arg0, %c0_i32 : i32, i32
  }
  func.func @transform_1(%arg0: i32) -> i32 {
    %c0_i32 = arith.constant 0 : i32
    %c0_i32_0 = arith.constant 0 : i32
    return %c0_i32 : i32
  }
  func.func @transform_2(%arg0: i32) -> i32 {
    %c0_i32 = arith.constant 0 : i32
    %c0_i32_0 = arith.constant 0 : i32
    return %c0_i32 : i32
  }
  func.func @transform_3(%arg0: i32) -> (i32, i32) {
    %c0_i32 = arith.constant 0 : i32
    %c0_i32_0 = arith.constant 0 : i32
    return %arg0, %c0_i32 : i32, i32
  }
}

</mosaic_0001>

<bundles_post_ra>
// kernel: tpu_custom_call.1
= control target key start
LH: loop header
LB: loop body
LE: loop exit
PB: predicated region body
PF: predicated region fallthrough
CT: control target
= control target key end

     0   :  { %s4441_s0 = inlined_call_operand.hbm [shape: f32[8,128], index: 0, kind: input, shape index: {}]   ;;  %s4442_s1 = inlined_call_operand.hbm [shape: f32[385], index: 1, kind: input, shape index: {}]   ;;  %s4443_s2 = inlined_call_operand.vmem [shape: f32[81], index: 2, kind: input, shape index: {}]   ;;  %s4444_s3 = inlined_call_operand.hbm [shape: f32[8,128], index: 3, kind: output, shape index: {}]  }
   0x1   :  { %4488 = sst [smem:[#allocation155_spill]] %s4444_s3 }
   0x2   :  { %8 = vsyncpa [#allocation3], 0 }
   0x3   :  { %9 = vsyncpa [#allocation5], 0 }
   0x4   :  { %10 = vsyncpa [#allocation6], 0 }
   0x5   :  { %11 = vsyncpa [#allocation4], 0  ;;  %s17_s14 = sshll.u32 %s4441_s0, 4  ;;  %s2405_s15 = smov [#allocation2]   ;;  %s18_s14 = int_to_ptr.hbm [resolvable:$true] %s17_s14 }
   0x6   :  { %s19_s16 = sshll.u32 %s2405_s15, 4  ;;  %s28_s19 = sshll.u32 %s4442_s1, 4  ;;  %s20_s16 = int_to_ptr.vmem [resolvable:$true] %s19_s16  ;;  %s29_s19 = int_to_ptr.hbm [resolvable:$true] %s28_s19 }
   0x7   :  { %22 = dma.hbm_to_vmem [thread:$0]  %s18_s14, 128, %s20_s16, [#allocation3]  }
   0x8   :  { %s2406_s20 = smov [#allocation7]   ;;  %s37_s23 = sshll.u32 %s4443_s2, 4  ;;  %s38_s23 = int_to_ptr.vmem [resolvable:$true] %s37_s23 }
   0x9   :  { %31 = dma.hbm_to_smem %s29_s19, 64, %s2406_s20, [#allocation5]  }
   0xa   :  { %s2407_s24 = smov [#allocation8]  }
   0xb   :  { %40 = dma.vmem_to_smem %s38_s23, 16, %s2407_s24, [#allocation6]  }
   0xc   :  { %2397 = dma.done.wait [#allocation3], 128  }
   0xd   :  { %2398 = vsyncadd [#allocation3], 4294967168 }
   0xe   :  { %2399 = dma.done.wait [#allocation5], 64  }
   0xf   :  { %2400 = vsyncadd [#allocation5], 4294967232 }
  0x10   :  { %2401 = dma.done.wait [#allocation6], 16  }
  0x11   :  { %2402 = vsyncadd [#allocation6], 4294967280 }
  0x12   :  { %53 = sfence }
  0x13   :  { %s2438_s0 = sld [smem:[#allocation7]]  ;;  %v520_v0 = vld [vmem:[#allocation2] sm:$0xff] }
  0x14   :  { %s2440_s1 = sld [smem:[#allocation7 + $0x1]] }
  0x15   :  { %s2442_s25 = sld [smem:[#allocation7 + $0x2]] }
  0x16   :  { %s2444_s26 = sld [smem:[#allocation7 + $0x3]] }
  0x17   :  { %s2446_s27 = sld [smem:[#allocation7 + $0x4]] }
  0x18   :  { %s2448_s2 = sld [smem:[#allocation7 + $0x5]] }
  0x19   :  { %s2450_s28 = sld [smem:[#allocation7 + $0x6]]  ;;  %v521_v1 = vstv %s2438_s0 }
  0x1a   :  { %s2452_s29 = sld [smem:[#allocation7 + $0x7]]  ;;  %v526_v2 = vstv %s2440_s1  ;;  %v2739_v6 = vmul.f32 %v521_v1, %v520_v0 }
  0x1b   :  { %s2454_s30 = sld [smem:[#allocation7 + $0x8]]  ;;  %v531_v3 = vstv %s2442_s25  ;;  %v2741_v7 = vmul.f32 %v526_v2, %v520_v0 }
  0x1c   :  { %s2456_s4 = sld [smem:[#allocation7 + $0x9]]  ;;  %v536_v4 = vstv %s2444_s26  ;;  %v2745_v8 = vmul.f32 %v531_v3, %v520_v0 }
  0x1d   :  { %s2458_s5 = sld [smem:[#allocation7 + $0xa]]  ;;  %v541_v5 = vstv %s2446_s27  ;;  %v2747_v9 = vmul.f32 %v536_v4, %v520_v0 }
  0x1e   :  { %s2460_s6 = sld [smem:[#allocation7 + $0xb]]  ;;  %v2749_v10 = vmul.f32 %v541_v5, %v520_v0  ;;  %v546_v11 = vstv %s2448_s2 }
  0x1f   :  { %s2462_s7 = sld [smem:[#allocation7 + $0xc]]  ;;  %v563_v15 = vstv %s2450_s28 }
  0x20   :  { %4489 = sst [smem:[#allocation14_spill]] %s2452_s29  ;;  %v580_v21 = vstv %s2452_s29 }
  0x21   :  { %4490 = sst [smem:[#allocation15_spill]] %s2454_s30 }
  0x22   :  { %4491 = sst [smem:[#allocation16_spill]] %s2456_s4 }
  0x23   :  { %s2464_s8 = sld [smem:[#allocation7 + $0xd]]  ;;  %v548_v12 = vstv %s2458_s5 }
  0x24   :  { %s2466_s9 = sld [smem:[#allocation7 + $0xe]]  ;;  %v565_v17 = vstv %s2460_s6 }
  0x25   :  { %4492 = sst [smem:[#allocation17_spill]] %s2462_s7  ;;  %v582_v22 = vstv %s2462_s7 }
  0x26   :  { %s2468_s10 = sld [smem:[#allocation7 + $0xf]] }
  0x27   :  { %s2470_s11 = sld [smem:[#allocation7 + $0x10]] }
  0x28   :  { %s2472_s12 = sld [smem:[#allocation7 + $0x11]] }
  0x29   :  { %4493 = sst [smem:[#allocation18_spill]] %s2464_s8 }
  0x2a   :  { %4494 = sst [smem:[#allocation19_spill]] %s2466_s9 }
  0x2b   :  { %s2474_s13 = sld [smem:[#allocation7 + $0x12]] }
  0x2c   :  { %s2476_s14 = sld [smem:[#allocation7 + $0x13]]  ;;  %v551_v13 = vstv %s2468_s10 }
  0x2d   :  { %s2478_s15 = sld [smem:[#allocation7 + $0x14]]  ;;  %v568_v18 = vstv %s2470_s11 }
  0x2e   :  { %4495 = sst [smem:[#allocation20_spill]] %s2472_s12  ;;  %v585_v23 = vstv %s2472_s12 }
  0x2f   :  { %s2480_s16 = sld [smem:[#allocation7 + $0x15]] }
  0x30   :  { %s2482_s17 = sld [smem:[#allocation7 + $0x16]] }
  0x31   :  { %4496 = sst [smem:[#allocation21_spill]] %s2474_s13 }
  0x32   :  { %4497 = sst [smem:[#allocation22_spill]] %s2476_s14 }
  0x33   :  { %s2484_s18 = sld [smem:[#allocation7 + $0x17]]  ;;  %v553_v14 = vstv %s2478_s15 }
  0x34   :  { %s2486_s19 = sld [smem:[#allocation7 + $0x18]] }
  0x35   :  { %4498 = sst [smem:[#allocation23_spill]] %s2480_s16  ;;  %v570_v19 = vstv %s2480_s16 }
  0x36   :  { %4499 = sst [smem:[#allocation24_spill]] %s2482_s17  ;;  %v587_v24 = vstv %s2482_s17 }
  0x37   :  { %s2488_s20 = sld [smem:[#allocation7 + $0x19]] }
  0x38   :  { %s2490_s21 = sld [smem:[#allocation7 + $0x1a]] }
  0x39   :  { %4500 = sst [smem:[#allocation25_spill]] %s2484_s18 }
  0x3a   :  { %4501 = sst [smem:[#allocation26_spill]] %s2486_s19 }
  0x3b   :  { %s2492_s22 = sld [smem:[#allocation7 + $0x1b]] }
  0x3c   :  { %s2494_s23 = sld [smem:[#allocation7 + $0x1c]] }
  0x3d   :  { %4502 = sst [smem:[#allocation27_spill]] %s2488_s20  ;;  %v556_v16 = vstv %s2488_s20 }
  0x3e   :  { %4503 = sst [smem:[#allocation28_spill]] %s2490_s21  ;;  %v573_v20 = vstv %s2490_s21 }
  0x3f   :  { %s2496_s24 = sld [smem:[#allocation7 + $0x1d]] }
  0x40   :  { %s2498_s3 = sld [smem:[#allocation7 + $0x1e]] }
  0x41   :  { %4504 = sst [smem:[#allocation29_spill]] %s2492_s22  ;;  %v590_v25 = vstv %s2492_s22 }
  0x42   :  { %4505 = sst [smem:[#allocation30_spill]] %s2494_s23 }
  0x43   :  { %s2500_s14 = sld [smem:[#allocation7 + $0x1f]] }
  0x44   :  { %s2502_s9 = sld [smem:[#allocation7 + $0x20]] }
  0x45   :  { %4506 = sst [smem:[#allocation31_spill]] %s2496_s24 }
  0x46   :  { %4507 = sst [smem:[#allocation32_spill]] %s2498_s3 }
  0x47   :  { %s2504_s4 = sld [smem:[#allocation7 + $0x21]] }
  0x48   :  { %s2506_s18 = sld [smem:[#allocation7 + $0x22]] }
  0x49   :  { %4508 = sst [smem:[#allocation33_spill]] %s2500_s14 }
  0x4a   :  { %4509 = sst [smem:[#allocation34_spill]] %s2502_s9 }
  0x4b   :  { %s2508_s19 = sld [smem:[#allocation7 + $0x23]] }
  0x4c   :  { %s2510_s13 = sld [smem:[#allocation7 + $0x24]] }
  0x4d   :  { %4510 = sst [smem:[#allocation35_spill]] %s2504_s4 }
  0x4e   :  { %4511 = sst [smem:[#allocation36_spill]] %s2506_s18 }
  0x4f   :  { %s2512_s8 = sld [smem:[#allocation7 + $0x25]] }
  0x50   :  { %s2514_s30 = sld [smem:[#allocation7 + $0x26]] }
  0x51   :  { %4512 = sst [smem:[#allocation37_spill]] %s2508_s19 }
  0x52   :  { %4513 = sst [smem:[#allocation38_spill]] %s2510_s13 }
  0x53   :  { %s2516_s23 = sld [smem:[#allocation7 + $0x27]] }
  0x54   :  { %s2518_s24 = sld [smem:[#allocation7 + $0x28]] }
  0x55   :  { %4514 = sst [smem:[#allocation39_spill]] %s2512_s8 }
  0x56   :  { %4515 = sst [smem:[#allocation40_spill]] %s2514_s30 }
  0x57   :  { %s2520_s3 = sld [smem:[#allocation7 + $0x29]] }
  0x58   :  { %s2522_s14 = sld [smem:[#allocation7 + $0x2a]] }
  0x59   :  { %4516 = sst [smem:[#allocation41_spill]] %s2516_s23 }
  0x5a   :  { %4517 = sst [smem:[#allocation42_spill]] %s2518_s24 }
  0x5b   :  { %s2524_s9 = sld [smem:[#allocation7 + $0x2b]] }
  0x5c   :  { %s2526_s4 = sld [smem:[#allocation7 + $0x2c]] }
  0x5d   :  { %4518 = sst [smem:[#allocation43_spill]] %s2520_s3 }
  0x5e   :  { %4519 = sst [smem:[#allocation44_spill]] %s2522_s14 }
  0x5f   :  { %s2528_s18 = sld [smem:[#allocation7 + $0x2d]] }
  0x60   :  { %s2530_s19 = sld [smem:[#allocation7 + $0x2e]] }
  0x61   :  { %4520 = sst [smem:[#allocation45_spill]] %s2524_s9 }
  0x62   :  { %4521 = sst [smem:[#allocation46_spill]] %s2526_s4 }
  0x63   :  { %s2532_s13 = sld [smem:[#allocation7 + $0x2f]] }
  0x64   :  { %s2534_s8 = sld [smem:[#allocation7 + $0x30]] }
  0x65   :  { %4522 = sst [smem:[#allocation47_spill]] %s2528_s18 }
  0x66   :  { %4523 = sst [smem:[#allocation48_spill]] %s2530_s19 }
  0x67   :  { %s2536_s30 = sld [smem:[#allocation7 + $0x31]] }
  0x68   :  { %s2538_s23 = sld [smem:[#allocation7 + $0x32]] }
  0x69   :  { %4524 = sst [smem:[#allocation49_spill]] %s2532_s13 }
  0x6a   :  { %4525 = sst [smem:[#allocation50_spill]] %s2534_s8 }
  0x6b   :  { %s2540_s24 = sld [smem:[#allocation7 + $0x33]] }
  0x6c   :  { %s2542_s3 = sld [smem:[#allocation7 + $0x34]] }
  0x6d   :  { %4526 = sst [smem:[#allocation51_spill]] %s2536_s30 }
  0x6e   :  { %4527 = sst [smem:[#allocation52_spill]] %s2538_s23 }
  0x6f   :  { %s2544_s14 = sld [smem:[#allocation7 + $0x35]] }
  0x70   :  { %s2546_s9 = sld [smem:[#allocation7 + $0x36]] }
  0x71   :  { %4528 = sst [smem:[#allocation53_spill]] %s2540_s24 }
  0x72   :  { %4529 = sst [smem:[#allocation54_spill]] %s2542_s3 }
  0x73   :  { %s2548_s4 = sld [smem:[#allocation7 + $0x37]] }
  0x74   :  { %s2550_s18 = sld [smem:[#allocation7 + $0x38]] }
  0x75   :  { %4530 = sst [smem:[#allocation55_spill]] %s2544_s14 }
  0x76   :  { %4531 = sst [smem:[#allocation56_spill]] %s2546_s9 }
  0x77   :  { %s2552_s19 = sld [smem:[#allocation7 + $0x39]] }
  0x78   :  { %s2554_s13 = sld [smem:[#allocation7 + $0x3a]] }
  0x79   :  { %4532 = sst [smem:[#allocation57_spill]] %s2548_s4 }
  0x7a   :  { %4533 = sst [smem:[#allocation58_spill]] %s2550_s18 }
  0x7b   :  { %s2556_s8 = sld [smem:[#allocation7 + $0x3b]] }
  0x7c   :  { %s2558_s30 = sld [smem:[#allocation7 + $0x3c]] }
  0x7d   :  { %4534 = sst [smem:[#allocation59_spill]] %s2552_s19 }
  0x7e   :  { %4535 = sst [smem:[#allocation60_spill]] %s2554_s13 }
  0x7f   :  { %s2560_s23 = sld [smem:[#allocation7 + $0x3d]] }
  0x80   :  { %s2562_s24 = sld [smem:[#allocation7 + $0x3e]] }
  0x81   :  { %4536 = sst [smem:[#allocation61_spill]] %s2556_s8 }
  0x82   :  { %4537 = sst [smem:[#allocation62_spill]] %s2558_s30 }
  0x83   :  { %s2564_s3 = sld [smem:[#allocation7 + $0x3f]] }
  0x84   :  { %s2566_s14 = sld [smem:[#allocation7 + $0x40]] }
  0x85   :  { %4538 = sst [smem:[#allocation63_spill]] %s2560_s23 }
  0x86   :  { %4539 = sst [smem:[#allocation64_spill]] %s2562_s24 }
  0x87   :  { %s2568_s9 = sld [smem:[#allocation7 + $0x41]] }
  0x88   :  { %s2570_s4 = sld [smem:[#allocation7 + $0x42]] }
  0x89   :  { %4540 = sst [smem:[#allocation65_spill]] %s2564_s3 }
  0x8a   :  { %4541 = sst [smem:[#allocation66_spill]] %s2566_s14 }
  0x8b   :  { %s2572_s18 = sld [smem:[#allocation7 + $0x43]] }
  0x8c   :  { %s2574_s19 = sld [smem:[#allocation7 + $0x44]] }
  0x8d   :  { %4542 = sst [smem:[#allocation67_spill]] %s2568_s9 }
  0x8e   :  { %4543 = sst [smem:[#allocation68_spill]] %s2570_s4 }
  0x8f   :  { %s2576_s13 = sld [smem:[#allocation7 + $0x45]] }
  0x90   :  { %s2578_s8 = sld [smem:[#allocation7 + $0x46]] }
  0x91   :  { %4544 = sst [smem:[#allocation69_spill]] %s2572_s18 }
  0x92   :  { %4545 = sst [smem:[#allocation70_spill]] %s2574_s19 }
  0x93   :  { %s2580_s30 = sld [smem:[#allocation7 + $0x47]] }
  0x94   :  { %s2582_s23 = sld [smem:[#allocation7 + $0x48]] }
  0x95   :  { %4546 = sst [smem:[#allocation71_spill]] %s2576_s13 }
  0x96   :  { %4547 = sst [smem:[#allocation72_spill]] %s2578_s8 }
  0x97   :  { %s2584_s24 = sld [smem:[#allocation7 + $0x49]] }
  0x98   :  { %s2586_s3 = sld [smem:[#allocation7 + $0x4a]] }
  0x99   :  { %4548 = sst [smem:[#allocation73_spill]] %s2580_s30 }
  0x9a   :  { %4549 = sst [smem:[#allocation74_spill]] %s2582_s23 }
  0x9b   :  { %s2588_s14 = sld [smem:[#allocation7 + $0x4b]] }
  0x9c   :  { %s2590_s9 = sld [smem:[#allocation7 + $0x4c]] }
  0x9d   :  { %4550 = sst [smem:[#allocation75_spill]] %s2584_s24 }
  0x9e   :  { %4551 = sst [smem:[#allocation76_spill]] %s2586_s3 }
  0x9f   :  { %s2592_s4 = sld [smem:[#allocation7 + $0x4d]] }
  0xa0   :  { %s2594_s18 = sld [smem:[#allocation7 + $0x4e]] }
  0xa1   :  { %4552 = sst [smem:[#allocation77_spill]] %s2588_s14 }
  0xa2   :  { %4553 = sst [smem:[#allocation78_spill]] %s2590_s9 }
  0xa3   :  { %s2596_s19 = sld [smem:[#allocation7 + $0x4f]] }
  0xa4   :  { %s2598_s13 = sld [smem:[#allocation7 + $0x50]] }
  0xa5   :  { %4554 = sst [smem:[#allocation79_spill]] %s2592_s4 }
  0xa6   :  { %4555 = sst [smem:[#allocation80_spill]] %s2594_s18 }
  0xa7   :  { %s2600_s8 = sld [smem:[#allocation7 + $0x51]] }
  0xa8   :  { %s2602_s30 = sld [smem:[#allocation7 + $0x52]] }
  0xa9   :  { %4556 = sst [smem:[#allocation81_spill]] %s2596_s19 }
  0xaa   :  { %4557 = sst [smem:[#allocation82_spill]] %s2598_s13 }
  0xab   :  { %s2604_s23 = sld [smem:[#allocation7 + $0x53]] }
  0xac   :  { %s2606_s24 = sld [smem:[#allocation7 + $0x54]] }
  0xad   :  { %4558 = sst [smem:[#allocation83_spill]] %s2600_s8 }
  0xae   :  { %4559 = sst [smem:[#allocation84_spill]] %s2602_s30 }
  0xaf   :  { %s2608_s3 = sld [smem:[#allocation7 + $0x55]] }
  0xb0   :  { %s2610_s14 = sld [smem:[#allocation7 + $0x56]] }
  0xb1   :  { %4560 = sst [smem:[#allocation85_spill]] %s2604_s23 }
  0xb2   :  { %4561 = sst [smem:[#allocation86_spill]] %s2606_s24 }
  0xb3   :  { %s2612_s9 = sld [smem:[#allocation7 + $0x57]] }
  0xb4   :  { %s2614_s4 = sld [smem:[#allocation7 + $0x58]] }
  0xb5   :  { %4562 = sst [smem:[#allocation87_spill]] %s2608_s3 }
  0xb6   :  { %4563 = sst [smem:[#allocation88_spill]] %s2610_s14 }
  0xb7   :  { %s2616_s18 = sld [smem:[#allocation7 + $0x59]] }
  0xb8   :  { %s2618_s19 = sld [smem:[#allocation7 + $0x5a]] }
  0xb9   :  { %4564 = sst [smem:[#allocation89_spill]] %s2612_s9 }
  0xba   :  { %4565 = sst [smem:[#allocation90_spill]] %s2614_s4 }
  0xbb   :  { %s2620_s13 = sld [smem:[#allocation7 + $0x5b]] }
  0xbc   :  { %s2622_s8 = sld [smem:[#allocation7 + $0x5c]] }
  0xbd   :  { %4566 = sst [smem:[#allocation91_spill]] %s2616_s18 }
  0xbe   :  { %4567 = sst [smem:[#allocation92_spill]] %s2618_s19 }
  0xbf   :  { %s2624_s30 = sld [smem:[#allocation7 + $0x5d]] }
  0xc0   :  { %s2626_s23 = sld [smem:[#allocation7 + $0x5e]] }
  0xc1   :  { %4568 = sst [smem:[#allocation93_spill]] %s2620_s13 }
  0xc2   :  { %4569 = sst [smem:[#allocation94_spill]] %s2622_s8 }
  0xc3   :  { %s2628_s24 = sld [smem:[#allocation7 + $0x5f]] }
  0xc4   :  { %s2630_s3 = sld [smem:[#allocation7 + $0x60]] }
  0xc5   :  { %4570 = sst [smem:[#allocation95_spill]] %s2624_s30 }
  0xc6   :  { %4571 = sst [smem:[#allocation96_spill]] %s2626_s23 }
  0xc7   :  { %s2632_s14 = sld [smem:[#allocation7 + $0x61]] }
  0xc8   :  { %s2634_s9 = sld [smem:[#allocation7 + $0x62]] }
  0xc9   :  { %4572 = sst [smem:[#allocation97_spill]] %s2628_s24 }
  0xca   :  { %4573 = sst [smem:[#allocation98_spill]] %s2630_s3 }
  0xcb   :  { %s2636_s4 = sld [smem:[#allocation7 + $0x63]] }
  0xcc   :  { %s2638_s18 = sld [smem:[#allocation7 + $0x64]] }
  0xcd   :  { %4574 = sst [smem:[#allocation99_spill]] %s2632_s14 }
  0xce   :  { %4575 = sst [smem:[#allocation100_spill]] %s2634_s9 }
  0xcf   :  { %s2640_s19 = sld [smem:[#allocation7 + $0x65]] }
  0xd0   :  { %s2642_s13 = sld [smem:[#allocation7 + $0x66]] }
  0xd1   :  { %4576 = sst [smem:[#allocation101_spill]] %s2636_s4 }
  0xd2   :  { %4577 = sst [smem:[#allocation102_spill]] %s2638_s18 }
  0xd3   :  { %s2644_s8 = sld [smem:[#allocation7 + $0x67]] }
  0xd4   :  { %s2646_s30 = sld [smem:[#allocation7 + $0x68]] }
  0xd5   :  { %4578 = sst [smem:[#allocation103_spill]] %s2640_s19 }
  0xd6   :  { %4579 = sst [smem:[#allocation104_spill]] %s2642_s13 }
  0xd7   :  { %s2648_s23 = sld [smem:[#allocation7 + $0x69]] }
  0xd8   :  { %s2650_s24 = sld [smem:[#allocation7 + $0x6a]] }
  0xd9   :  { %4580 = sst [smem:[#allocation105_spill]] %s2644_s8 }
  0xda   :  { %4581 = sst [smem:[#allocation106_spill]] %s2646_s30 }
  0xdb   :  { %s2652_s3 = sld [smem:[#allocation7 + $0x6b]] }
  0xdc   :  { %s2654_s14 = sld [smem:[#allocation7 + $0x6c]] }
  0xdd   :  { %4582 = sst [smem:[#allocation107_spill]] %s2648_s23 }
  0xde   :  { %4583 = sst [smem:[#allocation108_spill]] %s2650_s24 }
  0xdf   :  { %s2656_s9 = sld [smem:[#allocation7 + $0x6d]] }
  0xe0   :  { %s2658_s4 = sld [smem:[#allocation7 + $0x6e]] }
  0xe1   :  { %4584 = sst [smem:[#allocation109_spill]] %s2652_s3 }
  0xe2   :  { %4585 = sst [smem:[#allocation110_spill]] %s2654_s14 }
  0xe3   :  { %s2660_s18 = sld [smem:[#allocation7 + $0x6f]] }
  0xe4   :  { %s2662_s19 = sld [smem:[#allocation7 + $0x70]] }
  0xe5   :  { %4586 = sst [smem:[#allocation111_spill]] %s2656_s9 }
  0xe6   :  { %4587 = sst [smem:[#allocation112_spill]] %s2658_s4 }
  0xe7   :  { %s2664_s13 = sld [smem:[#allocation7 + $0x71]] }
  0xe8   :  { %s2666_s8 = sld [smem:[#allocation7 + $0x72]] }
  0xe9   :  { %4588 = sst [smem:[#allocation113_spill]] %s2660_s18 }
  0xea   :  { %4589 = sst [smem:[#allocation114_spill]] %s2662_s19 }
  0xeb   :  { %s2668_s30 = sld [smem:[#allocation7 + $0x73]] }
  0xec   :  { %s2670_s23 = sld [smem:[#allocation7 + $0x74]] }
  0xed   :  { %4590 = sst [smem:[#allocation115_spill]] %s2664_s13 }
  0xee   :  { %4591 = sst [smem:[#allocation116_spill]] %s2666_s8 }
  0xef   :  { %s2672_s24 = sld [smem:[#allocation7 + $0x75]] }
  0xf0   :  { %s2674_s3 = sld [smem:[#allocation7 + $0x76]] }
  0xf1   :  { %4592 = sst [smem:[#allocation117_spill]] %s2668_s30 }
  0xf2   :  { %4593 = sst [smem:[#allocation118_spill]] %s2670_s23 }
  0xf3   :  { %s2676_s14 = sld [smem:[#allocation7 + $0x77]] }
  0xf4   :  { %s2678_s9 = sld [smem:[#allocation7 + $0x78]] }
  0xf5   :  { %4594 = sst [smem:[#allocation119_spill]] %s2672_s24 }
  0xf6   :  { %4595 = sst [smem:[#allocation120_spill]] %s2674_s3 }
  0xf7   :  { %s2680_s4 = sld [smem:[#allocation7 + $0x79]] }
  0xf8   :  { %s2682_s18 = sld [smem:[#allocation7 + $0x7a]] }
  0xf9   :  { %4596 = sst [smem:[#allocation121_spill]] %s2676_s14 }
  0xfa   :  { %4597 = sst [smem:[#allocation122_spill]] %s2678_s9 }
  0xfb   :  { %s2684_s19 = sld [smem:[#allocation7 + $0x7b]] }
  0xfc   :  { %s2686_s13 = sld [smem:[#allocation7 + $0x7c]] }
  0xfd   :  { %4598 = sst [smem:[#allocation123_spill]] %s2680_s4 }
  0xfe   :  { %4599 = sst [smem:[#allocation124_spill]] %s2682_s18 }
  0xff   :  { %s2688_s8 = sld [smem:[#allocation7 + $0x7d]] }
 0x100   :  { %s2690_s30 = sld [smem:[#allocation7 + $0x7e]] }
 0x101   :  { %4600 = sst [smem:[#allocation125_spill]] %s2684_s19 }
 0x102   :  { %4601 = sst [smem:[#allocation126_spill]] %s2686_s13 }
 0x103   :  { %s2692_s23 = sld [smem:[#allocation7 + $0x7f]] }
 0x104   :  { %s2694_s24 = sld [smem:[#allocation7 + $0x80]] }
 0x105   :  { %4602 = sst [smem:[#allocation127_spill]] %s2688_s8 }
 0x106   :  { %4603 = sst [smem:[#allocation128_spill]] %s2690_s30 }
 0x107   :  { %s2696_s3 = sld [smem:[#allocation7 + $0x81]] }
 0x108   :  { %s2698_s14 = sld [smem:[#allocation7 + $0x82]] }
 0x109   :  { %4604 = sst [smem:[#allocation129_spill]] %s2692_s23 }
 0x10a   :  { %4605 = sst [smem:[#allocation130_spill]] %s2694_s24 }
 0x10b   :  { %s2700_s4 = sld [smem:[#allocation7 + $0x83]] }
 0x10c   :  { %s2702_s18 = sld [smem:[#allocation7 + $0x84]] }
 0x10d   :  { %4606 = sst [smem:[#allocation131_spill]] %s2696_s3 }
 0x10e   :  { %4607 = sst [smem:[#allocation132_spill]] %s2698_s14 }
 0x10f   :  { %s2704_s19 = sld [smem:[#allocation7 + $0x85]] }
 0x110   :  { %s2706_s13 = sld [smem:[#allocation7 + $0x86]] }
 0x111   :  { %4608 = sst [smem:[#allocation133_spill]] %s2700_s4 }
 0x112   :  { %4609 = sst [smem:[#allocation134_spill]] %s2702_s18 }
 0x113   :  { %s2708_s30 = sld [smem:[#allocation7 + $0x87]] }
 0x114   :  { %s2710_s24 = sld [smem:[#allocation7 + $0x88]] }
 0x115   :  { %4610 = sst [smem:[#allocation135_spill]] %s2704_s19 }
 0x116   :  { %4611 = sst [smem:[#allocation136_spill]] %s2706_s13 }
 0x117   :  { %s2712_s3 = sld [smem:[#allocation7 + $0x89]] }
 0x118   :  { %s2714_s14 = sld [smem:[#allocation7 + $0x8a]] }
 0x119   :  { %4612 = sst [smem:[#allocation137_spill]] %s2708_s30 }
 0x11a   :  { %4613 = sst [smem:[#allocation138_spill]] %s2710_s24 }
 0x11b   :  { %s2716_s23 = sld [smem:[#allocation7 + $0x8b]] }
 0x11c   :  { %s2718_s4 = sld [smem:[#allocation7 + $0x8c]] }
 0x11d   :  { %4614 = sst [smem:[#allocation139_spill]] %s2712_s3 }
 0x11e   :  { %4615 = sst [smem:[#allocation140_spill]] %s2714_s14 }
 0x11f   :  { %s2720_s18 = sld [smem:[#allocation7 + $0x8d]] }
 0x120   :  { %s2722_s19 = sld [smem:[#allocation7 + $0x8e]] }
 0x121   :  { %4616 = sst [smem:[#allocation141_spill]] %s2716_s23 }
 0x122   :  { %4617 = sst [smem:[#allocation142_spill]] %s2718_s4 }
 0x123   :  { %s2724_s8 = sld [smem:[#allocation7 + $0x8f]] }
 0x124   :  { %s2726_s13 = sld [smem:[#allocation7 + $0x90]] }
 0x125   :  { %4618 = sst [smem:[#allocation143_spill]] %s2720_s18 }
 0x126   :  { %4619 = sst [smem:[#allocation144_spill]] %s2722_s19 }
 0x127   :  { %s2730_s3 = sld [smem:[#allocation7 + $0x91]] }
 0x128   :  { %s2735_s23 = sld [smem:[#allocation7 + $0x92]] }
 0x129   :  { %4620 = sst [smem:[#allocation145_spill]] %s2724_s8 }
 0x12a   :  { %4621 = sst [smem:[#allocation146_spill]] %s2726_s13 }
 0x12b   :  { %s2737_s8 = sld [smem:[#allocation7 + $0x93]] }
 0x12c   :  { %s2743_s0 = sld [smem:[#allocation7 + $0x94]] }
 0x12d   :  { %4622 = sst [smem:[#allocation147_spill]] %s2730_s3 }
 0x12e   :  { %4623 = sst [smem:[#allocation148_spill]] %s2735_s23 }
 0x12f   :  { %s2752_s1 = sld [smem:[#allocation7 + $0x95]] }
 0x130   :  { %s4627_s25 = sld [smem:[#allocation15_spill]] }
 0x131   :  { %4624 = sst [smem:[#allocation149_spill]] %s2737_s8 }
 0x132   :  { %4625 = sst [smem:[#allocation150_spill]] %s2743_s0 }
 0x133   :  { %s4628_s26 = sld [smem:[#allocation18_spill]] }
 0x134   :  { %s2758_s27 = sld [smem:[#allocation7 + $0x96]] }
 0x135   :  { %4626 = sst [smem:[#allocation151_spill]] %s2752_s1 }
 0x136   :  { %s4630_s13 = sld [smem:[#allocation21_spill]]  ;;  %v597_v26 = vstv %s4627_s25 }
 0x137   :  { %s4631_s0 = sld [smem:[#allocation25_spill]] }
 0x138   :  { %s4632_s14 = sld [smem:[#allocation30_spill]] }
 0x139   :  { %s4633_s8 = sld [smem:[#allocation16_spill]]  ;;  %v599_v27 = vstv %s4628_s26 }
 0x13a   :  { %4629 = sst [smem:[#allocation152_spill]] %s2758_s27 }
 0x13b   :  { %s2764_s19 = sld [smem:[#allocation7 + $0x97]] }
 0x13c   :  { %s4635_s1 = sld [smem:[#allocation19_spill]]  ;;  %v602_v28 = vstv %s4630_s13 }
 0x13d   :  { %s4636_s23 = sld [smem:[#allocation22_spill]]  ;;  %v604_v29 = vstv %s4631_s0 }
 0x13e   :  { %s4637_s18 = sld [smem:[#allocation26_spill]]  ;;  %v607_v30 = vstv %s4632_s14 }
 0x13f   :  { %s4638_s24 = sld [smem:[#allocation31_spill]]  ;;  %v614_v31 = vstv %s4633_s8 }
 0x140   :  { %s2770_s3 = sld [smem:[#allocation7 + $0x98]] }
 0x141   :  { %4634 = sst [smem:[#allocation153_spill]] %s2764_s19 }
 0x142   :  { %s4640_s27 = sld [smem:[#allocation32_spill]]  ;;  %v616_v32 = vstv %s4635_s1 }
 0x143   :  { %s4641_s4 = sld [smem:[#allocation37_spill]]  ;;  %v619_v33 = vstv %s4636_s23 }
 0x144   :  { %s4642_s30 = sld [smem:[#allocation42_spill]]  ;;  %v621_v34 = vstv %s4637_s18 }
 0x145   :  { %s4643_s9 = sld [smem:[#allocation47_spill]]  ;;  %v624_v35 = vstv %s4638_s24 }
 0x146   :  { %4639 = sst [smem:[#allocation154_spill]] %s2770_s3 }
 0x147   :  { %s2776_s20 = sld [smem:[#allocation8]] }
 0x148   :  { %s4644_s19 = sld [smem:[#allocation33_spill]]  ;;  %v631_v36 = vstv %s4640_s27 }
 0x149   :  { %s4645_s21 = sld [smem:[#allocation38_spill]]  ;;  %v633_v37 = vstv %s4641_s4 }
 0x14a   :  { %s4646_s29 = sld [smem:[#allocation43_spill]]  ;;  %v636_v38 = vstv %s4642_s30 }
 0x14b   :  { %s4647_s7 = sld [smem:[#allocation48_spill]]  ;;  %v638_v39 = vstv %s4643_s9 }
 0x14c   :  { %s2782_s12 = sld [smem:[#allocation8 + $0x1]] }
 0x14d   :  { %s4648_s3 = sld [smem:[#allocation52_spill]]  ;;  %v523_v52 = vstv %s2776_s20 }
 0x14e   :  { %s4649_s17 = sld [smem:[#allocation53_spill]]  ;;  %v648_v40 = vstv %s4644_s19  ;;  %v524_v56 = vadd.f32 %v523_v52, %v2739_v6 }
 0x14f   :  { %s4650_s22 = sld [smem:[#allocation34_spill]]  ;;  %v650_v41 = vstv %s4645_s21 }
 0x150   :  { %s4651_s25 = sld [smem:[#allocation39_spill]]  ;;  %v653_v42 = vstv %s4646_s29  ;;  %v2832_v0 = vmax.f32 %v524_v56, 0.0 }
 0x151   :  { %s2788_s26 = sld [smem:[#allocation8 + $0x2]]  ;;  %v655_v43 = vstv %s4647_s7 }
 0x152   :  { %s4652_s16 = sld [smem:[#allocation44_spill]]  ;;  %v528_v57 = vstv %s2782_s12  ;;  %v547_v56 = vmul.f32 %v546_v11, %v2832_v0 }
 0x153   :  { %s4653_s13 = sld [smem:[#allocation49_spill]]  ;;  %v641_v44 = vstv %s4648_s3  ;;  %v529_v60 = vadd.f32 %v528_v57, %v2741_v7 }
 0x154   :  { %s4654_s0 = sld [smem:[#allocation54_spill]]  ;;  %v658_v45 = vstv %s4649_s17 }
 0x155   :  { %s4655_s14 = sld [smem:[#allocation35_spill]]  ;;  %v665_v46 = vstv %s4650_s22  ;;  %v2839_v4 = vmax.f32 %v529_v60, 0.0 }
 0x156   :  { %s2794_s8 = sld [smem:[#allocation8 + $0x3]]  ;;  %v667_v47 = vstv %s4651_s25 }
 0x157   :  { %s4656_s1 = sld [smem:[#allocation40_spill]]  ;;  %v533_v61 = vstv %s2788_s26 }
 0x158   :  { %s4657_s23 = sld [smem:[#allocation45_spill]]  ;;  %v670_v48 = vstv %s4652_s16  ;;  %v534_v1 = vadd.f32 %v533_v61, %v2745_v8  ;;  %v564_v61 = vmul.f32 %v563_v15, %v2832_v0 }
 0x159   :  { %s4658_s18 = sld [smem:[#allocation50_spill]]  ;;  %v672_v49 = vstv %s4653_s13 }
 0x15a   :  { %s2800_s24 = sld [smem:[#allocation8 + $0x4]]  ;;  %v675_v50 = vstv %s4654_s0  ;;  %v535_v52 = vmax.f32 %v534_v1, 0.0 }
 0x15b   :  { %s4659_s4 = sld [smem:[#allocation55_spill]]  ;;  %v682_v51 = vstv %s4655_s14 }
 0x15c   :  { %s4660_s30 = sld [smem:[#allocation36_spill]]  ;;  %v538_v2 = vstv %s2794_s8  ;;  %v552_v1 = vmul.f32 %v551_v13, %v535_v52 }
 0x15d   :  { %s2806_s9 = sld [smem:[#allocation8 + $0x5]]  ;;  %v684_v53 = vstv %s4656_s1  ;;  %v539_v5 = vadd.f32 %v538_v2, %v2747_v9  ;;  %v549_v9 = vmul.f32 %v548_v12, %v2839_v4  ;;  %v569_v2 = vmul.f32 %v568_v18, %v535_v52 }
 0x15e   :  { %s4661_s19 = sld [smem:[#allocation41_spill]]  ;;  %v687_v54 = vstv %s4657_s23  ;;  %v581_v18 = vmul.f32 %v580_v21, %v2832_v0 }
 0x15f   :  { %s4662_s21 = sld [smem:[#allocation46_spill]]  ;;  %v689_v55 = vstv %s4658_s18  ;;  %v540_v60 = vmax.f32 %v539_v5, 0.0  ;;  %v550_v12 = vadd.f32 %v549_v9, %v547_v56 }
 0x160   :  { %s2812_s29 = sld [smem:[#allocation8 + $0x6]]  ;;  %v543_v6 = vstv %s2800_s24 }
 0x161   :  { %s4663_s17 = sld [smem:[#allocation51_spill]]  ;;  %v692_v58 = vstv %s4659_s4  ;;  %v544_v8 = vadd.f32 %v543_v6, %v2749_v10  ;;  %v566_v10 = vmul.f32 %v565_v17, %v2839_v4  ;;  %v554_v6 = vmul.f32 %v553_v14, %v540_v60 }
 0x162   :  { %s2818_s3 = sld [smem:[#allocation7 + $0x99]]  ;;  %v699_v59 = vstv %s4660_s30  ;;  %v571_v7 = vmul.f32 %v570_v19, %v540_v60  ;;  %v586_v19 = vmul.f32 %v585_v23, %v535_v52 }
 0x163   :  { %s4665_s13 = sld [smem:[#allocation56_spill]]  ;;  %v558_v57 = vstv %s2806_s9  ;;  %v545_v11 = vmax.f32 %v544_v8, 0.0  ;;  %v567_v15 = vadd.f32 %v566_v10, %v564_v61  ;;  %v583_v8 = vmul.f32 %v582_v22, %v2839_v4 }
 0x164   :  { %s2824_s0 = sld [smem:[#allocation7 + $0x9a]]  ;;  %v701_v62 = vstv %s4661_s19  ;;  %v555_v14 = vadd.f32 %v554_v6, %v552_v1  ;;  %v572_v56 = vadd.f32 %v571_v7, %v569_v2  ;;  %v600_v1 = vmul.f32 %v599_v27, %v2839_v4 }
 0x165   :  { %v704_v63 = vstv %s4662_s21  ;;  %s2830_s20 = sld [smem:[#allocation7 + $0x9b]]  ;;  %v557_v17 = vmul.f32 %v556_v16, %v545_v11  ;;  %v574_v13 = vmul.f32 %v573_v20, %v545_v11  ;;  %v588_v16 = vmul.f32 %v587_v24, %v540_v60 }
 0x166   :  { %s2837_s12 = sld [smem:[#allocation8 + $0x7]]  ;;  %v575_v5 = vstv %s2812_s29  ;;  %v584_v21 = vadd.f32 %v583_v8, %v581_v18  ;;  %v591_v61 = vmul.f32 %v590_v25, %v545_v11  ;;  %v560_v22 = vadd.f32 %v555_v14, %v550_v12 }
 0x167   :  { %v706_v3 = vstv %s4663_s17  ;;  %s2844_s26 = sld [smem:[#allocation7 + $0x9c]]  ;;  %v559_v20 = vadd.f32 %v558_v57, %v557_v17  ;;  %v576_v9 = vadd.f32 %v575_v5, %v574_v13  ;;  %v577_v10 = vadd.f32 %v572_v56, %v567_v15 }
 0x168   :  { %4664 = sst [smem:[#allocation32_spill]] %s2818_s3  ;;  %v589_v7 = vadd.f32 %v588_v16, %v586_v19  ;;  %v598_v57 = vmul.f32 %v597_v26, %v2832_v0  ;;  %v603_v25 = vmul.f32 %v602_v28, %v535_v52  ;;  %v605_v6 = vmul.f32 %v604_v29, %v540_v60 }
 0x169   :  { %s2862_s2 = sld [smem:[#allocation8 + $0x8]]  ;;  %v561_v2 = vadd.f32 %v560_v22, %v559_v20  ;;  %v578_v5 = vadd.f32 %v577_v10, %v576_v9  ;;  %v608_v26 = vmul.f32 %v607_v30, %v545_v11  ;;  %v615_v27 = vmul.f32 %v614_v31, %v2832_v0 }
 0x16a   :  { %4666 = sst [smem:[#allocation48_spill]] %s2824_s0  ;;  %v594_v12 = vadd.f32 %v589_v7, %v584_v21  ;;  %v601_v15 = vadd.f32 %v600_v1, %v598_v57  ;;  %v606_v29 = vadd.f32 %v605_v6, %v603_v25  ;;  %v617_v30 = vmul.f32 %v616_v32, %v2839_v4 }
 0x16b   :  { %4667 = sst [smem:[#allocation34_spill]] %s2830_s20  ;;  %v2924_v28 = vmax.f32 %v561_v2, 0.0  ;;  %v2926_v13 = vmax.f32 %v578_v5, 0.0  ;;  %v620_v14 = vmul.f32 %v619_v33, %v535_v52  ;;  %v622_v31 = vmul.f32 %v621_v34, %v540_v60 }
 0x16c   :  { %s2851_s20 = sld [smem:[#allocation7 + $0x9d]]  ;;  %v592_v23 = vstv %s2837_s12  ;;  %v611_v56 = vadd.f32 %v606_v29, %v601_v15  ;;  %v625_v19 = vmul.f32 %v624_v35, %v545_v11  ;;  %v618_v20 = vadd.f32 %v617_v30, %v615_v27 }
 0x16d   :  { %4668 = sst [smem:[#allocation39_spill]] %s2844_s26  ;;  %v593_v24 = vadd.f32 %v592_v23, %v591_v61  ;;  %v623_v32 = vadd.f32 %v622_v31, %v620_v14  ;;  %v632_v33 = vmul.f32 %v631_v36, %v2924_v28  ;;  %v634_v34 = vmul.f32 %v633_v37, %v2926_v13 }
 0x16e   :  { %s2869_s5 = sld [smem:[#allocation7 + $0x9e]]  ;;  %v649_v37 = vmul.f32 %v648_v40, %v2924_v28  ;;  %v651_v9 = vmul.f32 %v650_v41, %v2926_v13  ;;  %v666_v22 = vmul.f32 %v665_v46, %v2924_v28  ;;  %v668_v7 = vmul.f32 %v667_v47, %v2926_v13 }
 0x16f   :  { %s2875_s6 = sld [smem:[#allocation7 + $0x9f]]  ;;  %v609_v17 = vstv %s2862_s2  ;;  %v595_v18 = vadd.f32 %v594_v12, %v593_v24  ;;  %v628_v11 = vadd.f32 %v623_v32, %v618_v20  ;;  %v635_v36 = vadd.f32 %v634_v34, %v632_v33 }
 0x170   :  { %s2887_s29 = sld [smem:[#allocation8 + $0x9]]  ;;  %v610_v8 = vadd.f32 %v609_v17, %v608_v26  ;;  %v652_v40 = vadd.f32 %v651_v9, %v649_v37  ;;  %v669_v47 = vadd.f32 %v668_v7, %v666_v22  ;;  %v683_v1 = vmul.f32 %v682_v51, %v2924_v28 }
 0x171   :  { %s2893_s0 = sld [smem:[#allocation7 + $0xa0]]  ;;  %v2939_v0 = vmax.f32 %v595_v18, 0.0  ;;  %v700_v18 = vmul.f32 %v699_v59, %v2924_v28 }
 0x172   :  { %4670 = sst [smem:[#allocation44_spill]] %s2851_s20  ;;  %v612_v4 = vadd.f32 %v611_v56, %v610_v8 }
 0x173   :  { %s2897_s26 = sld [smem:[#allocation8 + $0xa]]  ;;  %v637_v35 = vmul.f32 %v636_v38, %v2939_v0  ;;  %v654_v38 = vmul.f32 %v653_v42, %v2939_v0  ;;  %v671_v41 = vmul.f32 %v670_v48, %v2939_v0  ;;  %v685_v48 = vmul.f32 %v684_v53, %v2926_v13 }
 0x174   :  { %4677 = sst [smem:[#allocation35_spill]] %s2869_s5  ;;  %v613_v21 = vmax.f32 %v612_v4, 0.0  ;;  %v705_v59 = vmul.f32 %v704_v63, %v2939_v0 }
 0x175   :  { %4679 = sst [smem:[#allocation40_spill]] %s2875_s6  ;;  %v686_v53 = vadd.f32 %v685_v48, %v683_v1 }
 0x176   :  { %s2900_s20 = sld [smem:[#allocation7 + $0xa1]]  ;;  %v626_v16 = vstv %s2887_s29  ;;  %v639_v42 = vmul.f32 %v638_v39, %v613_v21  ;;  %v656_v23 = vmul.f32 %v655_v43, %v613_v21  ;;  %v673_v46 = vmul.f32 %v672_v49, %v613_v21 }
 0x177   :  { %s2910_s9 = sld [smem:[#allocation8 + $0xb]]  ;;  %v627_v52 = vadd.f32 %v626_v16, %v625_v19  ;;  %v688_v49 = vmul.f32 %v687_v54, %v2939_v0  ;;  %v690_v26 = vmul.f32 %v689_v55, %v613_v21  ;;  %v702_v55 = vmul.f32 %v701_v62, %v2926_v13 }
 0x178   :  { %s2914_s5 = sld [smem:[#allocation7 + $0xa2]]  ;;  %v640_v39 = vadd.f32 %v639_v42, %v637_v35  ;;  %v657_v25 = vadd.f32 %v656_v23, %v654_v38  ;;  %v674_v43 = vadd.f32 %v673_v46, %v671_v41  ;;  %v707_v28 = vmul.f32 %v706_v3, %v613_v21 }
 0x179   :  { %s2922_s11 = sld [smem:[#allocation8 + $0xc]]  ;;  %v643_v60 = vstv %s2897_s26  ;;  %v629_v10 = vadd.f32 %v628_v11, %v627_v52  ;;  %v703_v31 = vadd.f32 %v702_v55, %v700_v18  ;;  %v4705_v19 = vstv %s4665_s13 }
 0x17a   :  { %s2928_s3 = sld [smem:[#allocation7 + $0xa3]]  ;;  %v645_v12 = vadd.f32 %v640_v39, %v635_v36  ;;  %v662_v6 = vadd.f32 %v657_v25, %v652_v40  ;;  %v679_v15 = vadd.f32 %v674_v43, %v669_v47  ;;  %v708_v32 = vadd.f32 %v707_v28, %v705_v59 }
 0x17b   :  { %s2937_s8 = sld [smem:[#allocation7 + $0xa4]]  ;;  %v630_v57 = vmax.f32 %v629_v10, 0.0 }
 0x17c   :  { %s2952_s6 = sld [smem:[#allocation7 + $0xa6]]  ;;  %v713_v35 = vadd.f32 %v708_v32, %v703_v31 }
 0x17d   :  { %s2958_s29 = sld [smem:[#allocation7 + $0xa7]]  ;;  %v660_v61 = vstv %s2910_s9  ;;  %v642_v2 = vmul.f32 %v641_v44, %v630_v57  ;;  %v659_v51 = vmul.f32 %v658_v45, %v630_v57  ;;  %v676_v5 = vmul.f32 %v675_v50, %v630_v57 }
 0x17e   :  { %4689 = sst [smem:[#allocation45_spill]] %s2914_s5  ;;  %v693_v45 = vmul.f32 %v692_v58, %v630_v57  ;;  %v691_v50 = vadd.f32 %v690_v26, %v688_v49  ;;  %v710_v16 = vmul.f32 %v4705_v19, %v630_v57 }
 0x17f   :  { %s2966_s10 = sld [smem:[#allocation8 + $0xd]]  ;;  %v677_v24 = vstv %s2922_s11  ;;  %v644_v54 = vadd.f32 %v643_v60, %v642_v2  ;;  %v661_v17 = vadd.f32 %v660_v61, %v659_v51 }
 0x180   :  { %4692 = sst [smem:[#allocation50_spill]] %s2928_s3  ;;  %v678_v44 = vadd.f32 %v677_v24, %v676_v5  ;;  %v696_v58 = vadd.f32 %v691_v50, %v686_v53 }
 0x181   :  { %s2944_s3 = sld [smem:[#allocation7 + $0xa5]]  ;;  %v646_v29 = vadd.f32 %v645_v12, %v644_v54  ;;  %v663_v8 = vadd.f32 %v662_v6, %v661_v17 }
 0x182   :  { %s2975_s26 = sld [smem:[#allocation7 + $0xa8]]  ;;  %v680_v30 = vadd.f32 %v679_v15, %v678_v44 }
 0x183   :  { %s2983_s5 = sld [smem:[#allocation7 + $0xa9]]  ;;  %v3041_v62 = vmax.f32 %v646_v29, 0.0  ;;  %v3043_v13 = vmax.f32 %v663_v8, 0.0 }
 0x184   :  { %s2992_s2 = sld [smem:[#allocation7 + $0xaa]]  ;;  %v3045_v56 = vmax.f32 %v680_v30, 0.0 }
 0x185   :  { %s3000_s16 = sld [smem:[#allocation8 + $0xe]]  ;;  %v694_v27 = vstv %s2966_s10 }
 0x186   :  { %s3005_s7 = sld [smem:[#allocation7 + $0xab]]  ;;  %v695_v14 = vadd.f32 %v694_v27, %v693_v45 }
 0x187   :  { %s3013_s14 = sld [smem:[#allocation7 + $0xac]] }
 0x188   :  { %s3017_s23 = sld [smem:[#allocation8 + $0xf]]  ;;  %v697_v20 = vadd.f32 %v696_v58, %v695_v14 }
 0x189   :  { %s3021_s1 = sld [smem:[#allocation7 + $0xad]] }
 0x18a   :  { %s3030_s18 = sld [smem:[#allocation7 + $0xae]]  ;;  %v3060_v52 = vmax.f32 %v697_v20, 0.0 }
 0x18b   :  { %s4702_s4 = sld [smem:[#allocation57_spill]]  ;;  %v711_v63 = vstv %s3000_s16 }
 0x18c   :  { %s3032_s25 = sld [smem:[#allocation7 + $0xaf]]  ;;  %v712_v0 = vadd.f32 %v711_v63, %v710_v16 }
 0x18d   :  { %s4703_s30 = sld [smem:[#allocation62_spill]] }
 0x18e   :  { %s4704_s19 = sld [smem:[#allocation67_spill]]  ;;  %v728_v9 = vstv %s3017_s23  ;;  %v714_v38 = vadd.f32 %v713_v35, %v712_v0 }
 0x18f   :  { %s3039_s11 = sld [smem:[#allocation8 + $0x10]] }
 0x190   :  { %s3049_s24 = sld [smem:[#allocation7 + $0xb0]]  ;;  %v3082_v23 = vmax.f32 %v714_v38, 0.0 }
 0x191   :  { %s4706_s28 = sld [smem:[#allocation72_spill]]  ;;  %v716_v3 = vstv %s4702_s4 }
 0x192   :  { %s4707_s21 = sld [smem:[#allocation77_spill]]  ;;  %v717_v33 = vmul.f32 %v716_v3, %v3041_v62 }
 0x193   :  { %s4708_s17 = sld [smem:[#allocation58_spill]]  ;;  %v718_v34 = vstv %s4703_s30 }
 0x194   :  { %s3053_s12 = sld [smem:[#allocation7 + $0xb1]]  ;;  %v721_v4 = vstv %s4704_s19  ;;  %v719_v60 = vmul.f32 %v718_v34, %v3043_v13 }
 0x195   :  { %s3058_s27 = sld [smem:[#allocation7 + $0xb2]]  ;;  %v722_v11 = vmul.f32 %v721_v4, %v3045_v56  ;;  %v745_v1 = vstv %s3039_s11 }
 0x196   :  { %s4709_s13 = sld [smem:[#allocation63_spill]]  ;;  %v720_v61 = vadd.f32 %v719_v60, %v717_v33 }
 0x197   :  { %s4710_s10 = sld [smem:[#allocation68_spill]]  ;;  %v723_v36 = vstv %s4706_s28 }
 0x198   :  { %s4711_s15 = sld [smem:[#allocation73_spill]]  ;;  %v726_v37 = vstv %s4707_s21  ;;  %v724_v22 = vmul.f32 %v723_v36, %v3060_v52 }
 0x199   :  { %s4712_s22 = sld [smem:[#allocation78_spill]]  ;;  %v733_v21 = vstv %s4708_s17  ;;  %v727_v25 = vmul.f32 %v726_v37, %v3082_v23 }
 0x19a   :  { %s3064_s9 = sld [smem:[#allocation7 + $0xb3]]  ;;  %v734_v10 = vmul.f32 %v733_v21, %v3041_v62  ;;  %v725_v46 = vadd.f32 %v724_v22, %v722_v11 }
 0x19b   :  { %s3070_s16 = sld [smem:[#allocation8 + $0x11]]  ;;  %v729_v6 = vadd.f32 %v728_v9, %v727_v25 }
 0x19c   :  { %s4714_s4 = sld [smem:[#allocation59_spill]]  ;;  %v735_v40 = vstv %s4709_s13  ;;  %v730_v43 = vadd.f32 %v725_v46, %v720_v61 }
 0x19d   :  { %s4715_s30 = sld [smem:[#allocation64_spill]]  ;;  %v738_v7 = vstv %s4710_s10  ;;  %v736_v24 = vmul.f32 %v735_v40, %v3043_v13 }
 0x19e   :  { %s3074_s19 = sld [smem:[#allocation7 + $0xb4]]  ;;  %v740_v41 = vstv %s4711_s15  ;;  %v739_v57 = vmul.f32 %v738_v7, %v3045_v56  ;;  %v731_v27 = vadd.f32 %v730_v43, %v729_v6 }
 0x19f   :  { %v743_v42 = vstv %s4712_s22  ;;  %s3080_s28 = sld [smem:[#allocation7 + $0xb5]]  ;;  %v741_v47 = vmul.f32 %v740_v41, %v3060_v52  ;;  %v737_v49 = vadd.f32 %v736_v24, %v734_v10 }
 0x1a0   :  { %4713 = sst [smem:[#allocation55_spill]] %s3064_s9  ;;  %v744_v2 = vmul.f32 %v743_v42, %v3082_v23  ;;  %v3120_v31 = vmax.f32 %v731_v27, 0.0 }
 0x1a1   :  { %s4718_s23 = sld [smem:[#allocation69_spill]]  ;;  %v742_v51 = vadd.f32 %v741_v47, %v739_v57  ;;  %v762_v55 = vstv %s3070_s16 }
 0x1a2   :  { %s3086_s21 = sld [smem:[#allocation7 + $0xb6]]  ;;  %v750_v48 = vstv %s4714_s4  ;;  %v746_v15 = vadd.f32 %v745_v1, %v744_v2 }
 0x1a3   :  { %s4720_s17 = sld [smem:[#allocation74_spill]]  ;;  %v752_v39 = vstv %s4715_s30  ;;  %v751_v5 = vmul.f32 %v750_v48, %v3041_v62  ;;  %v747_v17 = vadd.f32 %v742_v51, %v737_v49 }
 0x1a4   :  { %4716 = sst [smem:[#allocation36_spill]] %s3074_s19  ;;  %v753_v53 = vmul.f32 %v752_v39, %v3043_v13 }
 0x1a5   :  { %4717 = sst [smem:[#allocation41_spill]] %s3080_s28  ;;  %v748_v8 = vadd.f32 %v747_v17, %v746_v15 }
 0x1a6   :  { %s3092_s13 = sld [smem:[#allocation8 + $0x12]]  ;;  %v754_v44 = vadd.f32 %v753_v53, %v751_v5 }
 0x1a7   :  { %s4721_s10 = sld [smem:[#allocation79_spill]]  ;;  %v755_v12 = vstv %s4718_s23  ;;  %v3126_v16 = vmax.f32 %v748_v8, 0.0 }
 0x1a8   :  { %4719 = sst [smem:[#allocation46_spill]] %s3086_s21  ;;  %v756_v26 = vmul.f32 %v755_v12, %v3045_v56 }
 0x1a9   :  { %s3096_s15 = sld [smem:[#allocation7 + $0xb7]]  ;;  %v757_v54 = vstv %s4720_s17 }
 0x1aa   :  { %s4723_s11 = sld [smem:[#allocation60_spill]]  ;;  %v758_v45 = vmul.f32 %v757_v54, %v3060_v52 }
 0x1ab   :  { %s3101_s22 = sld [smem:[#allocation7 + $0xb8]] }
 0x1ac   :  { %s4725_s4 = sld [smem:[#allocation65_spill]]  ;;  %v759_v30 = vadd.f32 %v758_v45, %v756_v26  ;;  %v779_v34 = vstv %s3092_s13 }
 0x1ad   :  { %s3105_s30 = sld [smem:[#allocation7 + $0xb9]]  ;;  %v760_v50 = vstv %s4721_s10 }
 0x1ae   :  { %s3109_s21 = sld [smem:[#allocation7 + $0xba]]  ;;  %v761_v18 = vmul.f32 %v760_v50, %v3082_v23  ;;  %v764_v20 = vadd.f32 %v759_v30, %v754_v44 }
 0x1af   :  { %4722 = sst [smem:[#allocation51_spill]] %s3096_s15 }
 0x1b0   :  { %s4727_s15 = sld [smem:[#allocation70_spill]]  ;;  %v767_v29 = vstv %s4723_s11  ;;  %v763_v59 = vadd.f32 %v762_v55, %v761_v18 }
 0x1b1   :  { %4724 = sst [smem:[#allocation56_spill]] %s3101_s22  ;;  %v768_v14 = vmul.f32 %v767_v29, %v3041_v62 }
 0x1b2   :  { %s4729_s23 = sld [smem:[#allocation75_spill]]  ;;  %v769_v58 = vstv %s4725_s4  ;;  %v765_v4 = vadd.f32 %v764_v20, %v763_v59 }
 0x1b3   :  { %4726 = sst [smem:[#allocation23_spill]] %s3105_s30  ;;  %v770_v28 = vmul.f32 %v769_v58, %v3043_v13 }
 0x1b4   :  { %4728 = sst [smem:[#allocation27_spill]] %s3109_s21  ;;  %v3147_v38 = vmax.f32 %v765_v4, 0.0 }
 0x1b5   :  { %s3114_s22 = sld [smem:[#allocation8 + $0x13]]  ;;  %v771_v3 = vadd.f32 %v770_v28, %v768_v14 }
 0x1b6   :  { %s4730_s17 = sld [smem:[#allocation80_spill]]  ;;  %v772_v19 = vstv %s4727_s15 }
 0x1b7   :  { %s3118_s28 = sld [smem:[#allocation7 + $0xbb]]  ;;  %v773_v32 = vmul.f32 %v772_v19, %v3045_v56 }
 0x1b8   :  { %s4732_s10 = sld [smem:[#allocation61_spill]]  ;;  %v774_v63 = vstv %s4729_s23 }
 0x1b9   :  { %s4733_s16 = sld [smem:[#allocation66_spill]]  ;;  %v775_v0 = vmul.f32 %v774_v63, %v3060_v52 }
 0x1ba   :  { %s3124_s11 = sld [smem:[#allocation7 + $0xbc]] }
 0x1bb   :  { %s4735_s21 = sld [smem:[#allocation71_spill]]  ;;  %v776_v36 = vadd.f32 %v775_v0, %v773_v32  ;;  %v796_v42 = vstv %s3114_s22 }
 0x1bc   :  { %s3130_s4 = sld [smem:[#allocation7 + $0xbd]]  ;;  %v777_v33 = vstv %s4730_s17 }
 0x1bd   :  { %4731 = sst [smem:[#allocation28_spill]] %s3118_s28  ;;  %v778_v35 = vmul.f32 %v777_v33, %v3082_v23  ;;  %v781_v40 = vadd.f32 %v776_v36, %v771_v3 }
 0x1be   :  { %s4737_s28 = sld [smem:[#allocation76_spill]]  ;;  %v784_v60 = vstv %s4732_s10 }
 0x1bf   :  { %s3135_s30 = sld [smem:[#allocation8 + $0x14]]  ;;  %v786_v11 = vstv %s4733_s16  ;;  %v785_v37 = vmul.f32 %v784_v60, %v3041_v62  ;;  %v780_v61 = vadd.f32 %v779_v34, %v778_v35 }
 0x1c0   :  { %4734 = sst [smem:[#allocation14_spill]] %s3124_s11  ;;  %v787_v9 = vmul.f32 %v786_v11, %v3043_v13 }
 0x1c1   :  { %s4738_s15 = sld [smem:[#allocation81_spill]]  ;;  %v789_v21 = vstv %s4735_s21 }
 0x1c2   :  { %4736 = sst [smem:[#allocation17_spill]] %s3130_s4  ;;  %v790_v22 = vmul.f32 %v789_v21, %v3045_v56  ;;  %v788_v7 = vadd.f32 %v787_v9, %v785_v37  ;;  %v782_v56 = vadd.f32 %v781_v40, %v780_v61 }
 0x1c3   :  { %s3140_s11 = sld [smem:[#allocation7 + $0xbe]] }
 0x1c4   :  { %s4740_s23 = sld [smem:[#allocation82_spill]]  ;;  %v791_v10 = vstv %s4737_s28  ;;  %v3172_v25 = vmax.f32 %v782_v56, 0.0 }
 0x1c5   :  { %s4741_s17 = sld [smem:[#allocation87_spill]]  ;;  %v792_v62 = vmul.f32 %v791_v10, %v3060_v52  ;;  %v813_v51 = vstv %s3135_s30 }
 0x1c6   :  { %s3145_s13 = sld [smem:[#allocation8 + $0x15]] }
 0x1c7   :  { %s3151_s10 = sld [smem:[#allocation7 + $0xbf]]  ;;  %v794_v13 = vstv %s4738_s15  ;;  %v793_v57 = vadd.f32 %v792_v62, %v790_v22 }
 0x1c8   :  { %s4743_s16 = sld [smem:[#allocation92_spill]]  ;;  %v795_v41 = vmul.f32 %v794_v13, %v3082_v23 }
 0x1c9   :  { %4739 = sst [smem:[#allocation20_spill]] %s3140_s11  ;;  %v798_v43 = vadd.f32 %v793_v57, %v788_v7 }
 0x1ca   :  { %s4744_s4 = sld [smem:[#allocation97_spill]]  ;;  %v801_v46 = vstv %s4740_s23  ;;  %v797_v1 = vadd.f32 %v796_v42, %v795_v41 }
 0x1cb   :  { %s4745_s11 = sld [smem:[#allocation102_spill]]  ;;  %v803_v24 = vstv %s4741_s17  ;;  %v802_v47 = vmul.f32 %v801_v46, %v3120_v31 }
 0x1cc   :  { %s3155_s19 = sld [smem:[#allocation7 + $0xc0]]  ;;  %v804_v52 = vmul.f32 %v803_v24, %v3126_v16  ;;  %v799_v6 = vadd.f32 %v798_v43, %v797_v1  ;;  %v830_v50 = vstv %s3145_s13 }
 0x1cd   :  { %4742 = sst [smem:[#allocation24_spill]] %s3151_s10 }
 0x1ce   :  { %s3161_s21 = sld [smem:[#allocation7 + $0xc1]]  ;;  %v806_v48 = vstv %s4743_s16  ;;  %v805_v49 = vadd.f32 %v804_v52, %v802_v47  ;;  %v3194_v27 = vmax.f32 %v799_v6, 0.0 }
 0x1cf   :  { %s4748_s28 = sld [smem:[#allocation83_spill]]  ;;  %v807_v2 = vmul.f32 %v806_v48, %v3147_v38 }
 0x1d0   :  { %s4749_s10 = sld [smem:[#allocation88_spill]]  ;;  %v808_v23 = vstv %s4744_s4 }
 0x1d1   :  { %s4750_s9 = sld [smem:[#allocation93_spill]]  ;;  %v811_v39 = vstv %s4745_s11  ;;  %v809_v15 = vmul.f32 %v808_v23, %v3172_v25 }
 0x1d2   :  { %4746 = sst [smem:[#allocation29_spill]] %s3155_s19  ;;  %v812_v59 = vmul.f32 %v811_v39, %v3194_v27 }
 0x1d3   :  { %s3165_s15 = sld [smem:[#allocation7 + $0xc2]]  ;;  %v810_v18 = vadd.f32 %v809_v15, %v807_v2 }
 0x1d4   :  { %4747 = sst [smem:[#allocation15_spill]] %s3161_s21  ;;  %v814_v33 = vadd.f32 %v813_v51, %v812_v59 }
 0x1d5   :  { %s3170_s22 = sld [smem:[#allocation7 + $0xc3]]  ;;  %v818_v5 = vstv %s4748_s28  ;;  %v815_v28 = vadd.f32 %v810_v18, %v805_v49 }
 0x1d6   :  { %s4753_s23 = sld [smem:[#allocation98_spill]]  ;;  %v820_v53 = vstv %s4749_s10  ;;  %v819_v26 = vmul.f32 %v818_v5, %v3120_v31 }
 0x1d7   :  { %s4754_s17 = sld [smem:[#allocation103_spill]]  ;;  %v823_v12 = vstv %s4750_s9  ;;  %v821_v54 = vmul.f32 %v820_v53, %v3126_v16  ;;  %v816_v9 = vadd.f32 %v815_v28, %v814_v33 }
 0x1d8   :  { %s3175_s21 = sld [smem:[#allocation8 + $0x16]]  ;;  %v824_v17 = vmul.f32 %v823_v12, %v3147_v38 }
 0x1d9   :  { %4751 = sst [smem:[#allocation18_spill]] %s3165_s15  ;;  %v822_v55 = vadd.f32 %v821_v54, %v819_v26  ;;  %v3230_v13 = vmax.f32 %v816_v9, 0.0 }
 0x1da   :  { %s3181_s16 = sld [smem:[#allocation7 + $0xc4]] }
 0x1db   :  { %4752 = sst [smem:[#allocation21_spill]] %s3170_s22 }
 0x1dc   :  { %s4756_s11 = sld [smem:[#allocation84_spill]]  ;;  %v825_v44 = vstv %s4753_s23 }
 0x1dd   :  { %s4757_s4 = sld [smem:[#allocation89_spill]]  ;;  %v828_v45 = vstv %s4754_s17  ;;  %v826_v29 = vmul.f32 %v825_v44, %v3172_v25 }
 0x1de   :  { %s4758_s15 = sld [smem:[#allocation94_spill]]  ;;  %v829_v20 = vmul.f32 %v828_v45, %v3194_v27  ;;  %v847_v37 = vstv %s3175_s21 }
 0x1df   :  { %s4759_s19 = sld [smem:[#allocation99_spill]]  ;;  %v827_v19 = vadd.f32 %v826_v29, %v824_v17 }
 0x1e0   :  { %4755 = sst [smem:[#allocation25_spill]] %s3181_s16  ;;  %v831_v34 = vadd.f32 %v830_v50, %v829_v20 }
 0x1e1   :  { %s3186_s22 = sld [smem:[#allocation7 + $0xc5]]  ;;  %v832_v4 = vadd.f32 %v827_v19, %v822_v55 }
 0x1e2   :  { %s3192_s9 = sld [smem:[#allocation7 + $0xc6]]  ;;  %v835_v8 = vstv %s4756_s11 }
 0x1e3   :  { %s3197_s30 = sld [smem:[#allocation7 + $0xc7]]  ;;  %v837_v30 = vstv %s4757_s4  ;;  %v836_v32 = vmul.f32 %v835_v8, %v3120_v31  ;;  %v833_v21 = vadd.f32 %v832_v4, %v831_v34 }
 0x1e4   :  { %v840_v14 = vstv %s4758_s15  ;;  %s4763_s10 = sld [smem:[#allocation104_spill]]  ;;  %v838_v63 = vmul.f32 %v837_v30, %v3126_v16 }
 0x1e5   :  { %v842_v58 = vstv %s4759_s19  ;;  %s3203_s28 = sld [smem:[#allocation8 + $0x17]]  ;;  %v841_v3 = vmul.f32 %v840_v14, %v3147_v38  ;;  %v3232_v41 = vmax.f32 %v833_v21, 0.0 }
 0x1e6   :  { %s3207_s13 = sld [smem:[#allocation7 + $0xc8]]  ;;  %v843_v0 = vmul.f32 %v842_v58, %v3172_v25  ;;  %v839_v60 = vadd.f32 %v838_v63, %v836_v32 }
 0x1e7   :  { %4760 = sst [smem:[#allocation30_spill]] %s3186_s22 }
 0x1e8   :  { %4761 = sst [smem:[#allocation16_spill]] %s3192_s9  ;;  %v844_v11 = vadd.f32 %v843_v0, %v841_v3 }
 0x1e9   :  { %4762 = sst [smem:[#allocation19_spill]] %s3197_s30 }
 0x1ea   :  { %s4765_s23 = sld [smem:[#allocation85_spill]]  ;;  %v845_v35 = vstv %s4763_s10  ;;  %v849_v40 = vadd.f32 %v844_v11, %v839_v60 }
 0x1eb   :  { %s4766_s19 = sld [smem:[#allocation90_spill]]  ;;  %v846_v36 = vmul.f32 %v845_v35, %v3194_v27  ;;  %v864_v1 = vstv %s3203_s28 }
 0x1ec   :  { %4764 = sst [smem:[#allocation22_spill]] %s3207_s13 }
 0x1ed   :  { %s3213_s15 = sld [smem:[#allocation7 + $0xc9]]  ;;  %v848_v10 = vadd.f32 %v847_v37, %v846_v36 }
 0x1ee   :  { %s3216_s17 = sld [smem:[#allocation7 + $0xca]] }
 0x1ef   :  { %s4769_s11 = sld [smem:[#allocation95_spill]]  ;;  %v850_v24 = vadd.f32 %v849_v40, %v848_v10 }
 0x1f0   :  { %s4770_s4 = sld [smem:[#allocation100_spill]]  ;;  %v852_v61 = vstv %s4765_s23 }
 0x1f1   :  { %s3220_s30 = sld [smem:[#allocation8 + $0x18]]  ;;  %v854_v22 = vstv %s4766_s19  ;;  %v853_v7 = vmul.f32 %v852_v61, %v3120_v31  ;;  %v3248_v39 = vmax.f32 %v850_v24, 0.0 }
 0x1f2   :  { %s3224_s9 = sld [smem:[#allocation7 + $0xcb]]  ;;  %v855_v62 = vmul.f32 %v854_v22, %v3126_v16 }
 0x1f3   :  { %4767 = sst [smem:[#allocation26_spill]] %s3213_s15 }
 0x1f4   :  { %4768 = sst [smem:[#allocation31_spill]] %s3216_s17  ;;  %v856_v56 = vadd.f32 %v855_v62, %v853_v7 }
 0x1f5   :  { %s4772_s22 = sld [smem:[#allocation105_spill]]  ;;  %v857_v42 = vstv %s4769_s11 }
 0x1f6   :  { %s4773_s10 = sld [smem:[#allocation86_spill]]  ;;  %v859_v46 = vstv %s4770_s4  ;;  %v858_v57 = vmul.f32 %v857_v42, %v3147_v38 }
 0x1f7   :  { %s4774_s17 = sld [smem:[#allocation91_spill]]  ;;  %v860_v47 = vmul.f32 %v859_v46, %v3172_v25 }
 0x1f8   :  { %4771 = sst [smem:[#allocation37_spill]] %s3224_s9 }
 0x1f9   :  { %s3228_s15 = sld [smem:[#allocation7 + $0xcc]]  ;;  %v861_v43 = vadd.f32 %v860_v47, %v858_v57 }
 0x1fa   :  { %s3236_s21 = sld [smem:[#allocation7 + $0xcd]] }
 0x1fb   :  { %s4777_s23 = sld [smem:[#allocation96_spill]]  ;;  %v862_v52 = vstv %s4772_s22  ;;  %v866_v15 = vadd.f32 %v861_v43, %v856_v56 }
 0x1fc   :  { %s4778_s19 = sld [smem:[#allocation101_spill]]  ;;  %v869_v48 = vstv %s4773_s10  ;;  %v863_v49 = vmul.f32 %v862_v52, %v3194_v27 }
 0x1fd   :  { %s4779_s9 = sld [smem:[#allocation106_spill]]  ;;  %v871_v23 = vstv %s4774_s17  ;;  %v870_v2 = vmul.f32 %v869_v48, %v3120_v31 }
 0x1fe   :  { %s3240_s16 = sld [smem:[#allocation8 + $0x19]]  ;;  %v872_v51 = vmul.f32 %v871_v23, %v3126_v16  ;;  %v865_v6 = vadd.f32 %v864_v1, %v863_v49  ;;  %v881_v16 = vstv %s3220_s30 }
 0x1ff   :  { %4775 = sst [smem:[#allocation42_spill]] %s3228_s15 }
 0x200   :  { %4776 = sst [smem:[#allocation33_spill]] %s3236_s21  ;;  %v873_v31 = vadd.f32 %v872_v51, %v870_v2  ;;  %v867_v45 = vadd.f32 %v866_v15, %v865_v6 }
 0x201   :  { %s3246_s15 = sld [smem:[#allocation7 + $0xce]]  ;;  %v874_v5 = vstv %s4777_s23 }
 0x202   :  { %s4781_s11 = sld [smem:[#allocation107_spill]]  ;;  %v876_v53 = vstv %s4778_s19  ;;  %v875_v26 = vmul.f32 %v874_v5, %v3147_v38  ;;  %v3278_v8 = vmax.f32 %v867_v45, 0.0 }
 0x203   :  { %s3252_s4 = sld [smem:[#allocation8 + $0x1a]]  ;;  %v879_v12 = vstv %s4779_s9  ;;  %v877_v54 = vmul.f32 %v876_v53, %v3172_v25 }
 0x204   :  { %s4782_s22 = sld [smem:[#allocation112_spill]]  ;;  %v880_v17 = vmul.f32 %v879_v12, %v3194_v27  ;;  %v898_v28 = vstv %s3240_s16 }
 0x205   :  { %s3258_s28 = sld [smem:[#allocation7 + $0xcf]]  ;;  %v878_v50 = vadd.f32 %v877_v54, %v875_v26 }
 0x206   :  { %s4784_s17 = sld [smem:[#allocation117_spill]]  ;;  %v882_v25 = vadd.f32 %v881_v16, %v880_v17 }
 0x207   :  { %4780 = sst [smem:[#allocation38_spill]] %s3246_s15  ;;  %v883_v30 = vadd.f32 %v878_v50, %v873_v31 }
 0x208   :  { %s4785_s10 = sld [smem:[#allocation122_spill]]  ;;  %v886_v44 = vstv %s4781_s11 }
 0x209   :  { %s3262_s15 = sld [smem:[#allocation7 + $0xd0]]  ;;  %v887_v18 = vmul.f32 %v886_v44, %v3230_v13  ;;  %v884_v32 = vadd.f32 %v883_v30, %v882_v25  ;;  %v915_v35 = vstv %s3252_s4 }
 0x20a   :  { %s4787_s23 = sld [smem:[#allocation127_spill]]  ;;  %v888_v38 = vstv %s4782_s22 }
 0x20b   :  { %4783 = sst [smem:[#allocation43_spill]] %s3258_s28  ;;  %v889_v55 = vmul.f32 %v888_v38, %v3232_v41  ;;  %v3300_v60 = vmax.f32 %v884_v32, 0.0 }
 0x20c   :  { %s3267_s19 = sld [smem:[#allocation7 + $0xd1]]  ;;  %v891_v29 = vstv %s4784_s17 }
 0x20d   :  { %s4789_s9 = sld [smem:[#allocation108_spill]]  ;;  %v892_v14 = vmul.f32 %v891_v29, %v3248_v39  ;;  %v890_v59 = vadd.f32 %v889_v55, %v887_v18 }
 0x20e   :  { %s4790_s28 = sld [smem:[#allocation113_spill]]  ;;  %v893_v27 = vstv %s4785_s10 }
 0x20f   :  { %4786 = sst [smem:[#allocation47_spill]] %s3262_s15  ;;  %v894_v63 = vmul.f32 %v893_v27, %v3278_v8 }
 0x210   :  { %s3271_s21 = sld [smem:[#allocation7 + $0xd2]]  ;;  %v896_v58 = vstv %s4787_s23 }
 0x211   :  { %s3276_s30 = sld [smem:[#allocation7 + $0xd3]]  ;;  %v895_v11 = vadd.f32 %v894_v63, %v892_v14  ;;  %v897_v10 = vmul.f32 %v896_v58, %v3300_v60 }
 0x212   :  { %4788 = sst [smem:[#allocation49_spill]] %s3267_s19 }
 0x213   :  { %s4793_s11 = sld [smem:[#allocation118_spill]]  ;;  %v903_v19 = vstv %s4789_s9  ;;  %v900_v40 = vadd.f32 %v895_v11, %v890_v59  ;;  %v899_v57 = vadd.f32 %v898_v28, %v897_v10 }
 0x214   :  { %s4794_s19 = sld [smem:[#allocation123_spill]]  ;;  %v905_v20 = vstv %s4790_s28  ;;  %v904_v3 = vmul.f32 %v903_v19, %v3230_v13 }
 0x215   :  { %s4795_s15 = sld [smem:[#allocation128_spill]]  ;;  %v906_v0 = vmul.f32 %v905_v20, %v3232_v41  ;;  %v901_v2 = vadd.f32 %v900_v40, %v899_v57 }
 0x216   :  { %4791 = sst [smem:[#allocation52_spill]] %s3271_s21 }
 0x217   :  { %4792 = sst [smem:[#allocation53_spill]] %s3276_s30  ;;  %v907_v36 = vadd.f32 %v906_v0, %v904_v3  ;;  %v3337_v54 = vmax.f32 %v901_v2, 0.0 }
 0x218   :  { %s3282_s22 = sld [smem:[#allocation8 + $0x1b]] }
 0x219   :  { %s3287_s17 = sld [smem:[#allocation7 + $0xd4]]  ;;  %v908_v33 = vstv %s4793_s11 }
 0x21a   :  { %s4797_s10 = sld [smem:[#allocation109_spill]]  ;;  %v910_v34 = vstv %s4794_s19  ;;  %v909_v37 = vmul.f32 %v908_v33, %v3248_v39 }
 0x21b   :  { %s4798_s30 = sld [smem:[#allocation114_spill]]  ;;  %v913_v4 = vstv %s4795_s15  ;;  %v911_v9 = vmul.f32 %v910_v34, %v3278_v8 }
 0x21c   :  { %s4799_s21 = sld [smem:[#allocation119_spill]]  ;;  %v914_v7 = vmul.f32 %v913_v4, %v3300_v60 }
 0x21d   :  { %s3292_s13 = sld [smem:[#allocation7 + $0xd5]]  ;;  %v912_v42 = vadd.f32 %v911_v9, %v909_v37 }
 0x21e   :  { %s3298_s16 = sld [smem:[#allocation7 + $0xd6]]  ;;  %v916_v47 = vadd.f32 %v915_v35, %v914_v7  ;;  %v932_v49 = vstv %s3282_s22 }
 0x21f   :  { %4796 = sst [smem:[#allocation54_spill]] %s3287_s17  ;;  %v917_v48 = vadd.f32 %v912_v42, %v907_v36 }
 0x220   :  { %s4802_s28 = sld [smem:[#allocation124_spill]]  ;;  %v920_v21 = vstv %s4797_s10 }
 0x221   :  { %s3303_s23 = sld [smem:[#allocation7 + $0xd7]]  ;;  %v922_v61 = vstv %s4798_s30  ;;  %v921_v62 = vmul.f32 %v920_v21, %v3230_v13  ;;  %v918_v12 = vadd.f32 %v917_v48, %v916_v47 }
 0x222   :  { %s4804_s9 = sld [smem:[#allocation129_spill]]  ;;  %v925_v22 = vstv %s4799_s21  ;;  %v923_v46 = vmul.f32 %v922_v61, %v3232_v41 }
 0x223   :  { %4800 = sst [smem:[#allocation57_spill]] %s3292_s13  ;;  %v926_v24 = vmul.f32 %v925_v22, %v3248_v39  ;;  %v3343_v44 = vmax.f32 %v918_v12, 0.0 }
 0x224   :  { %4801 = sst [smem:[#allocation62_spill]] %s3298_s16  ;;  %v924_v23 = vadd.f32 %v923_v46, %v921_v62 }
 0x225   :  { %s3309_s19 = sld [smem:[#allocation8 + $0x1c]] }
 0x226   :  { %s3314_s15 = sld [smem:[#allocation7 + $0xd8]]  ;;  %v927_v56 = vstv %s4802_s28 }
 0x227   :  { %4803 = sst [smem:[#allocation67_spill]] %s3303_s23  ;;  %v928_v52 = vmul.f32 %v927_v56, %v3278_v8 }
 0x228   :  { %s4806_s4 = sld [smem:[#allocation110_spill]]  ;;  %v930_v1 = vstv %s4804_s9 }
 0x229   :  { %s4807_s30 = sld [smem:[#allocation115_spill]]  ;;  %v931_v43 = vmul.f32 %v930_v1, %v3300_v60  ;;  %v929_v51 = vadd.f32 %v928_v52, %v926_v24 }
 0x22a   :  { %s3319_s21 = sld [smem:[#allocation7 + $0xd9]] }
 0x22b   :  { %s3323_s11 = sld [smem:[#allocation7 + $0xda]]  ;;  %v933_v6 = vadd.f32 %v932_v49, %v931_v43  ;;  %v934_v31 = vadd.f32 %v929_v51, %v924_v23  ;;  %v949_v55 = vstv %s3309_s19 }
 0x22c   :  { %4805 = sst [smem:[#allocation72_spill]] %s3314_s15 }
 0x22d   :  { %s4810_s10 = sld [smem:[#allocation120_spill]]  ;;  %v935_v38 = vadd.f32 %v934_v31, %v933_v6 }
 0x22e   :  { %s4811_s16 = sld [smem:[#allocation125_spill]]  ;;  %v937_v5 = vstv %s4806_s4 }
 0x22f   :  { %s3327_s13 = sld [smem:[#allocation8 + $0x1d]]  ;;  %v939_v53 = vstv %s4807_s30  ;;  %v938_v15 = vmul.f32 %v937_v5, %v3230_v13  ;;  %v3359_v59 = vmax.f32 %v935_v38, 0.0 }
 0x230   :  { %4808 = sst [smem:[#allocation77_spill]] %s3319_s21  ;;  %v940_v26 = vmul.f32 %v939_v53, %v3232_v41 }
 0x231   :  { %4809 = sst [smem:[#allocation58_spill]] %s3323_s11 }
 0x232   :  { %s3331_s28 = sld [smem:[#allocation7 + $0xdb]]  ;;  %v941_v45 = vadd.f32 %v940_v26, %v938_v15 }
 0x233   :  { %s4813_s21 = sld [smem:[#allocation130_spill]]  ;;  %v942_v17 = vstv %s4810_s10 }
 0x234   :  { %s4814_s9 = sld [smem:[#allocation111_spill]]  ;;  %v944_v16 = vstv %s4811_s16  ;;  %v943_v50 = vmul.f32 %v942_v17, %v3248_v39 }
 0x235   :  { %s3335_s11 = sld [smem:[#allocation7 + $0xdc]]  ;;  %v945_v18 = vmul.f32 %v944_v16, %v3278_v8  ;;  %v966_v34 = vstv %s3327_s13 }
 0x236   :  { %s4816_s22 = sld [smem:[#allocation116_spill]] }
 0x237   :  { %s3341_s4 = sld [smem:[#allocation7 + $0xdd]]  ;;  %v946_v27 = vadd.f32 %v945_v18, %v943_v50 }
 0x238   :  { %4812 = sst [smem:[#allocation63_spill]] %s3331_s28 }
 0x239   :  { %s4818_s30 = sld [smem:[#allocation121_spill]]  ;;  %v947_v25 = vstv %s4813_s21  ;;  %v951_v63 = vadd.f32 %v946_v27, %v941_v45 }
 0x23a   :  { %s4819_s28 = sld [smem:[#allocation126_spill]]  ;;  %v954_v29 = vstv %s4814_s9  ;;  %v948_v30 = vmul.f32 %v947_v25, %v3300_v60 }
 0x23b   :  { %4815 = sst [smem:[#allocation68_spill]] %s3335_s11  ;;  %v955_v14 = vmul.f32 %v954_v29, %v3230_v13 }
 0x23c   :  { %s3347_s17 = sld [smem:[#allocation8 + $0x1e]]  ;;  %v956_v58 = vstv %s4816_s22  ;;  %v950_v32 = vadd.f32 %v949_v55, %v948_v30 }
 0x23d   :  { %4817 = sst [smem:[#allocation73_spill]] %s3341_s4  ;;  %v957_v28 = vmul.f32 %v956_v58, %v3232_v41 }
 0x23e   :  { %s3352_s10 = sld [smem:[#allocation7 + $0xde]]  ;;  %v952_v4 = vadd.f32 %v951_v63, %v950_v32 }
 0x23f   :  { %s4821_s16 = sld [smem:[#allocation131_spill]]  ;;  %v959_v19 = vstv %s4818_s30  ;;  %v958_v0 = vadd.f32 %v957_v28, %v955_v14 }
 0x240   :  { %s4822_s4 = sld [smem:[#allocation132_spill]]  ;;  %v961_v20 = vstv %s4819_s28  ;;  %v960_v3 = vmul.f32 %v959_v19, %v3248_v39  ;;  %v3385_v21 = vmax.f32 %v952_v4, 0.0 }
 0x241   :  { %s3357_s15 = sld [smem:[#allocation7 + $0xdf]]  ;;  %v962_v13 = vmul.f32 %v961_v20, %v3278_v8 }
 0x242   :  { %s3364_s19 = sld [smem:[#allocation7 + $0xe0]]  ;;  %v983_v40 = vstv %s3347_s17 }
 0x243   :  { %s4825_s21 = sld [smem:[#allocation137_spill]]  ;;  %v963_v35 = vadd.f32 %v962_v13, %v960_v3 }
 0x244   :  { %4820 = sst [smem:[#allocation78_spill]] %s3352_s10 }
 0x245   :  { %s4826_s9 = sld [smem:[#allocation142_spill]]  ;;  %v964_v33 = vstv %s4821_s16  ;;  %v968_v22 = vadd.f32 %v963_v35, %v958_v0 }
 0x246   :  { %s4827_s10 = sld [smem:[#allocation147_spill]]  ;;  %v971_v41 = vstv %s4822_s4  ;;  %v965_v11 = vmul.f32 %v964_v33, %v3300_v60 }
 0x247   :  { %4823 = sst [smem:[#allocation59_spill]] %s3357_s15  ;;  %v972_v39 = vmul.f32 %v971_v41, %v3337_v54 }
 0x248   :  { %4824 = sst [smem:[#allocation64_spill]] %s3364_s19  ;;  %v967_v61 = vadd.f32 %v966_v34, %v965_v11 }
 0x249   :  { %s4828_s11 = sld [smem:[#allocation152_spill]]  ;;  %v973_v8 = vstv %s4825_s21 }
 0x24a   :  { %s3368_s22 = sld [smem:[#allocation8 + $0x1f]]  ;;  %v974_v60 = vmul.f32 %v973_v8, %v3343_v44  ;;  %v969_v42 = vadd.f32 %v968_v22, %v967_v61 }
 0x24b   :  { %s3373_s30 = sld [smem:[#allocation7 + $0xe1]]  ;;  %v976_v36 = vstv %s4826_s9 }
 0x24c   :  { %s4830_s28 = sld [smem:[#allocation133_spill]]  ;;  %v978_v37 = vstv %s4827_s10  ;;  %v977_v10 = vmul.f32 %v976_v36, %v3359_v59  ;;  %v975_v46 = vadd.f32 %v974_v60, %v972_v39  ;;  %v3406_v48 = vmax.f32 %v969_v42, 0.0 }
 0x24d   :  { %s4831_s19 = sld [smem:[#allocation138_spill]]  ;;  %v979_v24 = vmul.f32 %v978_v37, %v3385_v21 }
 0x24e   :  { %s3377_s15 = sld [smem:[#allocation7 + $0xe2]] }
 0x24f   :  { %v981_v9 = vstv %s4828_s11  ;;  %s3383_s16 = sld [smem:[#allocation7 + $0xe3]]  ;;  %v980_v23 = vadd.f32 %v979_v24, %v977_v10 }
 0x250   :  { %s4832_s13 = sld [smem:[#allocation143_spill]]  ;;  %v1000_v51 = vstv %s3368_s22  ;;  %v982_v12 = vmul.f32 %v981_v9, %v3406_v48 }
 0x251   :  { %4829 = sst [smem:[#allocation69_spill]] %s3373_s30  ;;  %v985_v6 = vadd.f32 %v980_v23, %v975_v46  ;;  %v1058_v23 = vstv %s2893_s0 }
 0x252   :  { %s4833_s4 = sld [smem:[#allocation148_spill]]  ;;  %v988_v7 = vstv %s4830_s28  ;;  %v984_v50 = vadd.f32 %v983_v40, %v982_v12 }
 0x253   :  { %s4834_s30 = sld [smem:[#allocation153_spill]]  ;;  %v990_v62 = vstv %s4831_s19  ;;  %v989_v56 = vmul.f32 %v988_v7, %v3337_v54 }
 0x254   :  { %s3388_s23 = sld [smem:[#allocation8 + $0x20]]  ;;  %v991_v57 = vmul.f32 %v990_v62, %v3343_v44  ;;  %v986_v14 = vadd.f32 %v985_v6, %v984_v50 }
 0x255   :  { %s3394_s10 = sld [smem:[#allocation7 + $0xe4]] }
 0x256   :  { %s4836_s11 = sld [smem:[#allocation134_spill]]  ;;  %v993_v47 = vstv %s4832_s13  ;;  %v992_v2 = vadd.f32 %v991_v57, %v989_v56  ;;  %v3444_v13 = vmax.f32 %v986_v14, 0.0 }
 0x257   :  { %s4837_s21 = sld [smem:[#allocation139_spill]]  ;;  %v994_v43 = vmul.f32 %v993_v47, %v3359_v59 }
 0x258   :  { %s3398_s9 = sld [smem:[#allocation7 + $0xe5]]  ;;  %v995_v52 = vstv %s4833_s4 }
 0x259   :  { %v998_v1 = vstv %s4834_s30  ;;  %s3404_s17 = sld [smem:[#allocation7 + $0xe6]]  ;;  %v996_v49 = vmul.f32 %v995_v52, %v3385_v21 }
 0x25a   :  { %s4840_s19 = sld [smem:[#allocation144_spill]]  ;;  %v999_v26 = vmul.f32 %v998_v1, %v3406_v48  ;;  %v1017_v30 = vstv %s3388_s23 }
 0x25b   :  { %4835 = sst [smem:[#allocation74_spill]] %s3394_s10  ;;  %v997_v15 = vadd.f32 %v996_v49, %v994_v43 }
 0x25c   :  { %s4841_s28 = sld [smem:[#allocation149_spill]]  ;;  %v1005_v5 = vstv %s4836_s11  ;;  %v1001_v18 = vadd.f32 %v1000_v51, %v999_v26 }
 0x25d   :  { %s3410_s10 = sld [smem:[#allocation7 + $0xe7]]  ;;  %v1007_v53 = vstv %s4837_s21  ;;  %v1006_v31 = vmul.f32 %v1005_v5, %v3337_v54  ;;  %v1002_v38 = vadd.f32 %v997_v15, %v992_v2  ;;  %v1063_v5 = vstv %s2992_s2 }
 0x25e   :  { %4838 = sst [smem:[#allocation79_spill]] %s3398_s9  ;;  %v1008_v17 = vmul.f32 %v1007_v53, %v3343_v44  ;;  %v1066_v53 = vstv %s3032_s25 }
 0x25f   :  { %4839 = sst [smem:[#allocation60_spill]] %s3404_s17  ;;  %v1003_v58 = vadd.f32 %v1002_v38, %v1001_v18 }
 0x260   :  { %s3415_s13 = sld [smem:[#allocation8 + $0x21]]  ;;  %v1010_v16 = vstv %s4840_s19  ;;  %v1009_v55 = vadd.f32 %v1008_v17, %v1006_v31 }
 0x261   :  { %s4843_s30 = sld [smem:[#allocation154_spill]]  ;;  %v1011_v25 = vmul.f32 %v1010_v16, %v3359_v59  ;;  %v3446_v0 = vmax.f32 %v1003_v58, 0.0  ;;  %v1075_v16 = vstv %s2900_s20 }
 0x262   :  { %s3419_s4 = sld [smem:[#allocation7 + $0xe8]]  ;;  %v1012_v45 = vstv %s4841_s28 }
 0x263   :  { %4842 = sst [smem:[#allocation65_spill]] %s3410_s10  ;;  %v1013_v29 = vmul.f32 %v1012_v45, %v3385_v21  ;;  %v1078_v45 = vstv %s2952_s6  ;;  %v1076_v38 = vmul.f32 %v1075_v16, %v3446_v0  ;;  %v1131_v16 = vstv %s3030_s18 }
 0x264   :  { %s4845_s22 = sld [smem:[#allocation135_spill]] }
 0x265   :  { %s3425_s11 = sld [smem:[#allocation7 + $0xe9]]  ;;  %v1014_v20 = vadd.f32 %v1013_v29, %v1011_v25  ;;  %v1083_v29 = vstv %s3049_s24 }
 0x266   :  { %s4847_s21 = sld [smem:[#allocation140_spill]]  ;;  %v1034_v37 = vstv %s3415_s13 }
 0x267   :  { %s4848_s10 = sld [smem:[#allocation145_spill]]  ;;  %v1015_v27 = vstv %s4843_s30  ;;  %v1019_v41 = vadd.f32 %v1014_v20, %v1009_v55  ;;  %v1080_v55 = vstv %s3005_s7 }
 0x268   :  { %4844 = sst [smem:[#allocation70_spill]] %s3419_s4  ;;  %v1016_v28 = vmul.f32 %v1015_v27, %v3406_v48 }
 0x269   :  { %s3428_s17 = sld [smem:[#allocation7 + $0xea]] }
 0x26a   :  { %s3433_s4 = sld [smem:[#allocation7 + $0xeb]]  ;;  %v1022_v19 = vstv %s4845_s22  ;;  %v1018_v33 = vadd.f32 %v1017_v30, %v1016_v28 }
 0x26b   :  { %4846 = sst [smem:[#allocation75_spill]] %s3425_s11  ;;  %v1023_v32 = vmul.f32 %v1022_v19, %v3337_v54 }
 0x26c   :  { %s4851_s19 = sld [smem:[#allocation150_spill]]  ;;  %v1024_v63 = vstv %s4847_s21  ;;  %v1020_v9 = vadd.f32 %v1019_v41, %v1018_v33 }
 0x26d   :  { %s4852_s28 = sld [smem:[#allocation32_spill]]  ;;  %v1027_v3 = vstv %s4848_s10  ;;  %v1025_v34 = vmul.f32 %v1024_v63, %v3343_v44  ;;  %v1095_v63 = vstv %s2958_s29 }
 0x26e   :  { %s3437_s11 = sld [smem:[#allocation8 + $0x22]]  ;;  %v1028_v4 = vmul.f32 %v1027_v3, %v3359_v59  ;;  %v3470_v42 = vmax.f32 %v1020_v9, 0.0  ;;  %v1097_v3 = vstv %s3013_s14 }
 0x26f   :  { %4849 = sst [smem:[#allocation80_spill]] %s3428_s17  ;;  %v1026_v39 = vadd.f32 %v1025_v34, %v1023_v32 }
 0x270   :  { %4850 = sst [smem:[#allocation61_spill]] %s3433_s4  ;;  %v1079_v25 = vmul.f32 %v1078_v45, %v3470_v42 }
 0x271   :  { %s3442_s17 = sld [smem:[#allocation7 + $0xec]] }
 0x272   :  { %s4854_s23 = sld [smem:[#allocation136_spill]]  ;;  %v1029_v35 = vstv %s4851_s19 }
 0x273   :  { %s4855_s30 = sld [smem:[#allocation141_spill]]  ;;  %v1032_v11 = vstv %s4852_s28  ;;  %v1030_v8 = vmul.f32 %v1029_v35, %v3385_v21 }
 0x274   :  { %s4856_s4 = sld [smem:[#allocation146_spill]]  ;;  %v1033_v36 = vmul.f32 %v1032_v11, %v3406_v48  ;;  %v1096_v11 = vmul.f32 %v1095_v63, %v3470_v42 }
 0x275   :  { %s3449_s22 = sld [smem:[#allocation7 + $0xed]]  ;;  %v1031_v10 = vadd.f32 %v1030_v8, %v1028_v4  ;;  %v1100_v8 = vstv %s3053_s12 }
 0x276   :  { %s3454_s10 = sld [smem:[#allocation8 + $0x23]]  ;;  %v1035_v40 = vadd.f32 %v1034_v37, %v1033_v36 }
 0x277   :  { %4853 = sst [smem:[#allocation66_spill]] %s3442_s17  ;;  %v1036_v57 = vadd.f32 %v1031_v10, %v1026_v39 }
 0x278   :  { %s4858_s21 = sld [smem:[#allocation151_spill]]  ;;  %v1039_v61 = vstv %s4854_s23 }
 0x279   :  { %s4859_s17 = sld [smem:[#allocation48_spill]]  ;;  %v1041_v22 = vstv %s4855_s30  ;;  %v1040_v7 = vmul.f32 %v1039_v61, %v3337_v54  ;;  %v1037_v43 = vadd.f32 %v1036_v57, %v1035_v40 }
 0x27a   :  { %s3459_s9 = sld [smem:[#allocation7 + $0xee]]  ;;  %v1044_v60 = vstv %s4856_s4  ;;  %v1042_v62 = vmul.f32 %v1041_v22, %v3343_v44  ;;  %v1051_v44 = vstv %s3437_s11 }
 0x27b   :  { %4857 = sst [smem:[#allocation71_spill]] %s3449_s22  ;;  %v1045_v46 = vmul.f32 %v1044_v60, %v3359_v59  ;;  %v1061_v59 = vstv %s2944_s3  ;;  %v3496_v12 = vmax.f32 %v1037_v43, 0.0 }
 0x27c   :  { %s3464_s22 = sld [smem:[#allocation7 + $0xef]]  ;;  %v1043_v47 = vadd.f32 %v1042_v62, %v1040_v7  ;;  %v1062_v51 = vmul.f32 %v1061_v59, %v3470_v42  ;;  %v1068_v15 = vstv %s3454_s10 }
 0x27d   :  { %s4860_s19 = sld [smem:[#allocation34_spill]]  ;;  %v1064_v18 = vmul.f32 %v1063_v5, %v3496_v12  ;;  %v1081_v19 = vmul.f32 %v1080_v55, %v3496_v12  ;;  %v1098_v39 = vmul.f32 %v1097_v3, %v3496_v12  ;;  %v1126_v5 = vstv %s2937_s8 }
 0x27e   :  { %s3468_s28 = sld [smem:[#allocation8 + $0x24]]  ;;  %v1046_v24 = vstv %s4858_s21 }
 0x27f   :  { %v1049_v56 = vstv %s4859_s17  ;;  %s3475_s13 = sld [smem:[#allocation7 + $0xf0]]  ;;  %v1047_v52 = vmul.f32 %v1046_v24, %v3385_v21  ;;  %v1065_v58 = vadd.f32 %v1064_v18, %v1062_v51  ;;  %v1082_v41 = vadd.f32 %v1081_v19, %v1079_v25 }
 0x280   :  { %v1050_v54 = vmul.f32 %v1049_v56, %v3406_v48  ;;  %s3479_s4 = sld [smem:[#allocation7 + $0xf1]]  ;;  %v1059_v48 = vmul.f32 %v1058_v23, %v3446_v0  ;;  %v1099_v60 = vadd.f32 %v1098_v39, %v1096_v11 }
 0x281   :  { %s4861_s23 = sld [smem:[#allocation39_spill]]  ;;  %v1048_v49 = vadd.f32 %v1047_v52, %v1045_v46  ;;  %v1114_v52 = vstv %s3021_s1 }
 0x282   :  { %s3485_s30 = sld [smem:[#allocation7 + $0xf2]]  ;;  %v1052_v2 = vadd.f32 %v1051_v44, %v1050_v54  ;;  %v1115_v43 = vmul.f32 %v1114_v52, %v3496_v12 }
 0x283   :  { %v1056_v1 = vstv %s4860_s19  ;;  %s3488_s17 = sld [smem:[#allocation7 + $0xf3]]  ;;  %v1053_v6 = vadd.f32 %v1048_v49, %v1043_v47  ;;  %v1112_v47 = vstv %s2975_s26  ;;  %v1117_v49 = vstv %s3058_s27 }
 0x284   :  { %v1057_v21 = vmul.f32 %v1056_v1, %v3444_v13  ;;  %s3494_s0 = sld [smem:[#allocation7 + $0xf4]]  ;;  %v1085_v27 = vstv %s3468_s28  ;;  %v1113_v23 = vmul.f32 %v1112_v47, %v3470_v42 }
 0x285   :  { %s4862_s3 = sld [smem:[#allocation44_spill]]  ;;  %v1054_v50 = vadd.f32 %v1053_v6, %v1052_v2 }
 0x286   :  { %s3500_s11 = sld [smem:[#allocation8 + $0x25]]  ;;  %v1060_v31 = vadd.f32 %v1059_v48, %v1057_v21  ;;  %v1116_v6 = vadd.f32 %v1115_v43, %v1113_v23 }
 0x287   :  { %v1073_v26 = vstv %s4861_s23  ;;  %s3505_s2 = sld [smem:[#allocation7 + $0xf5]]  ;;  %v3518_v14 = vmax.f32 %v1054_v50, 0.0 }
 0x288   :  { %v1074_v17 = vmul.f32 %v1073_v26, %v3444_v13  ;;  %s4863_s25 = sld [smem:[#allocation45_spill]]  ;;  %v1070_v34 = vadd.f32 %v1065_v58, %v1060_v31  ;;  %v1127_v26 = vmul.f32 %v1126_v5, %v3446_v0 }
 0x289   :  { %s3510_s10 = sld [smem:[#allocation7 + $0xf6]]  ;;  %v1067_v33 = vmul.f32 %v1066_v53, %v3518_v14  ;;  %v1084_v4 = vmul.f32 %v1083_v29, %v3518_v14  ;;  %v1101_v61 = vmul.f32 %v1100_v8, %v3518_v14  ;;  %v1118_v48 = vmul.f32 %v1117_v49, %v3518_v14 }
 0x28a   :  { %s3516_s20 = sld [smem:[#allocation7 + $0xf7]]  ;;  %v1077_v28 = vadd.f32 %v1076_v38, %v1074_v17  ;;  %v1129_v17 = vstv %s2983_s5 }
 0x28b   :  { %v1090_v30 = vstv %s4862_s3  ;;  %s3521_s6 = sld [smem:[#allocation8 + $0x26]]  ;;  %v1069_v36 = vadd.f32 %v1068_v15, %v1067_v33  ;;  %v1086_v37 = vadd.f32 %v1085_v27, %v1084_v4  ;;  %v1130_v38 = vmul.f32 %v1129_v17, %v3470_v42 }
 0x28c   :  { %v1091_v20 = vmul.f32 %v1090_v30, %v3444_v13  ;;  %s3527_s7 = sld [smem:[#allocation7 + $0xf8]]  ;;  %v1087_v9 = vadd.f32 %v1082_v41, %v1077_v28  ;;  %v1102_v10 = vstv %s3500_s11 }
 0x28d   :  { %s4864_s24 = sld [smem:[#allocation35_spill]]  ;;  %v1071_v7 = vadd.f32 %v1070_v34, %v1069_v36  ;;  %v1103_v46 = vadd.f32 %v1102_v10, %v1101_v61 }
 0x28e   :  { %v1092_v32 = vstv %s4863_s25  ;;  %s3531_s21 = sld [smem:[#allocation7 + $0xf9]]  ;;  %v1088_v62 = vadd.f32 %v1087_v9, %v1086_v37 }
 0x28f   :  { %v1093_v35 = vmul.f32 %v1092_v32, %v3446_v0  ;;  %s3537_s29 = sld [smem:[#allocation7 + $0xfa]]  ;;  %v3554_v54 = vmax.f32 %v1071_v7, 0.0 }
 0x290   :  { %s4866_s14 = sld [smem:[#allocation50_spill]]  ;;  %v3556_v44 = vmax.f32 %v1088_v62, 0.0 }
 0x291   :  { %s3540_s19 = sld [smem:[#allocation7 + $0xfb]]  ;;  %v1094_v22 = vadd.f32 %v1093_v35, %v1091_v20  ;;  %v1119_v2 = vstv %s3521_s6 }
 0x292   :  { %s3544_s28 = sld [smem:[#allocation8 + $0x27]]  ;;  %v1120_v31 = vadd.f32 %v1119_v2, %v1118_v48 }
 0x293   :  { %v1107_v40 = vstv %s4864_s24  ;;  %s3547_s12 = sld [smem:[#allocation7 + $0xfc]]  ;;  %v1104_v56 = vadd.f32 %v1099_v60, %v1094_v22 }
 0x294   :  { %4865 = sst [smem:[#allocation76_spill]] %s3531_s21  ;;  %v1108_v24 = vmul.f32 %v1107_v40, %v3444_v13 }
 0x295   :  { %s4867_s23 = sld [smem:[#allocation40_spill]]  ;;  %v1105_v59 = vadd.f32 %v1104_v56, %v1103_v46 }
 0x296   :  { %v1109_v57 = vstv %s4866_s14  ;;  %s3552_s3 = sld [smem:[#allocation7 + $0xfd]] }
 0x297   :  { %v1110_v1 = vmul.f32 %v1109_v57, %v3446_v0  ;;  %s3560_s11 = sld [smem:[#allocation7 + $0xfe]]  ;;  %v3572_v53 = vmax.f32 %v1105_v59, 0.0 }
 0x298   :  { %s4869_s26 = sld [smem:[#allocation55_spill]]  ;;  %v1136_v25 = vstv %s3544_s28 }
 0x299   :  { %s3565_s1 = sld [smem:[#allocation8 + $0x28]]  ;;  %v1111_v21 = vadd.f32 %v1110_v1, %v1108_v24 }
 0x29a   :  { %s3570_s25 = sld [smem:[#allocation7 + $0xff]] }
 0x29b   :  { %v1124_v51 = vstv %s4867_s23  ;;  %s4871_s24 = sld [smem:[#allocation36_spill]]  ;;  %v1121_v50 = vadd.f32 %v1116_v6, %v1111_v21 }
 0x29c   :  { %v1125_v15 = vmul.f32 %v1124_v51, %v3444_v13  ;;  %s4872_s27 = sld [smem:[#allocation23_spill]]  ;;  %v1132_v13 = vmul.f32 %v1131_v16, %v3496_v12 }
 0x29d   :  { %4868 = sst [smem:[#allocation81_spill]] %s3560_s11  ;;  %v1122_v27 = vadd.f32 %v1121_v50, %v1120_v31 }
 0x29e   :  { %s3576_s6 = sld [smem:[#allocation8 + $0x29]]  ;;  %v1134_v45 = vstv %s4869_s26  ;;  %v1128_v18 = vadd.f32 %v1127_v26, %v1125_v15  ;;  %v1133_v30 = vadd.f32 %v1132_v13, %v1130_v38 }
 0x29f   :  { %s3581_s14 = sld [smem:[#allocation7 + $0x100]]  ;;  %v1135_v0 = vmul.f32 %v1134_v45, %v3518_v14  ;;  %v3602_v20 = vmax.f32 %v1122_v27, 0.0  ;;  %v1153_v33 = vstv %s3565_s1 }
 0x2a0   :  { %4870 = sst [smem:[#allocation82_spill]] %s3570_s25  ;;  %v1138_v32 = vadd.f32 %v1133_v30, %v1128_v18 }
 0x2a1   :  { %s4874_s8 = sld [smem:[#allocation20_spill]]  ;;  %v1141_v55 = vstv %s4871_s24  ;;  %v1137_v12 = vadd.f32 %v1136_v25, %v1135_v0 }
 0x2a2   :  { %s4875_s23 = sld [smem:[#allocation21_spill]]  ;;  %v1143_v29 = vstv %s4872_s27  ;;  %v1142_v58 = vmul.f32 %v1141_v55, %v3554_v54 }
 0x2a3   :  { %s4876_s25 = sld [smem:[#allocation22_spill]]  ;;  %v1144_v42 = vmul.f32 %v1143_v29, %v3556_v44  ;;  %v1139_v35 = vadd.f32 %v1138_v32, %v1137_v12 }
 0x2a4   :  { %s3585_s11 = sld [smem:[#allocation7 + $0x101]]  ;;  %v1170_v61 = vstv %s3576_s6 }
 0x2a5   :  { %4873 = sst [smem:[#allocation87_spill]] %s3581_s14  ;;  %v1145_v63 = vadd.f32 %v1144_v42, %v1142_v58  ;;  %v3624_v22 = vmax.f32 %v1139_v35, 0.0 }
 0x2a6   :  { %s3591_s5 = sld [smem:[#allocation7 + $0x102]] }
 0x2a7   :  { %s4879_s18 = sld [smem:[#allocation41_spill]]  ;;  %v1146_v28 = vstv %s4874_s8 }
 0x2a8   :  { %s4880_s26 = sld [smem:[#allocation27_spill]]  ;;  %v1148_v14 = vstv %s4875_s23  ;;  %v1147_v3 = vmul.f32 %v1146_v28, %v3572_v53 }
 0x2a9   :  { %s4881_s14 = sld [smem:[#allocation24_spill]]  ;;  %v1151_v19 = vstv %s4876_s25  ;;  %v1149_v11 = vmul.f32 %v1148_v14, %v3602_v20 }
 0x2aa   :  { %4877 = sst [smem:[#allocation92_spill]] %s3585_s11  ;;  %v1152_v56 = vmul.f32 %v1151_v19, %v3624_v22 }
 0x2ab   :  { %s3595_s21 = sld [smem:[#allocation7 + $0x103]]  ;;  %v1150_v60 = vadd.f32 %v1149_v11, %v1147_v3 }
 0x2ac   :  { %4878 = sst [smem:[#allocation97_spill]] %s3591_s5  ;;  %v1154_v49 = vadd.f32 %v1153_v33, %v1152_v56 }
 0x2ad   :  { %s3600_s28 = sld [smem:[#allocation7 + $0x104]]  ;;  %v1158_v34 = vstv %s4879_s18  ;;  %v1155_v57 = vadd.f32 %v1150_v60, %v1145_v63 }
 0x2ae   :  { %s4884_s24 = sld [smem:[#allocation25_spill]]  ;;  %v1160_v41 = vstv %s4880_s26  ;;  %v1159_v39 = vmul.f32 %v1158_v34, %v3554_v54 }
 0x2af   :  { %s4885_s27 = sld [smem:[#allocation26_spill]]  ;;  %v1163_v4 = vstv %s4881_s14  ;;  %v1161_v8 = vmul.f32 %v1160_v41, %v3556_v44  ;;  %v1156_v26 = vadd.f32 %v1155_v57, %v1154_v49 }
 0x2b0   :  { %s3605_s5 = sld [smem:[#allocation8 + $0x2a]]  ;;  %v1164_v36 = vmul.f32 %v1163_v4, %v3572_v53 }
 0x2b1   :  { %4882 = sst [smem:[#allocation102_spill]] %s3595_s21  ;;  %v1162_v10 = vadd.f32 %v1161_v8, %v1159_v39  ;;  %v3660_v13 = vmax.f32 %v1156_v26, 0.0 }
 0x2b2   :  { %s3611_s8 = sld [smem:[#allocation7 + $0x105]] }
 0x2b3   :  { %4883 = sst [smem:[#allocation83_spill]] %s3600_s28 }
 0x2b4   :  { %s4887_s25 = sld [smem:[#allocation46_spill]]  ;;  %v1165_v37 = vstv %s4884_s24 }
 0x2b5   :  { %s4888_s23 = sld [smem:[#allocation28_spill]]  ;;  %v1168_v9 = vstv %s4885_s27  ;;  %v1166_v40 = vmul.f32 %v1165_v37, %v3602_v20 }
 0x2b6   :  { %s4889_s21 = sld [smem:[#allocation29_spill]]  ;;  %v1169_v52 = vmul.f32 %v1168_v9, %v3624_v22  ;;  %v1187_v15 = vstv %s3605_s5 }
 0x2b7   :  { %s4890_s11 = sld [smem:[#allocation30_spill]]  ;;  %v1167_v47 = vadd.f32 %v1166_v40, %v1164_v36 }
 0x2b8   :  { %4886 = sst [smem:[#allocation88_spill]] %s3611_s8  ;;  %v1171_v2 = vadd.f32 %v1170_v61, %v1169_v52 }
 0x2b9   :  { %s3616_s28 = sld [smem:[#allocation7 + $0x106]]  ;;  %v1172_v21 = vadd.f32 %v1167_v47, %v1162_v10 }
 0x2ba   :  { %s3622_s1 = sld [smem:[#allocation7 + $0x107]]  ;;  %v1175_v7 = vstv %s4887_s25 }
 0x2bb   :  { %s3627_s14 = sld [smem:[#allocation7 + $0x108]]  ;;  %v1177_v62 = vstv %s4888_s23  ;;  %v1176_v1 = vmul.f32 %v1175_v7, %v3554_v54  ;;  %v1173_v31 = vadd.f32 %v1172_v21, %v1171_v2  ;;  %v1253_v21 = vstv %s3377_s15 }
 0x2bc   :  { %v1180_v46 = vstv %s4889_s21  ;;  %s4894_s18 = sld [smem:[#allocation31_spill]]  ;;  %v1178_v23 = vmul.f32 %v1177_v62, %v3556_v44 }
 0x2bd   :  { %v1182_v24 = vstv %s4890_s11  ;;  %s3633_s26 = sld [smem:[#allocation8 + $0x2b]]  ;;  %v1181_v59 = vmul.f32 %v1180_v46, %v3572_v53  ;;  %v3662_v0 = vmax.f32 %v1173_v31, 0.0 }
 0x2be   :  { %s3637_s6 = sld [smem:[#allocation7 + $0x109]]  ;;  %v1183_v43 = vmul.f32 %v1182_v24, %v3602_v20  ;;  %v1179_v51 = vadd.f32 %v1178_v23, %v1176_v1 }
 0x2bf   :  { %4891 = sst [smem:[#allocation93_spill]] %s3616_s28 }
 0x2c0   :  { %4892 = sst [smem:[#allocation98_spill]] %s3622_s1  ;;  %v1184_v5 = vadd.f32 %v1183_v43, %v1181_v59 }
 0x2c1   :  { %4893 = sst [smem:[#allocation103_spill]] %s3627_s14 }
 0x2c2   :  { %s4895_s24 = sld [smem:[#allocation51_spill]]  ;;  %v1185_v48 = vstv %s4894_s18  ;;  %v1189_v50 = vadd.f32 %v1184_v5, %v1179_v51 }
 0x2c3   :  { %s4896_s21 = sld [smem:[#allocation14_spill]]  ;;  %v1186_v6 = vmul.f32 %v1185_v48, %v3624_v22  ;;  %v1204_v12 = vstv %s3633_s26 }
 0x2c4   :  { %s3643_s11 = sld [smem:[#allocation7 + $0x10a]] }
 0x2c5   :  { %s3646_s27 = sld [smem:[#allocation7 + $0x10b]]  ;;  %v1188_v45 = vadd.f32 %v1187_v15, %v1186_v6 }
 0x2c6   :  { %s4899_s25 = sld [smem:[#allocation15_spill]] }
 0x2c7   :  { %s4900_s23 = sld [smem:[#allocation16_spill]]  ;;  %v1190_v29 = vadd.f32 %v1189_v50, %v1188_v45 }
 0x2c8   :  { %s3650_s14 = sld [smem:[#allocation8 + $0x2c]]  ;;  %v1192_v17 = vstv %s4895_s24 }
 0x2c9   :  { %v1194_v16 = vstv %s4896_s21  ;;  %s3654_s1 = sld [smem:[#allocation7 + $0x10c]]  ;;  %v1193_v18 = vmul.f32 %v1192_v17, %v3554_v54  ;;  %v3678_v19 = vmax.f32 %v1190_v29, 0.0 }
 0x2ca   :  { %4897 = sst [smem:[#allocation84_spill]] %s3643_s11  ;;  %v1195_v38 = vmul.f32 %v1194_v16, %v3556_v44 }
 0x2cb   :  { %4898 = sst [smem:[#allocation89_spill]] %s3646_s27 }
 0x2cc   :  { %s4902_s28 = sld [smem:[#allocation37_spill]]  ;;  %v1197_v25 = vstv %s4899_s25  ;;  %v1196_v27 = vadd.f32 %v1195_v38, %v1193_v18 }
 0x2cd   :  { %s4903_s18 = sld [smem:[#allocation56_spill]]  ;;  %v1199_v55 = vstv %s4900_s23  ;;  %v1198_v30 = vmul.f32 %v1197_v25, %v3572_v53 }
 0x2ce   :  { %s4904_s27 = sld [smem:[#allocation17_spill]]  ;;  %v1200_v58 = vmul.f32 %v1199_v55, %v3602_v20 }
 0x2cf   :  { %4901 = sst [smem:[#allocation94_spill]] %s3654_s1 }
 0x2d0   :  { %s3658_s11 = sld [smem:[#allocation7 + $0x10d]]  ;;  %v1201_v32 = vadd.f32 %v1200_v58, %v1198_v30 }
 0x2d1   :  { %s3666_s5 = sld [smem:[#allocation7 + $0x10e]] }
 0x2d2   :  { %s4907_s24 = sld [smem:[#allocation18_spill]]  ;;  %v1202_v42 = vstv %s4902_s28  ;;  %v1206_v11 = vadd.f32 %v1201_v32, %v1196_v27 }
 0x2d3   :  { %s4908_s21 = sld [smem:[#allocation19_spill]]  ;;  %v1209_v28 = vstv %s4903_s18  ;;  %v1203_v63 = vmul.f32 %v1202_v42, %v3624_v22 }
 0x2d4   :  { %s4909_s1 = sld [smem:[#allocation42_spill]]  ;;  %v1211_v14 = vstv %s4904_s27  ;;  %v1210_v3 = vmul.f32 %v1209_v28, %v3554_v54 }
 0x2d5   :  { %s3670_s8 = sld [smem:[#allocation8 + $0x2d]]  ;;  %v1212_v33 = vmul.f32 %v1211_v14, %v3556_v44  ;;  %v1205_v35 = vadd.f32 %v1204_v12, %v1203_v63  ;;  %v1221_v44 = vstv %s3650_s14  ;;  %v1270_v12 = vstv %s3383_s16 }
 0x2d6   :  { %4905 = sst [smem:[#allocation99_spill]] %s3658_s11 }
 0x2d7   :  { %4906 = sst [smem:[#allocation104_spill]] %s3666_s5  ;;  %v1213_v54 = vadd.f32 %v1212_v33, %v1210_v3  ;;  %v1207_v9 = vadd.f32 %v1206_v11, %v1205_v35 }
 0x2d8   :  { %s3676_s11 = sld [smem:[#allocation7 + $0x10f]]  ;;  %v1214_v34 = vstv %s4907_s24 }
 0x2d9   :  { %s4911_s25 = sld [smem:[#allocation33_spill]]  ;;  %v1216_v41 = vstv %s4908_s21  ;;  %v1215_v39 = vmul.f32 %v1214_v34, %v3572_v53  ;;  %v3708_v7 = vmax.f32 %v1207_v9, 0.0 }
 0x2da   :  { %s3682_s23 = sld [smem:[#allocation8 + $0x2e]]  ;;  %v1219_v4 = vstv %s4909_s1  ;;  %v1217_v8 = vmul.f32 %v1216_v41, %v3602_v20 }
 0x2db   :  { %s4912_s28 = sld [smem:[#allocation52_spill]]  ;;  %v1220_v36 = vmul.f32 %v1219_v4, %v3624_v22  ;;  %v1238_v57 = vstv %s3670_s8 }
 0x2dc   :  { %s3688_s26 = sld [smem:[#allocation7 + $0x110]]  ;;  %v1218_v61 = vadd.f32 %v1217_v8, %v1215_v39 }
 0x2dd   :  { %s4914_s27 = sld [smem:[#allocation67_spill]]  ;;  %v1222_v20 = vadd.f32 %v1221_v44, %v1220_v36 }
 0x2de   :  { %4910 = sst [smem:[#allocation85_spill]] %s3676_s11  ;;  %v1223_v62 = vadd.f32 %v1218_v61, %v1213_v54 }
 0x2df   :  { %s4915_s18 = sld [smem:[#allocation68_spill]]  ;;  %v1226_v37 = vstv %s4911_s25 }
 0x2e0   :  { %s3692_s11 = sld [smem:[#allocation7 + $0x111]]  ;;  %v1227_v60 = vmul.f32 %v1226_v37, %v3660_v13  ;;  %v1224_v1 = vadd.f32 %v1223_v62, %v1222_v20  ;;  %v1255_v48 = vstv %s3682_s23 }
 0x2e1   :  { %s4917_s24 = sld [smem:[#allocation69_spill]]  ;;  %v1228_v53 = vstv %s4912_s28 }
 0x2e2   :  { %4913 = sst [smem:[#allocation90_spill]] %s3688_s26  ;;  %v1229_v10 = vmul.f32 %v1228_v53, %v3662_v0  ;;  %v3730_v51 = vmax.f32 %v1224_v1, 0.0 }
 0x2e3   :  { %s3697_s21 = sld [smem:[#allocation7 + $0x112]]  ;;  %v1231_v40 = vstv %s4914_s27 }
 0x2e4   :  { %s4919_s1 = sld [smem:[#allocation38_spill]]  ;;  %v1232_v46 = vmul.f32 %v1231_v40, %v3678_v19  ;;  %v1230_v56 = vadd.f32 %v1229_v10, %v1227_v60  ;;  %v1254_v18 = vmul.f32 %v1253_v21, %v3730_v51  ;;  %v1271_v32 = vmul.f32 %v1270_v12, %v3730_v51 }
 0x2e5   :  { %s4920_s26 = sld [smem:[#allocation53_spill]]  ;;  %v1233_v22 = vstv %s4915_s18  ;;  %v1338_v12 = vstv %s3540_s19 }
 0x2e6   :  { %4916 = sst [smem:[#allocation95_spill]] %s3692_s11  ;;  %v1234_v23 = vmul.f32 %v1233_v22, %v3708_v7  ;;  %v1256_v58 = vadd.f32 %v1255_v48, %v1254_v18 }
 0x2e7   :  { %s3701_s5 = sld [smem:[#allocation7 + $0x113]]  ;;  %v1236_v24 = vstv %s4917_s24 }
 0x2e8   :  { %s3706_s14 = sld [smem:[#allocation7 + $0x114]]  ;;  %v1235_v5 = vadd.f32 %v1234_v23, %v1232_v46  ;;  %v1237_v45 = vmul.f32 %v1236_v24, %v3730_v51 }
 0x2e9   :  { %4918 = sst [smem:[#allocation100_spill]] %s3697_s21 }
 0x2ea   :  { %s4923_s25 = sld [smem:[#allocation72_spill]]  ;;  %v1243_v47 = vstv %s4919_s1  ;;  %v1240_v50 = vadd.f32 %v1235_v5, %v1230_v56  ;;  %v1239_v30 = vadd.f32 %v1238_v57, %v1237_v45 }
 0x2eb   :  { %s4924_s21 = sld [smem:[#allocation73_spill]]  ;;  %v1245_v52 = vstv %s4920_s26  ;;  %v1244_v59 = vmul.f32 %v1243_v47, %v3660_v13 }
 0x2ec   :  { %s3712_s28 = sld [smem:[#allocation8 + $0x2f]]  ;;  %v1246_v43 = vmul.f32 %v1245_v52, %v3662_v0  ;;  %v1241_v3 = vadd.f32 %v1240_v50, %v1239_v30 }
 0x2ed   :  { %4921 = sst [smem:[#allocation105_spill]] %s3701_s5 }
 0x2ee   :  { %4922 = sst [smem:[#allocation86_spill]] %s3706_s14  ;;  %v1247_v6 = vadd.f32 %v1246_v43, %v1244_v59  ;;  %v3767_v8 = vmax.f32 %v1241_v3, 0.0 }
 0x2ef   :  { %s3717_s27 = sld [smem:[#allocation7 + $0x115]] }
 0x2f0   :  { %s4925_s18 = sld [smem:[#allocation43_spill]]  ;;  %v1248_v49 = vstv %s4923_s25 }
 0x2f1   :  { %s4926_s11 = sld [smem:[#allocation54_spill]]  ;;  %v1250_v2 = vstv %s4924_s21  ;;  %v1249_v15 = vmul.f32 %v1248_v49, %v3678_v19 }
 0x2f2   :  { %s4927_s14 = sld [smem:[#allocation77_spill]]  ;;  %v1251_v26 = vmul.f32 %v1250_v2, %v3708_v7  ;;  %v1272_v63 = vstv %s3712_s28 }
 0x2f3   :  { %s3722_s5 = sld [smem:[#allocation7 + $0x116]]  ;;  %v1273_v35 = vadd.f32 %v1272_v63, %v1271_v32 }
 0x2f4   :  { %s3728_s8 = sld [smem:[#allocation7 + $0x117]]  ;;  %v1252_v25 = vadd.f32 %v1251_v26, %v1249_v15  ;;  %v1318_v15 = vstv %s3505_s2  ;;  %v1321_v26 = vstv %s3537_s29 }
 0x2f5   :  { %s4928_s26 = sld [smem:[#allocation78_spill]] }
 0x2f6   :  { %s3733_s24 = sld [smem:[#allocation7 + $0x118]]  ;;  %v1260_v31 = vstv %s4925_s18  ;;  %v1257_v28 = vadd.f32 %v1252_v25, %v1247_v6  ;;  %v1316_v6 = vstv %s3475_s13 }
 0x2f7   :  { %v1262_v17 = vstv %s4926_s11  ;;  %s3739_s21 = sld [smem:[#allocation8 + $0x30]]  ;;  %v1261_v38 = vmul.f32 %v1260_v31, %v3660_v13 }
 0x2f8   :  { %v1265_v16 = vstv %s4927_s14  ;;  %s3744_s15 = sld [smem:[#allocation7 + $0x119]]  ;;  %v1263_v55 = vmul.f32 %v1262_v17, %v3662_v0  ;;  %v1258_v4 = vadd.f32 %v1257_v28, %v1256_v58  ;;  %v1333_v58 = vstv %s3479_s4 }
 0x2f9   :  { %s4931_s23 = sld [smem:[#allocation47_spill]]  ;;  %v1266_v29 = vmul.f32 %v1265_v16, %v3678_v19 }
 0x2fa   :  { %s4932_s11 = sld [smem:[#allocation57_spill]]  ;;  %v1264_v14 = vadd.f32 %v1263_v55, %v1261_v38  ;;  %v3773_v37 = vmax.f32 %v1258_v4, 0.0 }
 0x2fb   :  { %v1267_v27 = vstv %s4928_s26  ;;  %s3749_s1 = sld [smem:[#allocation7 + $0x11a]] }
 0x2fc   :  { %4929 = sst [smem:[#allocation91_spill]] %s3733_s24  ;;  %v1268_v42 = vmul.f32 %v1267_v27, %v3708_v7 }
 0x2fd   :  { %s3753_s14 = sld [smem:[#allocation7 + $0x11b]]  ;;  %v1289_v10 = vstv %s3739_s21 }
 0x2fe   :  { %4930 = sst [smem:[#allocation96_spill]] %s3744_s15  ;;  %v1269_v33 = vadd.f32 %v1268_v42, %v1266_v29  ;;  %v1335_v42 = vstv %s3510_s10 }
 0x2ff   :  { %s4935_s25 = sld [smem:[#allocation58_spill]]  ;;  %v1277_v34 = vstv %s4931_s23 }
 0x300   :  { %s4936_s18 = sld [smem:[#allocation59_spill]]  ;;  %v1279_v41 = vstv %s4932_s11  ;;  %v1278_v11 = vmul.f32 %v1277_v34, %v3660_v13  ;;  %v1274_v54 = vadd.f32 %v1269_v33, %v1264_v14 }
 0x301   :  { %4933 = sst [smem:[#allocation101_spill]] %s3749_s1  ;;  %v1280_v39 = vmul.f32 %v1279_v41, %v3662_v0 }
 0x302   :  { %s3757_s15 = sld [smem:[#allocation8 + $0x31]]  ;;  %v1275_v53 = vadd.f32 %v1274_v54, %v1273_v35 }
 0x303   :  { %4934 = sst [smem:[#allocation106_spill]] %s3753_s14  ;;  %v1281_v9 = vadd.f32 %v1280_v39, %v1278_v11 }
 0x304   :  { %s3761_s26 = sld [smem:[#allocation7 + $0x11c]]  ;;  %v3789_v56 = vmax.f32 %v1275_v53, 0.0 }
 0x305   :  { %s4938_s1 = sld [smem:[#allocation74_spill]]  ;;  %v1282_v36 = vstv %s4935_s25 }
 0x306   :  { %s4939_s16 = sld [smem:[#allocation49_spill]]  ;;  %v1284_v44 = vstv %s4936_s18  ;;  %v1283_v61 = vmul.f32 %v1282_v36, %v3678_v19  ;;  %v1317_v45 = vmul.f32 %v1316_v6, %v3789_v56  ;;  %v1334_v32 = vmul.f32 %v1333_v58, %v3789_v56 }
 0x307   :  { %s3765_s14 = sld [smem:[#allocation7 + $0x11d]]  ;;  %v1285_v60 = vmul.f32 %v1284_v44, %v3708_v7  ;;  %v1350_v44 = vstv %s3485_s30 }
 0x308   :  { %s4941_s28 = sld [smem:[#allocation62_spill]]  ;;  %v1306_v2 = vstv %s3757_s15 }
 0x309   :  { %s3771_s23 = sld [smem:[#allocation7 + $0x11e]]  ;;  %v1286_v22 = vadd.f32 %v1285_v60, %v1283_v61 }
 0x30a   :  { %4937 = sst [smem:[#allocation107_spill]] %s3761_s26 }
 0x30b   :  { %s4943_s11 = sld [smem:[#allocation63_spill]]  ;;  %v1287_v20 = vstv %s4938_s1  ;;  %v1291_v23 = vadd.f32 %v1286_v22, %v1281_v9  ;;  %v1352_v9 = vstv %s3516_s20  ;;  %v1355_v22 = vstv %s3547_s12 }
 0x30c   :  { %s4944_s26 = sld [smem:[#allocation64_spill]]  ;;  %v1294_v40 = vstv %s4939_s16  ;;  %v1288_v62 = vmul.f32 %v1287_v20, %v3730_v51  ;;  %v1351_v20 = vmul.f32 %v1350_v44, %v3789_v56 }
 0x30d   :  { %4940 = sst [smem:[#allocation112_spill]] %s3765_s14  ;;  %v1295_v46 = vmul.f32 %v1294_v40, %v3660_v13 }
 0x30e   :  { %s3777_s24 = sld [smem:[#allocation8 + $0x32]]  ;;  %v1296_v24 = vstv %s4941_s28  ;;  %v1290_v1 = vadd.f32 %v1289_v10, %v1288_v62 }
 0x30f   :  { %4942 = sst [smem:[#allocation117_spill]] %s3771_s23  ;;  %v1297_v57 = vmul.f32 %v1296_v24, %v3662_v0 }
 0x310   :  { %s3782_s25 = sld [smem:[#allocation7 + $0x11f]]  ;;  %v1292_v21 = vadd.f32 %v1291_v23, %v1290_v1  ;;  %v1364_v23 = vstv %s3459_s9 }
 0x311   :  { %s4945_s18 = sld [smem:[#allocation79_spill]]  ;;  %v1299_v47 = vstv %s4943_s11  ;;  %v1298_v43 = vadd.f32 %v1297_v57, %v1295_v46 }
 0x312   :  { %s4946_s23 = sld [smem:[#allocation60_spill]]  ;;  %v1301_v52 = vstv %s4944_s26  ;;  %v1300_v59 = vmul.f32 %v1299_v47, %v3678_v19  ;;  %v3815_v31 = vmax.f32 %v1292_v21, 0.0 }
 0x313   :  { %s3787_s14 = sld [smem:[#allocation7 + $0x120]]  ;;  %v1302_v13 = vmul.f32 %v1301_v52, %v3708_v7 }
 0x314   :  { %s3794_s21 = sld [smem:[#allocation7 + $0x121]]  ;;  %v1323_v50 = vstv %s3777_s24  ;;  %v1319_v29 = vmul.f32 %v1318_v15, %v3815_v31  ;;  %v1336_v63 = vmul.f32 %v1335_v42, %v3815_v31  ;;  %v1353_v40 = vmul.f32 %v1352_v9, %v3815_v31 }
 0x315   :  { %s4948_s1 = sld [smem:[#allocation61_spill]]  ;;  %v1303_v48 = vadd.f32 %v1302_v13, %v1300_v59  ;;  %v1367_v59 = vstv %s3488_s17 }
 0x316   :  { %s3798_s16 = sld [smem:[#allocation8 + $0x33]]  ;;  %v1320_v14 = vadd.f32 %v1319_v29, %v1317_v45  ;;  %v1337_v11 = vadd.f32 %v1336_v63, %v1334_v32  ;;  %v1354_v52 = vadd.f32 %v1353_v40, %v1351_v20  ;;  %v1368_v21 = vmul.f32 %v1367_v59, %v3789_v56 }
 0x317   :  { %v1304_v49 = vstv %s4945_s18  ;;  %s3803_s28 = sld [smem:[#allocation7 + $0x122]]  ;;  %v1308_v16 = vadd.f32 %v1303_v48, %v1298_v43  ;;  %v1369_v48 = vstv %s3527_s7 }
 0x318   :  { %v1311_v0 = vstv %s4946_s23  ;;  %s4949_s26 = sld [smem:[#allocation65_spill]]  ;;  %v1305_v5 = vmul.f32 %v1304_v49, %v3730_v51 }
 0x319   :  { %s4950_s11 = sld [smem:[#allocation66_spill]]  ;;  %v1312_v19 = vmul.f32 %v1311_v0, %v3767_v8 }
 0x31a   :  { %4947 = sst [smem:[#allocation122_spill]] %s3794_s21  ;;  %v1307_v17 = vadd.f32 %v1306_v2, %v1305_v5  ;;  %v1365_v2 = vmul.f32 %v1364_v23, %v3773_v37  ;;  %v1372_v5 = vstv %s3552_s3 }
 0x31b   :  { %s3807_s21 = sld [smem:[#allocation7 + $0x123]]  ;;  %v1313_v7 = vstv %s4948_s1 }
 0x31c   :  { %s3813_s18 = sld [smem:[#allocation7 + $0x124]]  ;;  %v1314_v51 = vmul.f32 %v1313_v7, %v3773_v37  ;;  %v1309_v25 = vadd.f32 %v1308_v16, %v1307_v17  ;;  %v1340_v33 = vstv %s3798_s16  ;;  %v1370_v7 = vmul.f32 %v1369_v48, %v3815_v31 }
 0x31d   :  { %s3818_s15 = sld [smem:[#allocation8 + $0x34]]  ;;  %v1381_v16 = vstv %s3464_s22 }
 0x31e   :  { %v1328_v18 = vstv %s4949_s26  ;;  %s3824_s13 = sld [smem:[#allocation7 + $0x125]]  ;;  %v1315_v55 = vadd.f32 %v1314_v51, %v1312_v19  ;;  %v3836_v28 = vmax.f32 %v1309_v25, 0.0  ;;  %v1384_v51 = vstv %s3494_s0 }
 0x31f   :  { %v1330_v38 = vstv %s4950_s11  ;;  %s4951_s2 = sld [smem:[#allocation70_spill]]  ;;  %v1329_v27 = vmul.f32 %v1328_v18, %v3767_v8  ;;  %v1371_v45 = vadd.f32 %v1370_v7, %v1368_v21  ;;  %v1440_v7 = vstv %s3717_s27 }
 0x320   :  { %s4952_s29 = sld [smem:[#allocation71_spill]]  ;;  %v1331_v30 = vmul.f32 %v1330_v38, %v3773_v37  ;;  %v1322_v4 = vmul.f32 %v1321_v26, %v3836_v28  ;;  %v1325_v35 = vadd.f32 %v1320_v14, %v1315_v55  ;;  %v1339_v39 = vmul.f32 %v1338_v12, %v3836_v28 }
 0x321   :  { %s3828_s23 = sld [smem:[#allocation7 + $0x126]]  ;;  %v1356_v57 = vmul.f32 %v1355_v22, %v3836_v28  ;;  %v1373_v6 = vmul.f32 %v1372_v5, %v3836_v28  ;;  %v1382_v38 = vmul.f32 %v1381_v16, %v3773_v37  ;;  %v1385_v55 = vmul.f32 %v1384_v51, %v3789_v56 }
 0x322   :  { %s3834_s24 = sld [smem:[#allocation7 + $0x127]]  ;;  %v1332_v3 = vadd.f32 %v1331_v30, %v1329_v27  ;;  %v1324_v61 = vadd.f32 %v1323_v50, %v1322_v4  ;;  %v1341_v60 = vadd.f32 %v1340_v33, %v1339_v39  ;;  %v1401_v56 = vstv %s3637_s6 }
 0x323   :  { %s3840_s1 = sld [smem:[#allocation7 + $0x128]]  ;;  %v1357_v62 = vstv %s3818_s15 }
 0x324   :  { %s3845_s4 = sld [smem:[#allocation8 + $0x35]]  ;;  %v1342_v53 = vadd.f32 %v1337_v11, %v1332_v3  ;;  %v1326_v46 = vadd.f32 %v1325_v35, %v1324_v61  ;;  %v1358_v49 = vadd.f32 %v1357_v62, %v1356_v57 }
 0x325   :  { %v1345_v34 = vstv %s4951_s2  ;;  %s3849_s10 = sld [smem:[#allocation7 + $0x129]] }
 0x326   :  { %v1347_v41 = vstv %s4952_s29  ;;  %v1346_v54 = vmul.f32 %v1345_v34, %v3767_v8  ;;  %s4954_s19 = sld [smem:[#allocation75_spill]]  ;;  %v1343_v24 = vadd.f32 %v1342_v53, %v1341_v60  ;;  %v3874_v13 = vmax.f32 %v1326_v46, 0.0 }
 0x327   :  { %4953 = sst [smem:[#allocation127_spill]] %s3828_s23  ;;  %v1348_v36 = vmul.f32 %v1347_v41, %v3773_v37 }
 0x328   :  { %s3855_s16 = sld [smem:[#allocation7 + $0x12a]]  ;;  %v3876_v43 = vmax.f32 %v1343_v24, 0.0 }
 0x329   :  { %s3858_s26 = sld [smem:[#allocation7 + $0x12b]]  ;;  %v1349_v10 = vadd.f32 %v1348_v36, %v1346_v54 }
 0x32a   :  { %s3863_s11 = sld [smem:[#allocation7 + $0x12c]]  ;;  %v1374_v15 = vstv %s3845_s4 }
 0x32b   :  { %s3867_s30 = sld [smem:[#allocation8 + $0x36]]  ;;  %v1359_v0 = vadd.f32 %v1354_v52, %v1349_v10  ;;  %v1375_v50 = vadd.f32 %v1374_v15, %v1373_v6 }
 0x32c   :  { %v1362_v47 = vstv %s4954_s19  ;;  %s3872_s20 = sld [smem:[#allocation7 + $0x12d]] }
 0x32d   :  { %v1363_v1 = vmul.f32 %v1362_v47, %v3767_v8  ;;  %s4956_s12 = sld [smem:[#allocation80_spill]]  ;;  %v1360_v26 = vadd.f32 %v1359_v0, %v1358_v49 }
 0x32e   :  { %s3879_s15 = sld [smem:[#allocation7 + $0x12e]] }
 0x32f   :  { %4955 = sst [smem:[#allocation108_spill]] %s3858_s26  ;;  %v1366_v19 = vadd.f32 %v1365_v2, %v1363_v1  ;;  %v3900_v25 = vmax.f32 %v1360_v26, 0.0 }
 0x330   :  { %s3884_s9 = sld [smem:[#allocation8 + $0x37]] }
 0x331   :  { %s4957_s17 = sld [smem:[#allocation76_spill]]  ;;  %v1376_v30 = vadd.f32 %v1371_v45, %v1366_v19  ;;  %v1391_v37 = vstv %s3867_s30  ;;  %v1402_v33 = vmul.f32 %v1401_v56, %v3900_v25 }
 0x332   :  { %s4958_s2 = sld [smem:[#allocation81_spill]] }
 0x333   :  { %s3889_s29 = sld [smem:[#allocation7 + $0x12f]]  ;;  %v1379_v17 = vstv %s4956_s12  ;;  %v1377_v32 = vadd.f32 %v1376_v30, %v1375_v50 }
 0x334   :  { %s3894_s19 = sld [smem:[#allocation7 + $0x130]]  ;;  %v1380_v18 = vmul.f32 %v1379_v17, %v3767_v8 }
 0x335   :  { %s4960_s7 = sld [smem:[#allocation82_spill]]  ;;  %v3926_v4 = vmax.f32 %v1377_v32, 0.0 }
 0x336   :  { %s4961_s3 = sld [smem:[#allocation83_spill]]  ;;  %v1383_v58 = vadd.f32 %v1382_v38, %v1380_v18  ;;  %v1408_v11 = vstv %s3884_s9 }
 0x337   :  { %s3898_s26 = sld [smem:[#allocation8 + $0x38]]  ;;  %v1386_v29 = vstv %s4957_s17 }
 0x338   :  { %v1389_v27 = vstv %s4958_s2  ;;  %s3905_s22 = sld [smem:[#allocation7 + $0x131]]  ;;  %v1387_v42 = vmul.f32 %v1386_v29, %v3815_v31 }
 0x339   :  { %s4963_s0 = sld [smem:[#allocation104_spill]]  ;;  %v1390_v8 = vmul.f32 %v1389_v27, %v3836_v28 }
 0x33a   :  { %4959 = sst [smem:[#allocation113_spill]] %s3894_s19  ;;  %v1388_v63 = vadd.f32 %v1387_v42, %v1385_v55 }
 0x33b   :  { %s4964_s4 = sld [smem:[#allocation105_spill]]  ;;  %v1396_v12 = vstv %s4960_s7  ;;  %v1392_v3 = vadd.f32 %v1391_v37, %v1390_v8 }
 0x33c   :  { %s3909_s12 = sld [smem:[#allocation7 + $0x132]]  ;;  %v1398_v14 = vstv %s4961_s3  ;;  %v1397_v31 = vmul.f32 %v1396_v12, %v3874_v13  ;;  %v1393_v35 = vadd.f32 %v1388_v63, %v1383_v58  ;;  %v1457_v63 = vstv %s3722_s5 }
 0x33d   :  { %s4965_s19 = sld [smem:[#allocation87_spill]]  ;;  %v1399_v28 = vmul.f32 %v1398_v14, %v3876_v43  ;;  %v1425_v22 = vstv %s3898_s26 }
 0x33e   :  { %4962 = sst [smem:[#allocation118_spill]] %s3905_s22  ;;  %v1394_v61 = vadd.f32 %v1393_v35, %v1392_v3 }
 0x33f   :  { %s3915_s17 = sld [smem:[#allocation7 + $0x133]]  ;;  %v1403_v34 = vstv %s4963_s0  ;;  %v1400_v54 = vadd.f32 %v1399_v28, %v1397_v31 }
 0x340   :  { %s4967_s2 = sld [smem:[#allocation88_spill]]  ;;  %v1404_v60 = vmul.f32 %v1403_v34, %v3926_v4  ;;  %v3948_v46 = vmax.f32 %v1394_v61, 0.0 }
 0x341   :  { %s4968_s22 = sld [smem:[#allocation84_spill]]  ;;  %v1406_v41 = vstv %s4964_s4 }
 0x342   :  { %s3918_s23 = sld [smem:[#allocation7 + $0x134]]  ;;  %v1405_v24 = vadd.f32 %v1404_v60, %v1402_v33  ;;  %v1407_v49 = vmul.f32 %v1406_v41, %v3948_v46  ;;  %v1441_v17 = vmul.f32 %v1440_v7, %v3948_v46  ;;  %v1458_v28 = vmul.f32 %v1457_v63, %v3948_v46 }
 0x343   :  { %s3924_s30 = sld [smem:[#allocation7 + $0x135]]  ;;  %v1413_v39 = vstv %s4965_s19 }
 0x344   :  { %s4971_s6 = sld [smem:[#allocation85_spill]]  ;;  %v1414_v36 = vmul.f32 %v1413_v39, %v3874_v13  ;;  %v1410_v2 = vadd.f32 %v1405_v24, %v1400_v54  ;;  %v1409_v6 = vadd.f32 %v1408_v11, %v1407_v49 }
 0x345   :  { %4966 = sst [smem:[#allocation123_spill]] %s3915_s17 }
 0x346   :  { %s4972_s7 = sld [smem:[#allocation86_spill]]  ;;  %v1415_v44 = vstv %s4967_s2  ;;  %v1411_v18 = vadd.f32 %v1410_v2, %v1409_v6 }
 0x347   :  { %s4973_s3 = sld [smem:[#allocation92_spill]]  ;;  %v1418_v9 = vstv %s4968_s22  ;;  %v1416_v53 = vmul.f32 %v1415_v44, %v3876_v43 }
 0x348   :  { %4969 = sst [smem:[#allocation128_spill]] %s3918_s23  ;;  %v1419_v20 = vmul.f32 %v1418_v9, %v3900_v25  ;;  %v3984_v8 = vmax.f32 %v1411_v18, 0.0  ;;  %v1474_v9 = vstv %s3728_s8 }
 0x349   :  { %4970 = sst [smem:[#allocation109_spill]] %s3924_s30  ;;  %v1417_v57 = vadd.f32 %v1416_v53, %v1414_v36 }
 0x34a   :  { %s3930_s17 = sld [smem:[#allocation8 + $0x39]]  ;;  %v1420_v10 = vstv %s4971_s6 }
 0x34b   :  { %s3935_s0 = sld [smem:[#allocation7 + $0x136]]  ;;  %v1421_v47 = vmul.f32 %v1420_v10, %v3926_v4 }
 0x34c   :  { %s4974_s4 = sld [smem:[#allocation93_spill]]  ;;  %v1423_v40 = vstv %s4972_s7 }
 0x34d   :  { %s4975_s30 = sld [smem:[#allocation89_spill]]  ;;  %v1430_v62 = vstv %s4973_s3  ;;  %v1422_v0 = vadd.f32 %v1421_v47, %v1419_v20  ;;  %v1424_v21 = vmul.f32 %v1423_v40, %v3948_v46  ;;  %v1491_v47 = vstv %s3863_s11 }
 0x34e   :  { %s4976_s9 = sld [smem:[#allocation90_spill]]  ;;  %v1431_v52 = vmul.f32 %v1430_v62, %v3874_v13 }
 0x34f   :  { %s3940_s19 = sld [smem:[#allocation7 + $0x137]]  ;;  %v1426_v15 = vadd.f32 %v1425_v22, %v1424_v21  ;;  %v1427_v26 = vadd.f32 %v1422_v0, %v1417_v57  ;;  %v1486_v57 = vstv %s3803_s28  ;;  %v1503_v21 = vstv %s3807_s21 }
 0x350   :  { %s3946_s2 = sld [smem:[#allocation7 + $0x138]]  ;;  %v1442_v45 = vstv %s3930_s17 }
 0x351   :  { %s3951_s22 = sld [smem:[#allocation8 + $0x3a]]  ;;  %v1428_v38 = vadd.f32 %v1427_v26, %v1426_v15  ;;  %v1443_v55 = vadd.f32 %v1442_v45, %v1441_v17  ;;  %v1505_v15 = vstv %s3840_s1  ;;  %v1508_v26 = vstv %s3872_s20 }
 0x352   :  { %v1432_v1 = vstv %s4974_s4  ;;  %s3957_s6 = sld [smem:[#allocation7 + $0x139]] }
 0x353   :  { %v1435_v23 = vstv %s4975_s30  ;;  %s4979_s26 = sld [smem:[#allocation97_spill]]  ;;  %v1433_v48 = vmul.f32 %v1432_v1, %v3876_v43  ;;  %v3986_v37 = vmax.f32 %v1428_v38, 0.0  ;;  %v1517_v38 = vstv %s3782_s25 }
 0x354   :  { %v1437_v59 = vstv %s4976_s9  ;;  %s3961_s7 = sld [smem:[#allocation7 + $0x13a]]  ;;  %v1436_v5 = vmul.f32 %v1435_v23, %v3900_v25 }
 0x355   :  { %v1438_v19 = vmul.f32 %v1437_v59, %v3926_v4  ;;  %s3967_s30 = sld [smem:[#allocation7 + $0x13b]]  ;;  %v1434_v16 = vadd.f32 %v1433_v48, %v1431_v52 }
 0x356   :  { %4977 = sst [smem:[#allocation114_spill]] %s3946_s2 }
 0x357   :  { %s4981_s3 = sld [smem:[#allocation98_spill]]  ;;  %v1439_v51 = vadd.f32 %v1438_v19, %v1436_v5  ;;  %v1459_v3 = vstv %s3951_s22 }
 0x358   :  { %4978 = sst [smem:[#allocation119_spill]] %s3957_s6  ;;  %v1460_v54 = vadd.f32 %v1459_v3, %v1458_v28  ;;  %v1525_v28 = vstv %s3879_s15 }
 0x359   :  { %s4982_s4 = sld [smem:[#allocation94_spill]]  ;;  %v1447_v50 = vstv %s4979_s26  ;;  %v1444_v27 = vadd.f32 %v1439_v51, %v1434_v16 }
 0x35a   :  { %4980 = sst [smem:[#allocation124_spill]] %s3961_s7  ;;  %v1448_v29 = vmul.f32 %v1447_v50, %v3874_v13 }
 0x35b   :  { %s4983_s9 = sld [smem:[#allocation95_spill]]  ;;  %v1445_v56 = vadd.f32 %v1444_v27, %v1443_v55  ;;  %v1520_v55 = vstv %s3813_s18 }
 0x35c   :  { %s3970_s6 = sld [smem:[#allocation7 + $0x13c]] }
 0x35d   :  { %s3974_s7 = sld [smem:[#allocation8 + $0x3b]]  ;;  %v1449_v30 = vstv %s4981_s3  ;;  %v4002_v41 = vmax.f32 %v1445_v56, 0.0 }
 0x35e   :  { %s3977_s27 = sld [smem:[#allocation7 + $0x13d]]  ;;  %v1450_v12 = vmul.f32 %v1449_v30, %v3876_v43 }
 0x35f   :  { %s4985_s23 = sld [smem:[#allocation102_spill]]  ;;  %v1452_v58 = vstv %s4982_s4  ;;  %v1487_v59 = vmul.f32 %v1486_v57, %v4002_v41  ;;  %v1504_v6 = vmul.f32 %v1503_v21, %v4002_v41  ;;  %v1521_v56 = vmul.f32 %v1520_v55, %v4002_v41 }
 0x360   :  { %s4986_s2 = sld [smem:[#allocation103_spill]]  ;;  %v1453_v14 = vmul.f32 %v1452_v58, %v3900_v25  ;;  %v1451_v31 = vadd.f32 %v1450_v12, %v1448_v29  ;;  %v1522_v29 = vstv %s3849_s10 }
 0x361   :  { %v1454_v42 = vstv %s4983_s9  ;;  %s3990_s17 = sld [smem:[#allocation7 + $0x13f]] }
 0x362   :  { %4984 = sst [smem:[#allocation129_spill]] %s3970_s6  ;;  %v1455_v32 = vmul.f32 %v1454_v42, %v3926_v4 }
 0x363   :  { %s3982_s6 = sld [smem:[#allocation7 + $0x13e]]  ;;  %v1476_v20 = vstv %s3974_s7 }
 0x364   :  { %s4989_s26 = sld [smem:[#allocation99_spill]]  ;;  %v1456_v35 = vadd.f32 %v1455_v32, %v1453_v14  ;;  %v1518_v14 = vmul.f32 %v1517_v38, %v3986_v37 }
 0x365   :  { %s4990_s3 = sld [smem:[#allocation100_spill]]  ;;  %v1464_v33 = vstv %s4985_s23 }
 0x366   :  { %s3995_s4 = sld [smem:[#allocation8 + $0x3c]]  ;;  %v1466_v34 = vstv %s4986_s2  ;;  %v1465_v11 = vmul.f32 %v1464_v33, %v3874_v13  ;;  %v1461_v61 = vadd.f32 %v1456_v35, %v1451_v31 }
 0x367   :  { %4988 = sst [smem:[#allocation115_spill]] %s3990_s17  ;;  %v1467_v39 = vmul.f32 %v1466_v34, %v3876_v43  ;;  %v1475_v43 = vmul.f32 %v1474_v9, %v3948_v46  ;;  %v1488_v46 = vstv %s3834_s24 }
 0x368   :  { %s4000_s9 = sld [smem:[#allocation7 + $0x140]]  ;;  %v1462_v22 = vadd.f32 %v1461_v61, %v1460_v54 }
 0x369   :  { %4987 = sst [smem:[#allocation110_spill]] %s3982_s6  ;;  %v1468_v60 = vadd.f32 %v1467_v39, %v1465_v11 }
 0x36a   :  { %s4991_s17 = sld [smem:[#allocation91_spill]]  ;;  %v1469_v36 = vstv %s4989_s26  ;;  %v4032_v52 = vmax.f32 %v1462_v22, 0.0 }
 0x36b   :  { %s4992_s5 = sld [smem:[#allocation112_spill]]  ;;  %v1471_v44 = vstv %s4990_s3  ;;  %v1470_v53 = vmul.f32 %v1469_v36, %v3900_v25 }
 0x36c   :  { %s4006_s22 = sld [smem:[#allocation8 + $0x3d]]  ;;  %v1472_v13 = vmul.f32 %v1471_v44, %v3926_v4  ;;  %v1477_v4 = vadd.f32 %v1476_v20, %v1475_v43  ;;  %v1493_v49 = vstv %s3995_s4  ;;  %v1489_v5 = vmul.f32 %v1488_v46, %v4032_v52 }
 0x36d   :  { %s4011_s23 = sld [smem:[#allocation7 + $0x141]]  ;;  %v1506_v50 = vmul.f32 %v1505_v15, %v4032_v52  ;;  %v1523_v32 = vmul.f32 %v1522_v29, %v4032_v52  ;;  %v1534_v44 = vstv %s3787_s14  ;;  %v1537_v20 = vstv %s3824_s13 }
 0x36e   :  { %s4015_s2 = sld [smem:[#allocation7 + $0x142]]  ;;  %v1473_v62 = vadd.f32 %v1472_v13, %v1470_v53  ;;  %v1490_v51 = vadd.f32 %v1489_v5, %v1487_v59  ;;  %v1535_v53 = vmul.f32 %v1534_v44, %v3986_v37  ;;  %v1605_v44 = vstv %s3977_s27 }
 0x36f   :  { %s4021_s26 = sld [smem:[#allocation7 + $0x143]]  ;;  %v1507_v58 = vadd.f32 %v1506_v50, %v1504_v6  ;;  %v1524_v34 = vadd.f32 %v1523_v32, %v1521_v56  ;;  %v1571_v50 = vstv %s3967_s30 }
 0x370   :  { %v1481_v10 = vstv %s4991_s17  ;;  %s4993_s8 = sld [smem:[#allocation96_spill]]  ;;  %v1478_v1 = vadd.f32 %v1473_v62, %v1468_v60  ;;  %v1538_v62 = vmul.f32 %v1537_v20, %v4002_v41 }
 0x371   :  { %v1483_v40 = vstv %s4992_s5  ;;  %s4994_s3 = sld [smem:[#allocation117_spill]]  ;;  %v1482_v24 = vmul.f32 %v1481_v10, %v3984_v8  ;;  %v1539_v10 = vstv %s3855_s16 }
 0x372   :  { %v1484_v25 = vmul.f32 %v1483_v40, %v3986_v37  ;;  %s4025_s6 = sld [smem:[#allocation7 + $0x144]]  ;;  %v1479_v48 = vadd.f32 %v1478_v1, %v1477_v4  ;;  %v1510_v17 = vstv %s4006_s22 }
 0x373   :  { %s4030_s7 = sld [smem:[#allocation7 + $0x145]] }
 0x374   :  { %v1485_v23 = vadd.f32 %v1484_v25, %v1482_v24  ;;  %s4035_s17 = sld [smem:[#allocation8 + $0x3e]]  ;;  %v4054_v16 = vmax.f32 %v1479_v48, 0.0  ;;  %v1540_v24 = vmul.f32 %v1539_v10, %v4032_v52  ;;  %v1542_v25 = vstv %s3889_s29 }
 0x375   :  { %s4041_s28 = sld [smem:[#allocation7 + $0x146]] }
 0x376   :  { %v1498_v2 = vstv %s4993_s8  ;;  %s4995_s24 = sld [smem:[#allocation101_spill]]  ;;  %v1492_v27 = vmul.f32 %v1491_v47, %v4054_v16  ;;  %v1495_v30 = vadd.f32 %v1490_v51, %v1485_v23  ;;  %v1509_v42 = vmul.f32 %v1508_v26, %v4054_v16 }
 0x377   :  { %v1500_v0 = vstv %s4994_s3  ;;  %v1499_v19 = vmul.f32 %v1498_v2, %v3984_v8  ;;  %s4046_s11 = sld [smem:[#allocation7 + $0x147]]  ;;  %v1526_v35 = vmul.f32 %v1525_v28, %v4054_v16  ;;  %v1541_v1 = vadd.f32 %v1540_v24, %v1538_v62 }
 0x378   :  { %v1501_v7 = vmul.f32 %v1500_v0, %v3986_v37  ;;  %s4052_s21 = sld [smem:[#allocation7 + $0x148]]  ;;  %v1494_v63 = vadd.f32 %v1493_v49, %v1492_v27  ;;  %v1511_v3 = vadd.f32 %v1510_v17, %v1509_v42  ;;  %v1543_v23 = vmul.f32 %v1542_v25, %v4054_v16 }
 0x379   :  { %s4057_s4 = sld [smem:[#allocation7 + $0x149]]  ;;  %v1576_v29 = vstv %s4030_s7  ;;  %v1585_v42 = vstv %s3940_s19 }
 0x37a   :  { %v1502_v45 = vadd.f32 %v1501_v7, %v1499_v19  ;;  %s4063_s5 = sld [smem:[#allocation8 + $0x3f]]  ;;  %v1527_v11 = vstv %s4035_s17  ;;  %v1496_v39 = vadd.f32 %v1495_v30, %v1494_v63 }
 0x37b   :  { %s4067_s1 = sld [smem:[#allocation7 + $0x14a]]  ;;  %v1528_v9 = vadd.f32 %v1527_v11, %v1526_v35 }
 0x37c   :  { %v1515_v18 = vstv %s4995_s24  ;;  %s4996_s25 = sld [smem:[#allocation106_spill]]  ;;  %v1512_v31 = vadd.f32 %v1507_v58, %v1502_v45  ;;  %v4090_v13 = vmax.f32 %v1496_v39, 0.0  ;;  %v1583_v58 = vstv %s3909_s12 }
 0x37d   :  { %v1516_v12 = vmul.f32 %v1515_v18, %v3984_v8  ;;  %s4073_s18 = sld [smem:[#allocation7 + $0x14b]] }
 0x37e   :  { %s4076_s10 = sld [smem:[#allocation7 + $0x14c]]  ;;  %v1513_v54 = vadd.f32 %v1512_v31, %v1511_v3  ;;  %v1584_v56 = vmul.f32 %v1583_v58, %v4090_v13  ;;  %v1590_v3 = vstv %s4011_s23  ;;  %v1593_v31 = vstv %s4041_s28 }
 0x37f   :  { %v1519_v33 = vadd.f32 %v1518_v14, %v1516_v12  ;;  %s4080_s20 = sld [smem:[#allocation8 + $0x40]] }
 0x380   :  { %s4084_s22 = sld [smem:[#allocation7 + $0x14d]]  ;;  %v4092_v43 = vmax.f32 %v1513_v54, 0.0  ;;  %v1544_v4 = vstv %s4063_s5 }
 0x381   :  { %v1529_v61 = vadd.f32 %v1524_v34, %v1519_v33  ;;  %s4998_s15 = sld [smem:[#allocation107_spill]]  ;;  %v1545_v48 = vadd.f32 %v1544_v4, %v1543_v23  ;;  %v1610_v4 = vstv %s4046_s11 }
 0x382   :  { %v1532_v36 = vstv %s4996_s25  ;;  %s4999_s8 = sld [smem:[#allocation122_spill]]  ;;  %v1586_v32 = vmul.f32 %v1585_v42, %v4092_v43  ;;  %v1641_v42 = vstv %s4025_s6 }
 0x383   :  { %v1533_v60 = vmul.f32 %v1532_v36, %v3984_v8  ;;  %s4088_s3 = sld [smem:[#allocation7 + $0x14e]]  ;;  %v1530_v40 = vadd.f32 %v1529_v61, %v1528_v9 }
 0x384   :  { %s4096_s14 = sld [smem:[#allocation7 + $0x14f]]  ;;  %v1587_v35 = vadd.f32 %v1586_v32, %v1584_v56 }
 0x385   :  { %s5001_s17 = sld [smem:[#allocation127_spill]]  ;;  %v1536_v22 = vadd.f32 %v1535_v53, %v1533_v60  ;;  %v4108_v47 = vmax.f32 %v1530_v40, 0.0 }
 0x386   :  { %4997 = sst [smem:[#allocation120_spill]] %s4084_s22 }
 0x387   :  { %s5002_s24 = sld [smem:[#allocation108_spill]]  ;;  %v1549_v57 = vstv %s4998_s15  ;;  %v1546_v5 = vadd.f32 %v1541_v1, %v1536_v22  ;;  %v1572_v55 = vmul.f32 %v1571_v50, %v4108_v47  ;;  %v1606_v40 = vmul.f32 %v1605_v44, %v4108_v47 }
 0x388   :  { %s5003_s25 = sld [smem:[#allocation113_spill]]  ;;  %v1551_v46 = vstv %s4999_s8  ;;  %v1550_v59 = vmul.f32 %v1549_v57, %v3984_v8  ;;  %v1607_v22 = vstv %s4015_s2 }
 0x389   :  { %5000 = sst [smem:[#allocation125_spill]] %s4088_s3  ;;  %v1552_v49 = vmul.f32 %v1551_v46, %v3986_v37  ;;  %v1561_v37 = vstv %s4080_s20  ;;  %v1547_v26 = vadd.f32 %v1546_v5, %v1545_v48 }
 0x38a   :  { %s4100_s22 = sld [smem:[#allocation8 + $0x41]] }
 0x38b   :  { %s4106_s3 = sld [smem:[#allocation7 + $0x150]]  ;;  %v1554_v2 = vstv %s5001_s17  ;;  %v1553_v8 = vadd.f32 %v1552_v49, %v1550_v59  ;;  %v4138_v18 = vmax.f32 %v1547_v26, 0.0 }
 0x38c   :  { %s5004_s13 = sld [smem:[#allocation118_spill]]  ;;  %v1555_v19 = vmul.f32 %v1554_v2, %v4002_v41  ;;  %v1568_v41 = vstv %s3935_s0 }
 0x38d   :  { %s4112_s16 = sld [smem:[#allocation8 + $0x42]]  ;;  %v1556_v0 = vstv %s5002_s24  ;;  %v1569_v45 = vmul.f32 %v1568_v41, %v4092_v43  ;;  %v1591_v39 = vmul.f32 %v1590_v3, %v4138_v18  ;;  %v1608_v25 = vmul.f32 %v1607_v22, %v4138_v18 }
 0x38e   :  { %v1559_v21 = vstv %s5003_s25  ;;  %s4118_s29 = sld [smem:[#allocation7 + $0x151]]  ;;  %v1557_v7 = vmul.f32 %v1556_v0, %v4032_v52 }
 0x38f   :  { %s4122_s5 = sld [smem:[#allocation7 + $0x152]]  ;;  %v1560_v6 = vmul.f32 %v1559_v21, %v4054_v16  ;;  %v1573_v16 = vstv %s4000_s9  ;;  %v1609_v49 = vadd.f32 %v1608_v25, %v1606_v40 }
 0x390   :  { %s4127_s15 = sld [smem:[#allocation7 + $0x153]]  ;;  %v1558_v17 = vadd.f32 %v1557_v7, %v1555_v19  ;;  %v1578_v30 = vstv %s4100_s22  ;;  %v1574_v14 = vmul.f32 %v1573_v16, %v4138_v18 }
 0x391   :  { %s4131_s8 = sld [smem:[#allocation7 + $0x154]]  ;;  %v1562_v52 = vadd.f32 %v1561_v37, %v1560_v6  ;;  %v1624_v37 = vstv %s4021_s26 }
 0x392   :  { %v1566_v15 = vstv %s5004_s13  ;;  %s4136_s20 = sld [smem:[#allocation7 + $0x155]]  ;;  %v1563_v38 = vadd.f32 %v1558_v17, %v1553_v8  ;;  %v1575_v34 = vadd.f32 %v1574_v14, %v1572_v55 }
 0x393   :  { %v1567_v51 = vmul.f32 %v1566_v15, %v4090_v13  ;;  %s5005_s17 = sld [smem:[#allocation129_spill]]  ;;  %v1595_v28 = vstv %s4112_s16 }
 0x394   :  { %s4142_s0 = sld [smem:[#allocation8 + $0x43]]  ;;  %v1564_v12 = vadd.f32 %v1563_v38, %v1562_v52  ;;  %v1627_v52 = vstv %s4052_s21 }
 0x395   :  { %v1570_v27 = vadd.f32 %v1569_v45, %v1567_v51  ;;  %s4147_s30 = sld [smem:[#allocation7 + $0x156]]  ;;  %v1625_v51 = vmul.f32 %v1624_v37, %v4138_v18 }
 0x396   :  { %s5006_s9 = sld [smem:[#allocation123_spill]]  ;;  %v4160_v33 = vmax.f32 %v1564_v12, 0.0 }
 0x397   :  { %s5007_s24 = sld [smem:[#allocation114_spill]]  ;;  %v1580_v61 = vadd.f32 %v1575_v34, %v1570_v27 }
 0x398   :  { %s4152_s25 = sld [smem:[#allocation7 + $0x157]]  ;;  %v1577_v9 = vmul.f32 %v1576_v29, %v4160_v33  ;;  %v1594_v60 = vmul.f32 %v1593_v31, %v4160_v33  ;;  %v1611_v1 = vmul.f32 %v1610_v4, %v4160_v33  ;;  %v1628_v38 = vmul.f32 %v1627_v52, %v4160_v33 }
 0x399   :  { %v1588_v63 = vstv %s5005_s17  ;;  %s4158_s12 = sld [smem:[#allocation7 + $0x158]] }
 0x39a   :  { %v1589_v11 = vmul.f32 %v1588_v63, %v4108_v47  ;;  %s4163_s19 = sld [smem:[#allocation7 + $0x159]]  ;;  %v1579_v62 = vadd.f32 %v1578_v30, %v1577_v9  ;;  %v1596_v24 = vadd.f32 %v1595_v28, %v1594_v60  ;;  %v1612_v23 = vstv %s4142_s0 }
 0x39b   :  { %s4169_s23 = sld [smem:[#allocation8 + $0x44]]  ;;  %v1613_v48 = vadd.f32 %v1612_v23, %v1611_v1  ;;  %v1644_v63 = vstv %s4057_s4  ;;  %v1668_v60 = vstv %s4073_s18  ;;  %v1690_v37 = vstv %s4147_s30 }
 0x39c   :  { %v1600_v54 = vstv %s5006_s9  ;;  %s4174_s7 = sld [smem:[#allocation7 + $0x15a]]  ;;  %v1592_v20 = vadd.f32 %v1591_v39, %v1589_v11  ;;  %v1581_v59 = vadd.f32 %v1580_v61, %v1579_v62  ;;  %v1645_v34 = vmul.f32 %v1644_v63, %v4160_v33 }
 0x39d   :  { %v1602_v36 = vstv %s5007_s24  ;;  %v1601_v53 = vmul.f32 %v1600_v54, %v4090_v13  ;;  %s5008_s28 = sld [smem:[#allocation128_spill]] }
 0x39e   :  { %v1603_v10 = vmul.f32 %v1602_v36, %v4092_v43  ;;  %s5009_s22 = sld [smem:[#allocation119_spill]]  ;;  %v1597_v57 = vadd.f32 %v1592_v20, %v1587_v35  ;;  %v4197_v7 = vmax.f32 %v1581_v59, 0.0  ;;  %v1656_v35 = vstv %s4131_s8 }
 0x39f   :  { %s4179_s27 = sld [smem:[#allocation7 + $0x15b]] }
 0x3a0   :  { %s4183_s13 = sld [smem:[#allocation7 + $0x15c]]  ;;  %v1604_v46 = vadd.f32 %v1603_v10, %v1601_v53  ;;  %v1598_v21 = vadd.f32 %v1597_v57, %v1596_v24  ;;  %v1658_v11 = vstv %s4163_s19  ;;  %v1670_v53 = vstv %s4106_s3 }
 0x3a1   :  { %s5010_s16 = sld [smem:[#allocation110_spill]]  ;;  %v1629_v45 = vstv %s4169_s23  ;;  %v1669_v22 = vmul.f32 %v1668_v60, %v4197_v7  ;;  %v1673_v24 = vstv %s4136_s20 }
 0x3a2   :  { %s4187_s17 = sld [smem:[#allocation8 + $0x45]]  ;;  %v1614_v8 = vadd.f32 %v1609_v49, %v1604_v46  ;;  %v4203_v15 = vmax.f32 %v1598_v21, 0.0  ;;  %v1630_v12 = vadd.f32 %v1629_v45, %v1628_v38  ;;  %v1675_v25 = vstv %s4174_s7 }
 0x3a3   :  { %v1617_v2 = vstv %s5008_s28  ;;  %s4191_s2 = sld [smem:[#allocation7 + $0x15d]] }
 0x3a4   :  { %v1619_v0 = vstv %s5009_s22  ;;  %v1618_v5 = vmul.f32 %v1617_v2, %v4090_v13  ;;  %s5011_s11 = sld [smem:[#allocation109_spill]]  ;;  %v1615_v41 = vadd.f32 %v1614_v8, %v1613_v48  ;;  %v1671_v62 = vmul.f32 %v1670_v53, %v4203_v15 }
 0x3a5   :  { %v1620_v19 = vmul.f32 %v1619_v0, %v4092_v43  ;;  %s4195_s9 = sld [smem:[#allocation7 + $0x15e]]  ;;  %v1685_v2 = vstv %s4076_s10  ;;  %v1687_v0 = vstv %s4118_s29 }
 0x3a6   :  { %s5012_s0 = sld [smem:[#allocation124_spill]]  ;;  %v4219_v27 = vmax.f32 %v1615_v41, 0.0  ;;  %v1672_v59 = vadd.f32 %v1671_v62, %v1669_v22  ;;  %v1686_v8 = vmul.f32 %v1685_v2, %v4197_v7 }
 0x3a7   :  { %v1622_v6 = vstv %s5010_s16  ;;  %s4201_s24 = sld [smem:[#allocation7 + $0x15f]]  ;;  %v1621_v26 = vadd.f32 %v1620_v19, %v1618_v5 }
 0x3a8   :  { %s5013_s28 = sld [smem:[#allocation115_spill]]  ;;  %v1623_v17 = vmul.f32 %v1622_v6, %v4108_v47  ;;  %v1646_v3 = vstv %s4187_s17  ;;  %v1657_v9 = vmul.f32 %v1656_v35, %v4219_v27  ;;  %v1674_v1 = vmul.f32 %v1673_v24, %v4219_v27 }
 0x3a9   :  { %s4207_s22 = sld [smem:[#allocation8 + $0x46]]  ;;  %v1647_v36 = vadd.f32 %v1646_v3, %v1645_v34  ;;  %v1688_v6 = vmul.f32 %v1687_v0, %v4203_v15  ;;  %v1691_v52 = vmul.f32 %v1690_v37, %v4219_v27 }
 0x3aa   :  { %v1634_v50 = vstv %s5011_s11  ;;  %s4212_s16 = sld [smem:[#allocation7 + $0x160]]  ;;  %v1626_v16 = vadd.f32 %v1625_v51, %v1623_v17 }
 0x3ab   :  { %v1635_v55 = vmul.f32 %v1634_v50, %v4090_v13  ;;  %s4217_s26 = sld [smem:[#allocation7 + $0x161]]  ;;  %v1642_v13 = vmul.f32 %v1641_v42, %v4138_v18  ;;  %v1653_v18 = vstv %s4096_s14  ;;  %v1661_v39 = vstv %s4195_s9 }
 0x3ac   :  { %v1636_v29 = vstv %s5012_s0  ;;  %s4224_s21 = sld [smem:[#allocation7 + $0x162]]  ;;  %v1631_v14 = vadd.f32 %v1626_v16, %v1621_v26  ;;  %v1654_v33 = vmul.f32 %v1653_v18, %v4203_v15  ;;  %v1692_v26 = vstv %s4179_s27 }
 0x3ad   :  { %v1637_v30 = vmul.f32 %v1636_v29, %v4092_v43  ;;  %s4228_s23 = sld [smem:[#allocation8 + $0x47]]  ;;  %v1651_v43 = vstv %s4067_s1  ;;  %v1678_v4 = vstv %s4201_s24  ;;  %v1689_v45 = vadd.f32 %v1688_v6, %v1686_v8 }
 0x3ae   :  { %v1639_v58 = vstv %s5013_s28  ;;  %s4233_s11 = sld [smem:[#allocation7 + $0x163]]  ;;  %v1632_v31 = vadd.f32 %v1631_v14, %v1630_v12  ;;  %v1704_v14 = vstv %s4122_s5 }
 0x3af   :  { %v1640_v56 = vmul.f32 %v1639_v58, %v4108_v47  ;;  %v1638_v32 = vadd.f32 %v1637_v30, %v1635_v55  ;;  %v1652_v47 = vmul.f32 %v1651_v43, %v4197_v7  ;;  %s4237_s6 = sld [smem:[#allocation7 + $0x164]]  ;;  %v1663_v61 = vstv %s4207_s22 }
 0x3b0   :  { %s4243_s4 = sld [smem:[#allocation7 + $0x165]]  ;;  %v4245_v54 = vmax.f32 %v1632_v31, 0.0  ;;  %v1695_v16 = vstv %s4212_s16  ;;  %v1705_v3 = vmul.f32 %v1704_v14, %v4203_v15 }
 0x3b1   :  { %v1643_v28 = vadd.f32 %v1642_v13, %v1640_v56  ;;  %s4248_s1 = sld [smem:[#allocation8 + $0x48]]  ;;  %v1655_v10 = vadd.f32 %v1654_v33, %v1652_v47  ;;  %v1707_v56 = vstv %s4152_s25  ;;  %v1712_v34 = vstv %s4217_s26 }
 0x3b2   :  { %s4254_s14 = sld [smem:[#allocation7 + $0x166]]  ;;  %v1659_v40 = vmul.f32 %v1658_v11, %v4245_v54  ;;  %v1676_v23 = vmul.f32 %v1675_v25, %v4245_v54  ;;  %v1693_v50 = vmul.f32 %v1692_v26, %v4245_v54  ;;  %v1708_v31 = vmul.f32 %v1707_v56, %v4219_v27 }
 0x3b3   :  { %v1648_v44 = vadd.f32 %v1643_v28, %v1638_v32  ;;  %s4258_s8 = sld [smem:[#allocation7 + $0x167]]  ;;  %v1680_v49 = vstv %s4228_s23  ;;  %v1709_v28 = vstv %s4183_s13  ;;  %v1724_v33 = vstv %s4158_s12 }
 0x3b4   :  { %s4264_s18 = sld [smem:[#allocation7 + $0x168]]  ;;  %v1660_v46 = vadd.f32 %v1659_v40, %v1657_v9  ;;  %v1677_v5 = vadd.f32 %v1676_v23, %v1674_v1  ;;  %v1694_v42 = vadd.f32 %v1693_v50, %v1691_v52  ;;  %v1710_v18 = vmul.f32 %v1709_v28, %v4245_v54 }
 0x3b5   :  { %v1649_v20 = vadd.f32 %v1648_v44, %v1647_v36  ;;  %s4270_s3 = sld [smem:[#allocation7 + $0x169]]  ;;  %v1721_v44 = vstv %s4127_s15  ;;  %v1726_v40 = vstv %s4191_s2  ;;  %v1729_v22 = vstv %s4224_s21 }
 0x3b6   :  { %s4275_s20 = sld [smem:[#allocation8 + $0x49]]  ;;  %v1665_v48 = vadd.f32 %v1660_v46, %v1655_v10  ;;  %v1682_v41 = vadd.f32 %v1677_v5, %v1672_v59  ;;  %v1699_v43 = vadd.f32 %v1694_v42, %v1689_v45  ;;  %v1711_v9 = vadd.f32 %v1710_v18, %v1708_v31 }
 0x3b7   :  { %v4266_v57 = vmax.f32 %v1649_v20, 0.0  ;;  %s4279_s19 = sld [smem:[#allocation7 + $0x16a]]  ;;  %v1697_v38 = vstv %s4248_s1  ;;  %v1722_v53 = vmul.f32 %v1721_v44, %v4203_v15  ;;  %v1725_v10 = vmul.f32 %v1724_v33, %v4219_v27 }
 0x3b8   :  { %s5014_s7 = sld [smem:[#allocation120_spill]]  ;;  %v1727_v25 = vmul.f32 %v1726_v40, %v4245_v54 }
 0x3b9   :  { %v1662_v21 = vmul.f32 %v1661_v39, %v4266_v57  ;;  %v1679_v19 = vmul.f32 %v1678_v4, %v4266_v57  ;;  %s4285_s10 = sld [smem:[#allocation7 + $0x16b]]  ;;  %v1696_v30 = vmul.f32 %v1695_v16, %v4266_v57  ;;  %v1713_v35 = vmul.f32 %v1712_v34, %v4266_v57 }
 0x3ba   :  { %s4288_s29 = sld [smem:[#allocation7 + $0x16d]]  ;;  %v1736_v4 = vstv %s4233_s11  ;;  %v1738_v46 = vstv %s4264_s18  ;;  %v1728_v23 = vadd.f32 %v1727_v25, %v1725_v10 }
 0x3bb   :  { %v1664_v17 = vadd.f32 %v1663_v61, %v1662_v21  ;;  %v1681_v51 = vadd.f32 %v1680_v49, %v1679_v19  ;;  %s4293_s17 = sld [smem:[#allocation7 + $0x16e]]  ;;  %v1698_v63 = vadd.f32 %v1697_v38, %v1696_v30  ;;  %v1753_v19 = vstv %s4237_s6 }
 0x3bc   :  { %s4297_s30 = sld [smem:[#allocation8 + $0x4a]]  ;;  %v1714_v11 = vstv %s4275_s20  ;;  %v1755_v37 = vstv %s4270_s3  ;;  %v1770_v38 = vstv %s4243_s4 }
 0x3bd   :  { %v1666_v55 = vadd.f32 %v1665_v48, %v1664_v17  ;;  %v1683_v29 = vadd.f32 %v1682_v41, %v1681_v51  ;;  %s4302_s27 = sld [smem:[#allocation7 + $0x172]]  ;;  %v1700_v39 = vadd.f32 %v1699_v43, %v1698_v63  ;;  %v1715_v61 = vadd.f32 %v1714_v11, %v1713_v35 }
 0x3be   :  { %v1702_v58 = vstv %s5014_s7  ;;  %s5015_s9 = sld [smem:[#allocation125_spill]]  ;;  %s2408_s7 = smov [#allocation9]  }
 0x3bf   :  { %v1703_v12 = vmul.f32 %v1702_v58, %v4197_v7  ;;  %v4304_v13 = vmax.f32 %v1666_v55, 0.0  ;;  %v4306_v32 = vmax.f32 %v1683_v29, 0.0  ;;  %s4309_s0 = sld [smem:[#allocation7 + $0x177]]  ;;  %v4330_v20 = vmax.f32 %v1700_v39, 0.0 }
 0x3c0   :  { %s4314_s5 = sld [smem:[#allocation8 + $0x4b]]  ;;  %v1741_v27 = vstv %s4288_s29 }
 0x3c1   :  { %v1706_v47 = vadd.f32 %v1705_v3, %v1703_v12  ;;  %s4319_s25 = sld [smem:[#allocation7 + $0x173]]  ;;  %v1737_v54 = vmul.f32 %v1736_v4, %v4304_v13  ;;  %v1742_v49 = vmul.f32 %v1741_v27, %v4330_v20  ;;  %v1754_v6 = vmul.f32 %v1753_v19, %v4304_v13 }
 0x3c2   :  { %s4324_s24 = sld [smem:[#allocation7 + $0x178]]  ;;  %v1731_v15 = vstv %s4297_s30  ;;  %v1758_v26 = vstv %s4293_s17  ;;  %v1756_v41 = vmul.f32 %v1755_v37, %v4306_v32  ;;  %v1771_v42 = vmul.f32 %v1770_v38, %v4304_v13 }
 0x3c3   :  { %s4328_s13 = sld [smem:[#allocation8 + $0x4c]]  ;;  %v1716_v62 = vadd.f32 %v1711_v9, %v1706_v47  ;;  %v1743_v2 = vstv %s4302_s27  ;;  %v1759_v52 = vmul.f32 %v1758_v26, %v4330_v20  ;;  %v1772_v12 = vstv %s4279_s19 }
 0x3c4   :  { %v1719_v36 = vstv %s5015_s9  ;;  %s4335_s15 = sld [smem:[#allocation7 + $0x16f]]  ;;  %v1757_v30 = vadd.f32 %v1756_v41, %v1754_v6  ;;  %v1773_v28 = vmul.f32 %v1772_v12, %v4306_v32 }
 0x3c5   :  { %v1720_v60 = vmul.f32 %v1719_v36, %v4197_v7  ;;  %v1730_v7 = vmul.f32 %v1729_v22, %v4266_v57  ;;  %s4339_s12 = sld [smem:[#allocation7 + $0x174]]  ;;  %v1717_v1 = vadd.f32 %v1716_v62, %v1715_v61  ;;  %v1739_v57 = vmul.f32 %v1738_v46, %v4306_v32 }
 0x3c6   :  { %s4345_s2 = sld [smem:[#allocation7 + $0x16c]]  ;;  %v1746_v0 = vstv %s4309_s0  ;;  %v1748_v5 = vstv %s4314_s5  ;;  %v1774_v44 = vadd.f32 %v1773_v28, %v1771_v42  ;;  %v1787_v61 = vstv %s4254_s14 }
 0x3c7   :  { %v1723_v24 = vadd.f32 %v1722_v53, %v1720_v60  ;;  %v1732_v59 = vadd.f32 %v1731_v15, %v1730_v7  ;;  %s4348_s28 = sld [smem:[#allocation7 + $0x179]]  ;;  %v4356_v21 = vmax.f32 %v1717_v1, 0.0  ;;  %v1740_v8 = vadd.f32 %v1739_v57, %v1737_v54 }
 0x3c8   :  { %s4354_s22 = sld [smem:[#allocation7 + $0x170]]  ;;  %v1760_v45 = vstv %s4319_s25  ;;  %v1763_v50 = vstv %s4324_s24  ;;  %v1788_v40 = vmul.f32 %v1787_v61, %v4304_v13  ;;  %v1789_v62 = vstv %s4285_s10  ;;  %s1843_s10 = sshll.u32 %s2408_s7, 4  ;;  %s1844_s10 = int_to_ptr.vmem [resolvable:$true] %s1843_s10 }
 0x3c9   :  { %v1733_v48 = vadd.f32 %v1728_v23, %v1723_v24  ;;  %s4360_s16 = sld [smem:[#allocation8 + $0x4d]]  ;;  %v1744_v51 = vmul.f32 %v1743_v2, %v4356_v21  ;;  %v1765_v16 = vstv %s4328_s13  ;;  %v1761_v58 = vmul.f32 %v1760_v45, %v4356_v21 }
 0x3ca   :  { %s4365_s26 = sld [smem:[#allocation7 + $0x171]]  ;;  %v1775_v14 = vstv %s4335_s15  ;;  %v1790_v4 = vmul.f32 %v1789_v62, %v4306_v32 }
 0x3cb   :  { %v1734_v17 = vadd.f32 %v1733_v48, %v1732_v59  ;;  %s4370_s21 = sld [smem:[#allocation7 + $0x175]]  ;;  %v1745_v29 = vadd.f32 %v1744_v51, %v1742_v49  ;;  %v1777_v56 = vstv %s4339_s12  ;;  %v1762_v43 = vadd.f32 %v1761_v58, %v1759_v52 }
 0x3cc   :  { %s4376_s23 = sld [smem:[#allocation7 + $0x17a]]  ;;  %v1776_v34 = vmul.f32 %v1775_v14, %v4330_v20  ;;  %v1778_v47 = vmul.f32 %v1777_v56, %v4356_v21  ;;  %v1791_v54 = vadd.f32 %v1790_v4, %v1788_v40  ;;  %v1804_v49 = vstv %s4258_s8 }
 0x3cd   :  { %v4378_v55 = vmax.f32 %v1734_v17, 0.0  ;;  %s4381_s11 = sld [smem:[#allocation8 + $0x4e]]  ;;  %v1750_v3 = vadd.f32 %v1745_v29, %v1740_v8  ;;  %v1780_v18 = vstv %s4348_s28  ;;  %v1767_v39 = vadd.f32 %v1762_v43, %v1757_v30 }
 0x3ce   :  { %s4387_s6 = sld [smem:[#allocation7 + $0x176]]  ;;  %v1779_v33 = vadd.f32 %v1778_v47, %v1776_v34  ;;  %v1792_v24 = vstv %s4354_s22  ;;  %v1806_v2 = vstv %s4345_s2 }
 0x3cf   :  { %v1747_v63 = vmul.f32 %v1746_v0, %v4378_v55  ;;  %v1764_v31 = vmul.f32 %v1763_v50, %v4378_v55  ;;  %s4391_s4 = sld [smem:[#allocation7 + $0x17b]]  ;;  %v1781_v36 = vmul.f32 %v1780_v18, %v4378_v55  ;;  %v1782_v9 = vstv %s4360_s16 }
 0x3d0   :  { %s4397_s1 = sld [smem:[#allocation7 + $0x17c]]  ;;  %v1784_v22 = vadd.f32 %v1779_v33, %v1774_v44  ;;  %v1793_v46 = vmul.f32 %v1792_v24, %v4330_v20  ;;  %v1807_v19 = vmul.f32 %v1806_v2, %v4306_v32  ;;  %v1809_v6 = vstv %s4365_s26 }
 0x3d1   :  { %v1749_v35 = vadd.f32 %v1748_v5, %v1747_v63  ;;  %v1766_v11 = vadd.f32 %v1765_v16, %v1764_v31  ;;  %s4400_s18 = sld [smem:[#allocation7 + $0x17d]]  ;;  %v1783_v10 = vadd.f32 %v1782_v9, %v1781_v36  ;;  %v1794_v25 = vstv %s4370_s21 }
 0x3d2   :  { %s4404_s3 = sld [smem:[#allocation8 + $0x4f]]  ;;  %v1795_v1 = vmul.f32 %v1794_v25, %v4356_v21  ;;  %v1797_v23 = vstv %s4376_s23  ;;  %v1805_v5 = vmul.f32 %v1804_v49, %v4304_v13  ;;  %v1810_v41 = vmul.f32 %v1809_v6, %v4330_v20 }
 0x3d3   :  { %v1751_v60 = vadd.f32 %v1750_v3, %v1749_v35  ;;  %v1768_v53 = vadd.f32 %v1767_v39, %v1766_v11  ;;  %s4407_s20 = sld [smem:[#allocation7 + $0x17e]]  ;;  %v1785_v27 = vadd.f32 %v1784_v22, %v1783_v10  ;;  %v1799_v59 = vstv %s4381_s11 }
 0x3d4   :  { %s4412_s19 = sld [smem:[#allocation7 + $0x17f]]  ;;  %v1798_v57 = vmul.f32 %v1797_v23, %v4378_v55  ;;  %v1796_v48 = vadd.f32 %v1795_v1, %v1793_v46  ;;  %v1811_v37 = vstv %s4387_s6  ;;  %v1808_v51 = vadd.f32 %v1807_v19, %v1805_v5 }
 0x3d5   :  { %v1752_v7 = vmax.f32 %v1751_v60, 0.0  ;;  %v1769_v15 = vmax.f32 %v1768_v53, 0.0  ;;  %v1786_v0 = vmax.f32 %v1785_v27, 0.0  ;;  %s4424_s14 = sld [smem:[#allocation7 + $0x180]]  ;;  %v1814_v26 = vstv %s4391_s4 }
 0x3d6   :  { %v1800_v8 = vadd.f32 %v1799_v59, %v1798_v57  ;;  %v1801_v17 = vadd.f32 %v1796_v48, %v1791_v54  ;;  %v1812_v52 = vmul.f32 %v1811_v37, %v4356_v21  ;;  %s2320_s8 = sld [smem:[#allocation8 + $0x50]]  ;;  %v1815_v45 = vmul.f32 %v1814_v26, %v4378_v55 }
 0x3d7   :  { %v1821_v32 = vstv %s4397_s1  ;;  %v1823_v50 = vstv %s4400_s18  ;;  %s5016_s30 = sld [smem:[#allocation155_spill]] }
 0x3d8   :  { %v1816_v13 = vstv %s4404_s3  ;;  %v1802_v16 = vadd.f32 %v1801_v17, %v1800_v8  ;;  %v1813_v38 = vadd.f32 %v1812_v52, %v1810_v41  ;;  %v1822_v29 = vmul.f32 %v1821_v32, %v1752_v7 }
 0x3d9   :  { %v1824_v30 = vmul.f32 %v1823_v50, %v1769_v15  ;;  %v1817_v58 = vadd.f32 %v1816_v13, %v1815_v45  ;;  %v1826_v42 = vstv %s4407_s20 }
 0x3da   :  { %v1828_v12 = vstv %s4412_s19  ;;  %v1803_v14 = vmax.f32 %v1802_v16, 0.0  ;;  %v1818_v56 = vadd.f32 %v1813_v38, %v1808_v51  ;;  %v1827_v63 = vmul.f32 %v1826_v42, %v1786_v0 }
 0x3db   :  { %v1825_v3 = vadd.f32 %v1824_v30, %v1822_v29  ;;  %v1831_v43 = vstv %s4424_s14 }
 0x3dc   :  { %v1819_v20 = vadd.f32 %v1818_v56, %v1817_v58  ;;  %v1829_v21 = vmul.f32 %v1828_v12, %v1803_v14  ;;  %v1833_v28 = vstv %s2320_s8 }
 0x3dd   :  { %s1845_s27 = sshll.u32 %s5016_s30, 4  ;;  %s1846_s27 = int_to_ptr.hbm [resolvable:$true] %s1845_s27 }
 0x3de   :  { %v1820_v31 = vmax.f32 %v1819_v20, 0.0  ;;  %v1830_v55 = vadd.f32 %v1829_v21, %v1827_v63 }
 0x3e0   :  { %v1832_v34 = vmul.f32 %v1831_v43, %v1820_v31  ;;  %v1835_v47 = vadd.f32 %v1830_v55, %v1825_v3 }
 0x3e2   :  { %v1834_v18 = vadd.f32 %v1833_v28, %v1832_v34 }
 0x3e4   :  { %v1836_v35 = vadd.f32 %v1835_v47, %v1834_v18 }
 0x3e6   :  { %1837 = vst [vmem:[#allocation9] sm:$0xff] %v1836_v35 }
 0x3e7   :  { %1848 = dma.vmem_to_hbm [thread:$0]  %s1844_s10, 128, %s1846_s27, [#allocation4]  }
 0x3e8   :  { %2403 = dma.done.wait [#allocation4], 128  }
 0x3e9   :  { %2404 = vsyncadd [#allocation4], 4294967168 }
 0x3ea   :  { %1853 = vsyncpa [#allocation3], 1 }
 0x3eb   :  { %1854 = vsyncpa [#allocation4], 1 }
 0x3ec   :  { %1855 = vsyncpa [#allocation5], 1 }
 0x3ed   :  { %1856 = vsyncpa [#allocation6], 1 }

</bundles_post_ra>
